<compile_context>
chip_gen: v6e
topology: v6e:2x2x1
jax: 0.10.0
libtpu: 0.0.40
codegen_flags: <defaults>
</compile_context>

<pallas_src>
import jax
import jax.numpy as jnp
from jax import lax
from jax.experimental import pallas as pl
from jax.experimental.pallas import tpu as pltpu


def _mish(x):
    # torch.nn.Mish: x * tanh(softplus(x)), softplus thresholded at 20.
    # Single-exp identity: tanh(log1p(e)) = (e^2 + 2e) / (e^2 + 2e + 2).
    e = jnp.exp(jnp.minimum(x, 20.0))            # EUP; clamp keeps padded/tail columns finite
    t = e * (e + 2.0)
    d = t + 2.0
    inv = pl.reciprocal(d, approx=True)          # EUP slot
    inv = inv * (2.0 - d * inv)                  # one Newton step (VPU) -> ~full f32 precision
    # x > 20: softplus(x) ~= x, tanh ~= 1  =>  mish(x) ~= x (matches torch exactly in f32)
    return jnp.where(x > 20.0, x, x * t * inv)


def _residual_mlp_kernel(
    x_ref,                      # (block_b, input_dim)   batch-major, straight from HBM
    w_in_ref, b_in_ref,         # (hidden, input_dim), (hidden, 1)
    w_r1_ref, b_r1_ref,         # (hidden, hidden),    (hidden, 1)
    w_out_ref,                  # (out, hidden)
    w_of_ref,                   # (out, hidden)  = W_out @ W_r2   (folded)
    b_fold_ref,                 # (1, out)       = (W_out @ b_r2 + b_out)^T
    o_ref,                      # (block_b, out)
):
    x = x_ref[...]

    # h^T = W_in @ x^T  -> (hidden, block_b): contract input_dim of both operands.
    # Batch sits on the 128-lane axis -> lane-dense VPU/EUP work for mish.
    h = lax.dot_general(
        w_in_ref[...], x, (((1,), (1,)), ((), ())),
        preferred_element_type=jnp.float32) + b_in_ref[...]

    # ResBlock inner path (dropout=0, use_norm=False).
    t = _mish(h)
    t = jnp.dot(w_r1_ref[...], t, preferred_element_type=jnp.float32) + b_r1_ref[...]
    t = _mish(t)

    # Folded output projection, emitted batch-major:
    #   y = h^T @ W_out^T + t^T @ W_of^T + b_fold    -> (block_b, out)
    y = lax.dot_general(h, w_out_ref[...], (((0,), (1,)), ((), ())),
                        preferred_element_type=jnp.float32)
    y = y + lax.dot_general(t, w_of_ref[...], (((0,), (1,)), ((), ())),
                            preferred_element_type=jnp.float32)
    y = y + b_fold_ref[...]
    o_ref[...] = y.astype(o_ref.dtype)


def residual_mlp_forward(x, params, *, block_b=None):
    """x: (B, input_dim) float32.

    params: torch-layout weights (out_features, in_features) and biases (out_features, 1).
    Returns (B, output_dim) float32.
    """
    B, input_dim = x.shape
    hidden_dim = params["w_in"].shape[0]
    output_dim = params["w_out"].shape[0]

    # Fold the ResBlock's second linear into the output projection (tiny 4x64 matmuls,
    # wrapper-side): y = W_out@h + (W_out@W_r2)@mish(...) + (W_out@b_r2 + b_out).
    w_of = params["w_out"] @ params["w_r2"]                              # (out, hidden)
    b_fold = (params["w_out"] @ params["b_r2"] + params["b_out"]).T      # (1, out)

    # Batch tile selection:
    #   * B <= 2048: single grid step (per-step ~0.35us overhead dominates at this size;
    #     optimal on single-TC v5e/v6e, fine on v7x).
    #   * larger B: >= 2 balanced 128-aligned tiles so "parallel" shards over v7x's 2 TCs.
    if block_b is None:
        if B <= 2048:
            block_b = B
        else:
            block_b = min(4096, ((pl.cdiv(B, 2) + 127) // 128) * 128)
    block_b = min(block_b, B)
    grid_b = pl.cdiv(B, block_b)     # partial tail blocks are fine: batch rows independent

    def rep(shape):
        # Full (untiled) weight/bias block, resident in VMEM across the batch grid.
        return pl.BlockSpec(shape, lambda i, _n=len(shape): (0,) * _n)

    grid_spec = pltpu.PrefetchScalarGridSpec(
        num_scalar_prefetch=0,
        grid=(grid_b,),
        in_specs=[
            pl.BlockSpec((block_b, input_dim), lambda i: (i, 0)),
            rep((hidden_dim, input_dim)), rep((hidden_dim, 1)),
            rep((hidden_dim, hidden_dim)), rep((hidden_dim, 1)),
            rep((output_dim, hidden_dim)),
            rep((output_dim, hidden_dim)),
            rep((1, output_dim)),
        ],
        out_specs=pl.BlockSpec((block_b, output_dim), lambda i: (i, 0)),
    )

    return pl.pallas_call(
        _residual_mlp_kernel,
        out_shape=jax.ShapeDtypeStruct((B, output_dim), jnp.float32),
        grid_spec=grid_spec,
        compiler_params=pltpu.CompilerParams(
            dimension_semantics=("parallel",),   # batch tiles independent (v7x megacore)
        ),
    )(
        x,
        params["w_in"], params["b_in"],
        params["w_r1"], params["b_r1"],
        params["w_out"], w_of, b_fold,
    )


def init_params(key, input_dim, hidden_dim, output_dim):
    """Deterministic torch-like (kaiming-uniform) init; weights stored (out, in)."""
    def linear(key, fan_in, fan_out):
        kw, kb = jax.random.split(key)
        bound = 1.0 / jnp.sqrt(fan_in)
        w = jax.random.uniform(kw, (fan_out, fan_in), jnp.float32, -bound, bound)
        b = jax.random.uniform(kb, (fan_out, 1), jnp.float32, -bound, bound)
        return w, b

    k0, k1, k2, k3 = jax.random.split(key, 4)
    w_in, b_in = linear(k0, input_dim, hidden_dim)
    w_r1, b_r1 = linear(k1, hidden_dim, hidden_dim)
    w_r2, b_r2 = linear(k2, hidden_dim, hidden_dim)
    w_out, b_out = linear(k3, hidden_dim, output_dim)
    return dict(
        w_in=w_in, b_in=b_in,
        w_r1=w_r1, b_r1=b_r1,
        w_r2=w_r2, b_r2=b_r2,
        w_out=w_out, b_out=b_out,
    )


def reference_forward(x, p):
    """Plain-JAX reference matching the PyTorch module semantics (unfused)."""
    def mish(v):
        return v * jnp.tanh(jax.nn.softplus(v))
    h = x @ p["w_in"].T + p["b_in"][:, 0]
    t = mish(h) @ p["w_r1"].T + p["b_r1"][:, 0]
    t = mish(t) @ p["w_r2"].T + p["b_r2"][:, 0]
    h = h + t
    return h @ p["w_out"].T + p["b_out"][:, 0]


if __name__ == "__main__":
    # ResidualMLPNetwork(input_dim=16, hidden_dim=64, num_hidden_layers=2,
    #                    output_dim=4, dropout=0, activation='Mish')
    B, input_dim, hidden_dim, output_dim = 512, 16, 64, 4

    key = jax.random.PRNGKey(0)
    kx, kp = jax.random.split(key)
    x = jax.random.normal(kx, (B, input_dim), jnp.float32)
    params = init_params(kp, input_dim, hidden_dim, output_dim)

    # Default path: single grid step for B=512 (the shipped configuration).
    out = jax.block_until_ready(residual_mlp_forward(x, params))
    ref = reference_forward(x, params)
    assert out.shape == (B, output_dim)
    assert jnp.allclose(out, ref, atol=1e-4, rtol=1e-4), "mismatch vs reference (single step)"

    # Multi-step grid with a partial tail block (exercises grid + masked writeback).
    x_big = jax.random.normal(jax.random.PRNGKey(1), (640, input_dim), jnp.float32)
    out_big = jax.block_until_ready(residual_mlp_forward(x_big, params, block_b=256))
    assert jnp.allclose(out_big, reference_forward(x_big, params),
                        atol=1e-4, rtol=1e-4), "mismatch vs reference (grid + tail)"

    # Tiny-batch path: block_b clamps to B, grid collapses to a single step.
    x_small = jax.random.normal(jax.random.PRNGKey(2), (16, input_dim), jnp.float32)
    out_small = jax.block_until_ready(residual_mlp_forward(x_small, params))
    assert jnp.allclose(out_small, reference_forward(x_small, params),
                        atol=1e-4, rtol=1e-4), "mismatch vs reference (small batch)"

    # TODO(synk): dropout>0 / BatchNorm / spectral_norm branches of the module are not
    # exercised by this config (dropout=0, use_norm=False, use_spectral_norm=False).
    print("KERNEL_OK")
</pallas_src>

<mosaic_0001>
module attributes {stable_mosaic.version = 11 : i64} {
  func.func @_residual_mlp_kernel(%arg0: i32, %arg1: memref<512x16xf32, #tpu.memory_space<vmem>>, %arg2: memref<64x16xf32, #tpu.memory_space<vmem>>, %arg3: memref<64x1xf32, #tpu.memory_space<vmem>>, %arg4: memref<64x64xf32, #tpu.memory_space<vmem>>, %arg5: memref<64x1xf32, #tpu.memory_space<vmem>>, %arg6: memref<4x64xf32, #tpu.memory_space<vmem>>, %arg7: memref<4x64xf32, #tpu.memory_space<vmem>>, %arg8: memref<1x4xf32, #tpu.memory_space<vmem>>, %arg9: memref<512x4xf32, #tpu.memory_space<vmem>>) attributes {dimension_semantics = [#tpu.dimension_semantics<parallel>], iteration_bounds = array<i64: 1>, scalar_prefetch = 0 : i64, scratch_operands = 0 : i64, tpu.core_type = #tpu.core_type<tc>, window_params = [{transform_indices = @transform_0, window_bounds = array<i64: 512, 16>}, {pipeline_mode = #tpu.pipeline_mode<synchronous>, transform_indices = @transform_1, window_bounds = array<i64: 64, 16>}, {pipeline_mode = #tpu.pipeline_mode<synchronous>, transform_indices = @transform_2, window_bounds = array<i64: 64, 1>}, {pipeline_mode = #tpu.pipeline_mode<synchronous>, transform_indices = @transform_3, window_bounds = array<i64: 64, 64>}, {pipeline_mode = #tpu.pipeline_mode<synchronous>, transform_indices = @transform_4, window_bounds = array<i64: 64, 1>}, {pipeline_mode = #tpu.pipeline_mode<synchronous>, transform_indices = @transform_5, window_bounds = array<i64: 4, 64>}, {pipeline_mode = #tpu.pipeline_mode<synchronous>, transform_indices = @transform_6, window_bounds = array<i64: 4, 64>}, {pipeline_mode = #tpu.pipeline_mode<synchronous>, transform_indices = @transform_7, window_bounds = array<i64: 1, 4>}, {transform_indices = @transform_8, window_bounds = array<i64: 512, 4>}]} {
    %c0 = arith.constant 0 : index
    %c0_0 = arith.constant 0 : index
    %0 = vector.load %arg1[%c0, %c0_0] : memref<512x16xf32, #tpu.memory_space<vmem>>, vector<512x16xf32>
    %c0_1 = arith.constant 0 : index
    %c0_2 = arith.constant 0 : index
    %1 = vector.load %arg2[%c0_1, %c0_2] : memref<64x16xf32, #tpu.memory_space<vmem>>, vector<64x16xf32>
    %cst = arith.constant dense<0.000000e+00> : vector<64x512xf32>
    %2 = tpu.matmul %1, %0, %cst {dimension_numbers = #tpu.dot_dimension_numbers<[1], [1], [0], [0], [0, 0, 1, 0], [], []>} : vector<64x16xf32>, vector<512x16xf32>, vector<64x512xf32> -> vector<64x512xf32>
    %c0_3 = arith.constant 0 : index
    %c0_4 = arith.constant 0 : index
    %3 = vector.load %arg3[%c0_3, %c0_4] : memref<64x1xf32, #tpu.memory_space<vmem>>, vector<64x1xf32>
    %4 = vector.broadcast %3 : vector<64x1xf32> to vector<64x512xf32>
    %5 = arith.addf %2, %4 : vector<64x512xf32>
    %cst_5 = arith.constant 2.000000e+01 : f32
    %6 = vector.broadcast %cst_5 : f32 to vector<64x512xf32>
    %7 = arith.minimumf %5, %6 : vector<64x512xf32>
    %8 = math.exp %7 : vector<64x512xf32>
    %cst_6 = arith.constant 2.000000e+00 : f32
    %9 = vector.broadcast %cst_6 : f32 to vector<64x512xf32>
    %10 = arith.addf %8, %9 : vector<64x512xf32>
    %11 = arith.mulf %8, %10 : vector<64x512xf32>
    %cst_7 = arith.constant 2.000000e+00 : f32
    %12 = vector.broadcast %cst_7 : f32 to vector<64x512xf32>
    %13 = arith.addf %11, %12 : vector<64x512xf32>
    %14 = tpu.reciprocal %13 {approx = true} : vector<64x512xf32> -> vector<64x512xf32>
    %15 = arith.mulf %13, %14 : vector<64x512xf32>
    %cst_8 = arith.constant 2.000000e+00 : f32
    %16 = vector.broadcast %cst_8 : f32 to vector<64x512xf32>
    %17 = arith.subf %16, %15 : vector<64x512xf32>
    %18 = arith.mulf %14, %17 : vector<64x512xf32>
    %cst_9 = arith.constant 2.000000e+01 : f32
    %19 = vector.broadcast %cst_9 : f32 to vector<64x512xf32>
    %20 = arith.cmpf ogt, %5, %19 : vector<64x512xf32>
    %21 = arith.mulf %5, %11 : vector<64x512xf32>
    %22 = arith.mulf %21, %18 : vector<64x512xf32>
    %23 = arith.select %20, %5, %22 : vector<64x512xi1>, vector<64x512xf32>
    %c0_10 = arith.constant 0 : index
    %c0_11 = arith.constant 0 : index
    %24 = vector.load %arg4[%c0_10, %c0_11] : memref<64x64xf32, #tpu.memory_space<vmem>>, vector<64x64xf32>
    %cst_12 = arith.constant dense<0.000000e+00> : vector<64x512xf32>
    %25 = tpu.matmul %24, %23, %cst_12 {dimension_numbers = #tpu.dot_dimension_numbers<[1], [0], [0], [1], [0, 0, 1, 1], [], []>} : vector<64x64xf32>, vector<64x512xf32>, vector<64x512xf32> -> vector<64x512xf32>
    %c0_13 = arith.constant 0 : index
    %c0_14 = arith.constant 0 : index
    %26 = vector.load %arg5[%c0_13, %c0_14] : memref<64x1xf32, #tpu.memory_space<vmem>>, vector<64x1xf32>
    %27 = vector.broadcast %26 : vector<64x1xf32> to vector<64x512xf32>
    %28 = arith.addf %25, %27 : vector<64x512xf32>
    %cst_15 = arith.constant 2.000000e+01 : f32
    %29 = vector.broadcast %cst_15 : f32 to vector<64x512xf32>
    %30 = arith.minimumf %28, %29 : vector<64x512xf32>
    %31 = math.exp %30 : vector<64x512xf32>
    %cst_16 = arith.constant 2.000000e+00 : f32
    %32 = vector.broadcast %cst_16 : f32 to vector<64x512xf32>
    %33 = arith.addf %31, %32 : vector<64x512xf32>
    %34 = arith.mulf %31, %33 : vector<64x512xf32>
    %cst_17 = arith.constant 2.000000e+00 : f32
    %35 = vector.broadcast %cst_17 : f32 to vector<64x512xf32>
    %36 = arith.addf %34, %35 : vector<64x512xf32>
    %37 = tpu.reciprocal %36 {approx = true} : vector<64x512xf32> -> vector<64x512xf32>
    %38 = arith.mulf %36, %37 : vector<64x512xf32>
    %cst_18 = arith.constant 2.000000e+00 : f32
    %39 = vector.broadcast %cst_18 : f32 to vector<64x512xf32>
    %40 = arith.subf %39, %38 : vector<64x512xf32>
    %41 = arith.mulf %37, %40 : vector<64x512xf32>
    %cst_19 = arith.constant 2.000000e+01 : f32
    %42 = vector.broadcast %cst_19 : f32 to vector<64x512xf32>
    %43 = arith.cmpf ogt, %28, %42 : vector<64x512xf32>
    %44 = arith.mulf %28, %34 : vector<64x512xf32>
    %45 = arith.mulf %44, %41 : vector<64x512xf32>
    %46 = arith.select %43, %28, %45 : vector<64x512xi1>, vector<64x512xf32>
    %c0_20 = arith.constant 0 : index
    %c0_21 = arith.constant 0 : index
    %47 = vector.load %arg6[%c0_20, %c0_21] : memref<4x64xf32, #tpu.memory_space<vmem>>, vector<4x64xf32>
    %cst_22 = arith.constant dense<0.000000e+00> : vector<512x4xf32>
    %48 = tpu.matmul %5, %47, %cst_22 {dimension_numbers = #tpu.dot_dimension_numbers<[0], [1], [1], [0], [0, 1, 1, 0], [], []>} : vector<64x512xf32>, vector<4x64xf32>, vector<512x4xf32> -> vector<512x4xf32>
    %c0_23 = arith.constant 0 : index
    %c0_24 = arith.constant 0 : index
    %49 = vector.load %arg7[%c0_23, %c0_24] : memref<4x64xf32, #tpu.memory_space<vmem>>, vector<4x64xf32>
    %cst_25 = arith.constant dense<0.000000e+00> : vector<512x4xf32>
    %50 = tpu.matmul %46, %49, %cst_25 {dimension_numbers = #tpu.dot_dimension_numbers<[0], [1], [1], [0], [0, 1, 1, 0], [], []>} : vector<64x512xf32>, vector<4x64xf32>, vector<512x4xf32> -> vector<512x4xf32>
    %51 = arith.addf %48, %50 : vector<512x4xf32>
    %c0_26 = arith.constant 0 : index
    %c0_27 = arith.constant 0 : index
    %52 = vector.load %arg8[%c0_26, %c0_27] : memref<1x4xf32, #tpu.memory_space<vmem>>, vector<1x4xf32>
    %53 = vector.broadcast %52 : vector<1x4xf32> to vector<512x4xf32>
    %54 = arith.addf %51, %53 : vector<512x4xf32>
    %c0_28 = arith.constant 0 : index
    %c0_29 = arith.constant 0 : index
    %55 = vector.load %arg9[%c0_28, %c0_29] : memref<512x4xf32, #tpu.memory_space<vmem>>, vector<512x4xf32>
    tpu.vector_store %arg9[%c0_28, %c0_29], %54 {strides = array<i32>} : memref<512x4xf32, #tpu.memory_space<vmem>>, vector<512x4xf32>,
    return
  }
  func.func @transform_0(%arg0: i32) -> (i32, i32) {
    %c0_i32 = arith.constant 0 : i32
    %c0_i32_0 = arith.constant 0 : i32
    return %arg0, %c0_i32 : i32, i32
  }
  func.func @transform_1(%arg0: i32) -> (i32, i32) {
    %c0_i32 = arith.constant 0 : i32
    %c0_i32_0 = arith.constant 0 : i32
    %c0_i32_1 = arith.constant 0 : i32
    return %c0_i32, %c0_i32_0 : i32, i32
  }
  func.func @transform_2(%arg0: i32) -> (i32, i32) {
    %c0_i32 = arith.constant 0 : i32
    %c0_i32_0 = arith.constant 0 : i32
    %c0_i32_1 = arith.constant 0 : i32
    return %c0_i32, %c0_i32_0 : i32, i32
  }
  func.func @transform_3(%arg0: i32) -> (i32, i32) {
    %c0_i32 = arith.constant 0 : i32
    %c0_i32_0 = arith.constant 0 : i32
    %c0_i32_1 = arith.constant 0 : i32
    return %c0_i32, %c0_i32_0 : i32, i32
  }
  func.func @transform_4(%arg0: i32) -> (i32, i32) {
    %c0_i32 = arith.constant 0 : i32
    %c0_i32_0 = arith.constant 0 : i32
    %c0_i32_1 = arith.constant 0 : i32
    return %c0_i32, %c0_i32_0 : i32, i32
  }
  func.func @transform_5(%arg0: i32) -> (i32, i32) {
    %c0_i32 = arith.constant 0 : i32
    %c0_i32_0 = arith.constant 0 : i32
    %c0_i32_1 = arith.constant 0 : i32
    return %c0_i32, %c0_i32_0 : i32, i32
  }
  func.func @transform_6(%arg0: i32) -> (i32, i32) {
    %c0_i32 = arith.constant 0 : i32
    %c0_i32_0 = arith.constant 0 : i32
    %c0_i32_1 = arith.constant 0 : i32
    return %c0_i32, %c0_i32_0 : i32, i32
  }
  func.func @transform_7(%arg0: i32) -> (i32, i32) {
    %c0_i32 = arith.constant 0 : i32
    %c0_i32_0 = arith.constant 0 : i32
    %c0_i32_1 = arith.constant 0 : i32
    return %c0_i32, %c0_i32_0 : i32, i32
  }
  func.func @transform_8(%arg0: i32) -> (i32, i32) {
    %c0_i32 = arith.constant 0 : i32
    %c0_i32_0 = arith.constant 0 : i32
    return %arg0, %c0_i32 : i32, i32
  }
}

</mosaic_0001>

<bundles_post_ra>
// kernel: tpu_custom_call.1
= control target key start
LH: loop header
LB: loop body
LE: loop exit
PB: predicated region body
PF: predicated region fallthrough
CT: control target
= control target key end

     0   :  { %vm149_vm0 = vcmask 130048   ;;  %v4262_v3 = vmov 0   ;;  %s6258_s0 = inlined_call_operand.vmem [shape: f32[512,16], index: 0, kind: input, shape index: {}]   ;;  %s6259_s1 = inlined_call_operand.vmem [shape: f32[64,16], index: 1, kind: input, shape index: {}]   ;;  %s6260_s2 = inlined_call_operand.vmem [shape: f32[64,1], index: 2, kind: input, shape index: {}]   ;;  %s6261_s4 = inlined_call_operand.vmem [shape: f32[64,1], index: 4, kind: input, shape index: {}]   ;;  %s6262_s3 = inlined_call_operand.vmem [shape: f32[64,64], index: 3, kind: input, shape index: {}]   ;;  %s6263_s6 = inlined_call_operand.vmem [shape: f32[4,64], index: 6, kind: input, shape index: {}]   ;;  %s6264_s5 = inlined_call_operand.vmem [shape: f32[4,64], index: 5, kind: input, shape index: {}]   ;;  %s6265_s7 = inlined_call_operand.vmem [shape: f32[1,4], index: 7, kind: input, shape index: {}]   ;;  %s6266_s8 = inlined_call_operand.vmem [shape: f32[512,4], index: 8, kind: output, shape index: {}]  }
   0x1   :  { %v60_v0 = vld [vmem:[%s6258_s0 + $0xf8] sm:$0xff]  ;;  %4005 = vset.pattern.permute.xlu1 %v4262_v3  ;;  %4004 = vset.pattern.permute.xlu0 %v4262_v3  ;;  %v59_v5 = vld [vmem:[%s6258_s0 + $0xf0] sm:$0xff]  ;;  %v58_v9 = vld [vmem:[%s6258_s0 + $0xe8] sm:$0xff] }
   0x2   :  { %v92_v1 = vld [vmem:[%s6258_s0 + $0x1f8] sm:$0xff]  ;;  %3580 = vmatprep.subr.msk.mxu0 %vm149_vm0, %v60_v0  ;;  %v91_v6 = vld [vmem:[%s6258_s0 + $0x1f0] sm:$0xff]  ;;  %v90_v10 = vld [vmem:[%s6258_s0 + $0x1e8] sm:$0xff] }
   0x3   :  { %v44_v2 = vld [vmem:[%s6258_s0 + $0x78] sm:$0xff]  ;;  %3628 = vmatprep.subr.msk.mxu1 %vm149_vm0, %v92_v1  ;;  %v43_v7 = vld [vmem:[%s6258_s0 + $0x70] sm:$0xff]  ;;  %v42_v11 = vld [vmem:[%s6258_s0 + $0x68] sm:$0xff] }
   0x4   :  { %v76_v4 = vld [vmem:[%s6258_s0 + $0x178] sm:$0xff]  ;;  %3581 = vmatpush3.xpose.msk.msra.mxu0 %vm149_vm0, %v44_v2  ;;  %v75_v8 = vld [vmem:[%s6258_s0 + $0x170] sm:$0xff]  ;;  %v74_v12 = vld [vmem:[%s6258_s0 + $0x168] sm:$0xff] }
   0x5   :  { %3629 = vmatpush3.xpose.msk.msra.mxu1 %vm149_vm0, %v76_v4  ;;  %3582 = vmatprep.subr.msk.mxu0 %vm149_vm0, %v59_v5  ;;  %v57_v13 = vld [vmem:[%s6258_s0 + $0xe0] sm:$0xff]  ;;  %v56_v17 = vld [vmem:[%s6258_s0 + $0xd8] sm:$0xff]  ;;  %v55_v21 = vld [vmem:[%s6258_s0 + $0xd0] sm:$0xff] }
   0x6   :  { %3630 = vmatprep.subr.msk.mxu1 %vm149_vm0, %v91_v6  ;;  %v89_v14 = vld [vmem:[%s6258_s0 + $0x1e0] sm:$0xff]  ;;  %v88_v18 = vld [vmem:[%s6258_s0 + $0x1d8] sm:$0xff]  ;;  %v87_v22 = vld [vmem:[%s6258_s0 + $0x1d0] sm:$0xff] }
   0x7   :  { %v41_v15 = vld [vmem:[%s6258_s0 + $0x60] sm:$0xff]  ;;  %v40_v19 = vld [vmem:[%s6258_s0 + $0x58] sm:$0xff]  ;;  %v39_v23 = vld [vmem:[%s6258_s0 + $0x50] sm:$0xff] }
   0x8   :  { %3583 = vmatpush3.xpose.msk.msra.mxu0 %vm149_vm0, %v43_v7  ;;  %v73_v16 = vld [vmem:[%s6258_s0 + $0x160] sm:$0xff]  ;;  %v72_v20 = vld [vmem:[%s6258_s0 + $0x158] sm:$0xff]  ;;  %v71_v24 = vld [vmem:[%s6258_s0 + $0x150] sm:$0xff] }
   0x9   :  { %3631 = vmatpush3.xpose.msk.msra.mxu1 %vm149_vm0, %v75_v8  ;;  %3584 = vmatprep.subr.msk.mxu0 %vm149_vm0, %v58_v9  ;;  %v54_v25 = vld [vmem:[%s6258_s0 + $0xc8] sm:$0xff]  ;;  %v4412_v27 = vld [vmem:[%s6259_s1] sm:$0xff]  ;;  %v108_v33 = vld [vmem:[%s6260_s2 + $0x38] sm:$0xff] }
   0xa   :  { %3632 = vmatprep.subr.msk.mxu1 %vm149_vm0, %v90_v10  ;;  %v86_v26 = vld [vmem:[%s6258_s0 + $0x1c8] sm:$0xff]  ;;  %v53_v30 = vld [vmem:[%s6258_s0 + $0xc0] sm:$0xff]  ;;  %3612 = vmatprep.mubr.msk.f32.mxu0 %vm149_vm0, %v4412_v27  ;;  %v107_v35 = vld [vmem:[%s6260_s2 + $0x30] sm:$0xff] }
   0xb   :  { %v38_v28 = vld [vmem:[%s6258_s0 + $0x48] sm:$0xff]  ;;  %v85_v31 = vld [vmem:[%s6258_s0 + $0x1c0] sm:$0xff]  ;;  %3660 = vmatprep.mubr.msk.f32.mxu1 %vm149_vm0, %v4412_v27  ;;  %146 = vperm.xlu0 %4004, %v108_v33   ;;  %v52_v38 = vld [vmem:[%s6258_s0 + $0xb8] sm:$0xff] }
   0xc   :  { %3585 = vmatpush3.xpose.msk.msra.mxu0 %vm149_vm0, %v42_v11  ;;  %v70_v29 = vld [vmem:[%s6258_s0 + $0x148] sm:$0xff]  ;;  %v105_v34 = vld [vmem:[%s6260_s2 + $0x20] sm:$0xff]  ;;  %v84_v39 = vld [vmem:[%s6258_s0 + $0x1b8] sm:$0xff] }
   0xd   :  { %3633 = vmatpush3.xpose.msk.msra.mxu1 %vm149_vm0, %v74_v12  ;;  %3586 = vmatprep.subr.msk.mxu0 %vm149_vm0, %v57_v13  ;;  %v106_v32 = vld [vmem:[%s6260_s2 + $0x28] sm:$0xff]  ;;  %v37_v36 = vld [vmem:[%s6258_s0 + $0x40] sm:$0xff]  ;;  %v103_v40 = vld [vmem:[%s6260_s2 + $0x10] sm:$0xff] }
   0xe   :  { %3634 = vmatprep.subr.msk.mxu1 %vm149_vm0, %v89_v14  ;;  %136 = vperm.xlu1 %4005, %v106_v32   ;;  %v69_v37 = vld [vmem:[%s6258_s0 + $0x140] sm:$0xff]  ;;  %v104_v41 = vld [vmem:[%s6260_s2 + $0x18] sm:$0xff]  ;;  %v51_v44 = vld [vmem:[%s6258_s0 + $0xb0] sm:$0xff] }
   0xf   :  { %141 = vperm.xlu0 %4004, %v107_v35   ;;  %v36_v42 = vld [vmem:[%s6258_s0 + $0x38] sm:$0xff]  ;;  %v83_v45 = vld [vmem:[%s6258_s0 + $0x1b0] sm:$0xff]  ;;  %v101_v46 = vld [vmem:[%s6260_s2] sm:$0xff] }
  0x10   :  { %3587 = vmatpush3.xpose.msk.msra.mxu0 %vm149_vm0, %v41_v15  ;;  %v68_v43 = vld [vmem:[%s6258_s0 + $0x138] sm:$0xff]  ;;  %v102_v47 = vld [vmem:[%s6260_s2 + $0x8] sm:$0xff]  ;;  %v35_v48 = vld [vmem:[%s6258_s0 + $0x30] sm:$0xff] }
  0x11   :  { %3635 = vmatpush3.xpose.msk.msra.mxu1 %vm149_vm0, %v73_v16  ;;  %3588 = vmatprep.subr.msk.mxu0 %vm149_vm0, %v56_v17  ;;  %v67_v49 = vld [vmem:[%s6258_s0 + $0x130] sm:$0xff]  ;;  %v50_v50 = vld [vmem:[%s6258_s0 + $0xa8] sm:$0xff]  ;;  %v1048_v52 = vld [vmem:[%s6261_s4] sm:$0xff] }
  0x12   :  { %3636 = vmatprep.subr.msk.mxu1 %vm149_vm0, %v88_v18  ;;  %131 = vperm.xlu1 %4005, %v105_v34   ;;  %v82_v51 = vld [vmem:[%s6258_s0 + $0x1a8] sm:$0xff]  ;;  %v49_v56 = vld [vmem:[%s6258_s0 + $0xa0] sm:$0xff]  ;;  %v1050_v58 = vld [vmem:[%s6261_s4 + $0x10] sm:$0xff] }
  0x13   :  { %126 = vperm.xlu0 %4004, %v104_v41   ;;  %v1049_v53 = vld [vmem:[%s6261_s4 + $0x8] sm:$0xff]  ;;  %v81_v57 = vld [vmem:[%s6258_s0 + $0x1a0] sm:$0xff]  ;;  %v1051_v59 = vld [vmem:[%s6261_s4 + $0x18] sm:$0xff] }
  0x14   :  { %3589 = vmatpush3.xpose.msk.msra.mxu0 %vm149_vm0, %v40_v19  ;;  %v34_v54 = vld [vmem:[%s6258_s0 + $0x28] sm:$0xff]  ;;  %v33_v60 = vld [vmem:[%s6258_s0 + $0x20] sm:$0xff]  ;;  %v48_v62 = vld [vmem:[%s6258_s0 + $0x98] sm:$0xff] }
  0x15   :  { %3637 = vmatpush3.xpose.msk.msra.mxu1 %vm149_vm0, %v72_v20  ;;  %3590 = vmatprep.subr.msk.mxu0 %vm149_vm0, %v55_v21  ;;  %v66_v55 = vld [vmem:[%s6258_s0 + $0x128] sm:$0xff]  ;;  %v65_v61 = vld [vmem:[%s6258_s0 + $0x120] sm:$0xff]  ;;  %v80_v63 = vld [vmem:[%s6258_s0 + $0x198] sm:$0xff] }
  0x16   :  { %3638 = vmatprep.subr.msk.mxu1 %vm149_vm0, %v87_v22  ;;  %121 = vperm.xlu1 %4005, %v103_v40   ;;  %v1052_v0 = vld [vmem:[%s6261_s4 + $0x20] sm:$0xff]  ;;  %v1053_v1 = vld [vmem:[%s6261_s4 + $0x28] sm:$0xff]  ;;  %v32_v2 = vld [vmem:[%s6258_s0 + $0x18] sm:$0xff] }
  0x17   :  { %116 = vperm.xlu0 %4004, %v102_v47   ;;  %v64_v3 = vld [vmem:[%s6258_s0 + $0x118] sm:$0xff]  ;;  %v47_v4 = vld [vmem:[%s6258_s0 + $0x90] sm:$0xff]  ;;  %v46_v10 = vld [vmem:[%s6258_s0 + $0x88] sm:$0xff] }
  0x18   :  { %3591 = vmatpush3.xpose.msk.msra.mxu0 %vm149_vm0, %v39_v23  ;;  %v79_v5 = vld [vmem:[%s6258_s0 + $0x190] sm:$0xff]  ;;  %v1055_v7 = vld [vmem:[%s6261_s4 + $0x38] sm:$0xff]  ;;  %v78_v11 = vld [vmem:[%s6258_s0 + $0x188] sm:$0xff] }
  0x19   :  { %3639 = vmatpush3.xpose.msk.msra.mxu1 %vm149_vm0, %v71_v24  ;;  %3592 = vmatprep.subr.msk.mxu0 %vm149_vm0, %v54_v25  ;;  %v1054_v6 = vld [vmem:[%s6261_s4 + $0x30] sm:$0xff]  ;;  %v30_v12 = vld [vmem:[%s6258_s0 + $0x8] sm:$0xff]  ;;  %v45_v14 = vld [vmem:[%s6258_s0 + $0x80] sm:$0xff] }
  0x1a   :  { %3640 = vmatprep.subr.msk.mxu1 %vm149_vm0, %v86_v26  ;;  %111 = vperm.xlu1 %4005, %v101_v46   ;;  %v31_v8 = vld [vmem:[%s6258_s0 + $0x10] sm:$0xff]  ;;  %v62_v13 = vld [vmem:[%s6258_s0 + $0x108] sm:$0xff]  ;;  %v77_v15 = vld [vmem:[%s6258_s0 + $0x180] sm:$0xff] }
  0x1b   :  { %1058 = vperm.xlu0 %4004, %v1048_v52   ;;  %v63_v9 = vld [vmem:[%s6258_s0 + $0x110] sm:$0xff]  ;;  %v29_v16 = vld [vmem:[%s6258_s0] sm:$0xff]  ;;  %v94_v18 = vld [vmem:[%s6259_s1 + $0x8] sm:$0xff] }
  0x1c   :  { %3593 = vmatpush3.xpose.msk.msra.mxu0 %vm149_vm0, %v38_v28  ;;  %v61_v17 = vld [vmem:[%s6258_s0 + $0x100] sm:$0xff]  ;;  %v95_v19 = vld [vmem:[%s6259_s1 + $0x10] sm:$0xff]  ;;  %v96_v20 = vld [vmem:[%s6259_s1 + $0x18] sm:$0xff] }
  0x1d   :  { %3641 = vmatpush3.xpose.msk.msra.mxu1 %vm149_vm0, %v70_v29  ;;  %3594 = vmatprep.subr.msk.mxu0 %vm149_vm0, %v53_v30  ;;  %v97_v21 = vld [vmem:[%s6259_s1 + $0x20] sm:$0xff]  ;;  %v98_v22 = vld [vmem:[%s6259_s1 + $0x28] sm:$0xff]  ;;  %v99_v23 = vld [vmem:[%s6259_s1 + $0x30] sm:$0xff] }
  0x1e   :  { %3642 = vmatprep.subr.msk.mxu1 %vm149_vm0, %v85_v31  ;;  %1063 = vperm.xlu1 %4005, %v1049_v53   ;;  %v100_v24 = vld [vmem:[%s6259_s1 + $0x38] sm:$0xff] }
  0x1f   :  { %1068 = vperm.xlu0 %4004, %v1050_v58  }
  0x20   :  { %3595 = vmatpush3.xpose.msk.msra.mxu0 %vm149_vm0, %v37_v36 }
  0x21   :  { %3643 = vmatpush3.xpose.msk.msra.mxu1 %vm149_vm0, %v69_v37  ;;  %3596 = vmatprep.subr.msk.mxu0 %vm149_vm0, %v52_v38 }
  0x22   :  { %3644 = vmatprep.subr.msk.mxu1 %vm149_vm0, %v84_v39  ;;  %1073 = vperm.xlu1 %4005, %v1051_v59  }
  0x23   :  { %1078 = vperm.xlu0 %4004, %v1052_v0  }
  0x24   :  { %3597 = vmatpush3.xpose.msk.msra.mxu0 %vm149_vm0, %v36_v42 }
  0x25   :  { %3645 = vmatpush3.xpose.msk.msra.mxu1 %vm149_vm0, %v68_v43  ;;  %3598 = vmatprep.subr.msk.mxu0 %vm149_vm0, %v51_v44 }
  0x26   :  { %3646 = vmatprep.subr.msk.mxu1 %vm149_vm0, %v83_v45  ;;  %1083 = vperm.xlu1 %4005, %v1053_v1   ;;  %v6267_v45 = vmov 0.0  }
  0x27   :  { %1088 = vperm.xlu0 %4004, %v1054_v6  }
  0x28   :  { %3599 = vmatpush3.xpose.msk.msra.mxu0 %vm149_vm0, %v35_v48 }
  0x29   :  { %3647 = vmatpush3.xpose.msk.msra.mxu1 %vm149_vm0, %v67_v49  ;;  %3600 = vmatprep.subr.msk.mxu0 %vm149_vm0, %v50_v50 }
  0x2a   :  { %3648 = vmatprep.subr.msk.mxu1 %vm149_vm0, %v82_v51  ;;  %1093 = vperm.xlu1 %4005, %v1055_v7  }
  0x2c   :  { %3601 = vmatpush3.xpose.msk.msra.mxu0 %vm149_vm0, %v34_v54 }
  0x2d   :  { %3649 = vmatpush3.xpose.msk.msra.mxu1 %vm149_vm0, %v66_v55  ;;  %3602 = vmatprep.subr.msk.mxu0 %vm149_vm0, %v49_v56 }
  0x2e   :  { %3650 = vmatprep.subr.msk.mxu1 %vm149_vm0, %v81_v57 }
  0x30   :  { %3603 = vmatpush3.xpose.msk.msra.mxu0 %vm149_vm0, %v33_v60 }
  0x31   :  { %3651 = vmatpush3.xpose.msk.msra.mxu1 %vm149_vm0, %v65_v61  ;;  %3604 = vmatprep.subr.msk.mxu0 %vm149_vm0, %v48_v62 }
  0x32   :  { %3652 = vmatprep.subr.msk.mxu1 %vm149_vm0, %v80_v63 }
  0x34   :  { %3605 = vmatpush3.xpose.msk.msra.mxu0 %vm149_vm0, %v32_v2 }
  0x35   :  { %3653 = vmatpush3.xpose.msk.msra.mxu1 %vm149_vm0, %v64_v3  ;;  %3606 = vmatprep.subr.msk.mxu0 %vm149_vm0, %v47_v4 }
  0x36   :  { %3654 = vmatprep.subr.msk.mxu1 %vm149_vm0, %v79_v5 }
  0x38   :  { %3607 = vmatpush3.xpose.msk.msra.mxu0 %vm149_vm0, %v31_v8 }
  0x39   :  { %3655 = vmatpush3.xpose.msk.msra.mxu1 %vm149_vm0, %v63_v9  ;;  %3608 = vmatprep.subr.msk.mxu0 %vm149_vm0, %v46_v10 }
  0x3a   :  { %3656 = vmatprep.subr.msk.mxu1 %vm149_vm0, %v78_v11 }
  0x3c   :  { %3609 = vmatpush3.xpose.msk.msra.mxu0 %vm149_vm0, %v30_v12 }
  0x3d   :  { %3657 = vmatpush3.xpose.msk.msra.mxu1 %vm149_vm0, %v62_v13  ;;  %3610 = vmatprep.subr.msk.mxu0 %vm149_vm0, %v45_v14 }
  0x3e   :  { %3658 = vmatprep.subr.msk.mxu1 %vm149_vm0, %v77_v15 }
  0x40   :  { %3611 = vmatpush3.xpose.msk.msra.mxu0 %vm149_vm0, %v29_v16 }
  0x41   :  { %3659 = vmatpush3.xpose.msk.msra.mxu1 %vm149_vm0, %v61_v17 }
  0x43   :  { %3613 = vmatmul.mubr.msk.f32.vlgmr.msra.gmra.mxu0 %vm149_vm0, %v4412_v27 }
  0x44   :  { %3661 = vmatmul.mubr.msk.f32.vlgmr.msra.gmra.mxu1 %vm149_vm0, %v4412_v27  ;;  %3614 = vmatprep.mubr.msk.f32.mxu0 %vm149_vm0, %v94_v18 }
  0x45   :  { %3662 = vmatprep.mubr.msk.f32.mxu1 %vm149_vm0, %v94_v18 }
  0x47   :  { %3615 = vmatmul.mubr.msk.f32.gmra.mxu0 %vm149_vm0, %v94_v18 }
  0x48   :  { %3663 = vmatmul.mubr.msk.f32.gmra.mxu1 %vm149_vm0, %v94_v18  ;;  %3616 = vmatprep.mubr.msk.f32.mxu0 %vm149_vm0, %v95_v19 }
  0x49   :  { %3664 = vmatprep.mubr.msk.f32.mxu1 %vm149_vm0, %v95_v19 }
  0x4b   :  { %3617 = vmatmul.mubr.msk.f32.gmra.mxu0 %vm149_vm0, %v95_v19 }
  0x4c   :  { %3665 = vmatmul.mubr.msk.f32.gmra.mxu1 %vm149_vm0, %v95_v19  ;;  %3618 = vmatprep.mubr.msk.f32.mxu0 %vm149_vm0, %v96_v20 }
  0x4d   :  { %3666 = vmatprep.mubr.msk.f32.mxu1 %vm149_vm0, %v96_v20 }
  0x4f   :  { %3619 = vmatmul.mubr.msk.f32.gmra.mxu0 %vm149_vm0, %v96_v20 }
  0x50   :  { %3667 = vmatmul.mubr.msk.f32.gmra.mxu1 %vm149_vm0, %v96_v20  ;;  %3620 = vmatprep.mubr.msk.f32.mxu0 %vm149_vm0, %v97_v21 }
  0x51   :  { %3668 = vmatprep.mubr.msk.f32.mxu1 %vm149_vm0, %v97_v21 }
  0x53   :  { %3621 = vmatmul.mubr.msk.f32.gmra.mxu0 %vm149_vm0, %v97_v21 }
  0x54   :  { %3669 = vmatmul.mubr.msk.f32.gmra.mxu1 %vm149_vm0, %v97_v21  ;;  %3622 = vmatprep.mubr.msk.f32.mxu0 %vm149_vm0, %v98_v22 }
  0x55   :  { %3670 = vmatprep.mubr.msk.f32.mxu1 %vm149_vm0, %v98_v22 }
  0x57   :  { %3623 = vmatmul.mubr.msk.f32.gmra.mxu0 %vm149_vm0, %v98_v22 }
  0x58   :  { %3671 = vmatmul.mubr.msk.f32.gmra.mxu1 %vm149_vm0, %v98_v22  ;;  %3624 = vmatprep.mubr.msk.f32.mxu0 %vm149_vm0, %v99_v23 }
  0x59   :  { %3672 = vmatprep.mubr.msk.f32.mxu1 %vm149_vm0, %v99_v23 }
  0x5b   :  { %3625 = vmatmul.mubr.msk.f32.gmra.mxu0 %vm149_vm0, %v99_v23 }
  0x5c   :  { %3673 = vmatmul.mubr.msk.f32.gmra.mxu1 %vm149_vm0, %v99_v23  ;;  %3626 = vmatprep.mubr.msk.f32.mxu0 %vm149_vm0, %v100_v24 }
  0x5d   :  { %3674 = vmatprep.mubr.msk.f32.mxu1 %vm149_vm0, %v100_v24 }
  0x5f   :  { %3627 = vmatmul.mubr.msk.f32.gmra.mxu0 %vm149_vm0, %v100_v24 }
  0x60   :  { %3675 = vmatmul.mubr.msk.f32.gmra.mxu1 %vm149_vm0, %v100_v24  ;;  %1185 = vmatprep.mubr.f32.mxu0 %v6267_v45 }
  0x61   :  { %1298 = vmatprep.mubr.f32.mxu1 %v6267_v45 }
  0x86   :  { %v4677_v26 = vpop.permute.xlu0 %146 }
  0x89   :  { %v4675_v25 = vpop.permute.xlu1 %136 }
  0x8a   :  { %v4681_v28 = vpop.permute.xlu0 %141 }
  0x8d   :  { %v4679_v27 = vpop.permute.xlu1 %131 }
  0x8e   :  { %v4685_v30 = vpop.permute.xlu0 %126 }
  0x91   :  { %v4683_v29 = vpop.permute.xlu1 %121 }
  0x92   :  { %v117_v40 = vpop.permute.xlu0 %116 }
  0x95   :  { %v112_v31 = vpop.permute.xlu1 %111 }
 0x103   :  { %v432_v32 = vpop.f32.mrf.mxu0 }
 0x104   :  { %v545_v33 = vpop.f32.mrf.mxu1  ;;  %v4687_v34 = vadd.f32 %v432_v32, %v112_v31 }
 0x105   :  { %v4689_v35 = vadd.f32 %v545_v33, %v112_v31  ;;  %v434_v36 = vpop.f32.mrf.mxu0 }
 0x106   :  { %6323 = vst [vmem:[#allocation2_spill] sm:$0xff] %v4687_v34  ;;  %v547_v37 = vpop.f32.mrf.mxu1  ;;  %v4691_v38 = vadd.f32 %v434_v36, %v112_v31  ;;  %2505 = vxpose.xlu1.b32.start [1/8] (short) %v4687_v34, 128  ;;  %v592_v41 = vmin.f32 %v4687_v34, 20.0 }
 0x107   :  { %6324 = vst [vmem:[#allocation3_spill] sm:$0xff] %v4689_v35  ;;  %v4693_v39 = vadd.f32 %v547_v37, %v112_v31  ;;  %v438_v42 = vpop.f32.mrf.mxu0  ;;  %v594_v44 = vmin.f32 %v4689_v35, 20.0 }
 0x108   :  { %6325 = vst [vmem:[#allocation4_spill] sm:$0xff] %v4691_v38  ;;  %v551_v43 = vpop.f32.mrf.mxu1  ;;  %v593_v46 = vmin.f32 %v4691_v38, 20.0  ;;  %v4701_v47 = vadd.f32 %v438_v42, %v117_v40  ;;  %v624_v53 = vmul.f32 1.442695, %v592_v41 }
 0x109   :  { %6326 = vst [vmem:[#allocation5_spill] sm:$0xff] %v4693_v39  ;;  %v4703_v48 = vadd.f32 %v551_v43, %v117_v40  ;;  %v440_v49 = vpop.f32.mrf.mxu0  ;;  %v595_v51 = vmin.f32 %v4693_v39, 20.0  ;;  %v628_v57 = vmul.f32 1.442695, %v594_v44 }
 0x10a   :  { %6327 = vst [vmem:[#allocation6_spill] sm:$0xff] %v4701_v47  ;;  %v553_v50 = vpop.f32.mrf.mxu1  ;;  %v4706_v52 = vadd.f32 %v440_v49, %v117_v40  ;;  %v596_v54 = vmin.f32 %v4701_v47, 20.0  ;;  %2506 = vxpose.xlu1.b32.cont [2/8] (short) %v4701_v47, 128  ;;  %v626_v60 = vmul.f32 1.442695, %v593_v46  ;;  %4006 = vpow2.f32 %v624_v53 }
 0x10b   :  { %6328 = vst [vmem:[#allocation7_spill] sm:$0xff] %v4703_v48  ;;  %v444_v55 = vpop.f32.mrf.mxu0  ;;  %v4710_v58 = vadd.f32 %v553_v50, %v117_v40  ;;  %v598_v61 = vmin.f32 %v4703_v48, 20.0  ;;  %v630_v0 = vmul.f32 1.442695, %v595_v51  ;;  %4008 = vpow2.f32 %v628_v57 }
 0x10c   :  { %6329 = vst [vmem:[#allocation8_spill] sm:$0xff] %v4706_v52  ;;  %v557_v56 = vpop.f32.mrf.mxu1  ;;  %v4713_v59 = vadd.f32 %v444_v55, %v4683_v29  ;;  %v597_v1 = vmin.f32 %v4706_v52, 20.0  ;;  %v632_v2 = vmul.f32 1.442695, %v596_v54  ;;  %4010 = vpow2.f32 %v626_v60 }
 0x10d   :  { %6330 = vst [vmem:[#allocation9_spill] sm:$0xff] %v4710_v58  ;;  %v446_v62 = vpop.f32.mrf.mxu0  ;;  %v599_v5 = vmin.f32 %v4710_v58, 20.0  ;;  %v636_v6 = vmul.f32 1.442695, %v598_v61  ;;  %v4722_v7 = vadd.f32 %v557_v56, %v4683_v29  ;;  %4012 = vpow2.f32 %v630_v0 }
 0x10e   :  { %6331 = vst [vmem:[#allocation10_spill] sm:$0xff] %v4713_v59  ;;  %v4716_v63 = vpop.f32.mrf.mxu1  ;;  %2507 = vxpose.xlu1.b32.cont [3/8] (short) %v4713_v59, 128  ;;  %v634_v11 = vmul.f32 1.442695, %v597_v1  ;;  %4014 = vpow2.f32 %v632_v2  ;;  %v600_v14 = vmin.f32 %v4713_v59, 20.0  ;;  %v4742_v22 = vadd.f32 %v446_v62, %v4683_v29 }
 0x10f   :  { %v450_v3 = vpop.f32.mrf.mxu0  ;;  %6332 = vst [vmem:[#allocation11_spill] sm:$0xff] %v4722_v7  ;;  %v638_v17 = vmul.f32 1.442695, %v599_v5  ;;  %4016 = vpow2.f32 %v636_v6  ;;  %v602_v21 = vmin.f32 %v4722_v7, 20.0 }
 0x110   :  { %v563_v4 = vpop.f32.mrf.mxu1  ;;  %v4725_v8 = vadd.f32 %v450_v3, %v4685_v30  ;;  %6335 = vst [vmem:[#allocation14_spill] sm:$0xff] %v4742_v22  ;;  %4018 = vpow2.f32 %v634_v11 }
 0x111   :  { %v452_v9 = vpop.f32.mrf.mxu0  ;;  %v4749_v37 = vadd.f32 %v563_v4, %v4685_v30  ;;  %4020 = vpow2.f32 %v638_v17 }
 0x112   :  { %6333 = vst [vmem:[#allocation12_spill] sm:$0xff] %v4725_v8  ;;  %v565_v10 = vpop.f32.mrf.mxu1  ;;  %v4728_v12 = vadd.f32 %v452_v9, %v4685_v30  ;;  %2508 = vxpose.xlu1.b32.cont [4/8] (short) %v4725_v8, 128 }
 0x113   :  { %v4731_v13 = vadd.f32 %v565_v10, %v4685_v30  ;;  %v456_v15 = vpop.f32.mrf.mxu0  ;;  %6336 = vst [vmem:[#allocation15_spill] sm:$0xff] %v4749_v37 }
 0x114   :  { %v569_v16 = vpop.f32.mrf.mxu1  ;;  %v605_v18 = vmin.f32 %v4728_v12, 20.0  ;;  %v4738_v20 = vadd.f32 %v456_v15, %v4679_v27 }
 0x115   :  { %v607_v19 = vmin.f32 %v4731_v13, 20.0  ;;  %v4745_v23 = vadd.f32 %v569_v16, %v4679_v27  ;;  %v458_v24 = vpop.f32.mrf.mxu0 }
 0x116   :  { %6334 = vst [vmem:[#allocation13_spill] sm:$0xff] %v4738_v20  ;;  %v571_v31 = vpop.f32.mrf.mxu1  ;;  %v650_v32 = vmul.f32 1.442695, %v605_v18  ;;  %v608_v36 = vmin.f32 %v4738_v20, 20.0  ;;  %v4753_v41 = vadd.f32 %v458_v24, %v4679_v27  ;;  %2509 = vxpose.xlu1.b32.cont [5/8] (short) %v4738_v20, 128 }
 0x117   :  { %v654_v33 = vmul.f32 1.442695, %v607_v19  ;;  %v610_v40 = vmin.f32 %v4745_v23, 20.0  ;;  %v4756_v42 = vadd.f32 %v571_v31, %v4679_v27  ;;  %v462_v43 = vpop.f32.mrf.mxu0  ;;  %v4776_v2 = vpop.eup %4006  ;;  %vm930_vm0 = vcmp.gt.f32.partialorder %v4745_v23, 20.0 }
 0x118   :  { %v575_v44 = vpop.f32.mrf.mxu1  ;;  %v656_v46 = vmul.f32 1.442695, %v608_v36  ;;  %v4760_v49 = vadd.f32 %v462_v43, %v4675_v25  ;;  %4022 = vpow2.f32 %v650_v32  ;;  %v609_v51 = vmin.f32 %v4753_v41, 20.0  ;;  %6338 = vst [vmem:[#allocation17_spill] sm:$0xff] %v4776_v2  ;;  %v4779_v6 = vpop.eup %4008 }
 0x119   :  { %6337 = vst [vmem:[#allocation16_spill] sm:$0xff] %v4756_v42  ;;  %v4763_v30 = vadd.f32 %v575_v44, %v4675_v25  ;;  %v660_v50 = vmul.f32 1.442695, %v610_v40  ;;  %v611_v53 = vmin.f32 %v4756_v42, 20.0  ;;  %v464_v27 = vpop.f32.mrf.mxu0  ;;  %4024 = vpow2.f32 %v654_v33  ;;  %6339 = vst [vmem:[#allocation18_spill] sm:$0xff] %v4779_v6  ;;  %v4788_v16 = vpop.eup %4010 }
 0x11a   :  { %v577_v54 = vpop.f32.mrf.mxu1  ;;  %v612_v55 = vmin.f32 %v4760_v49, 20.0  ;;  %v4770_v57 = vadd.f32 %v464_v27, %v4675_v25  ;;  %4026 = vpow2.f32 %v656_v46  ;;  %v658_v60 = vmul.f32 1.442695, %v609_v51  ;;  %2510 = vxpose.xlu1.b32.cont [6/8] (short) %v4760_v49, 128  ;;  %6340 = vst [vmem:[#allocation19_spill] sm:$0xff] %v4788_v16  ;;  %v4796_v24 = vpop.eup %4012 }
 0x11b   :  { %v614_v56 = vmin.f32 %v4763_v30, 20.0  ;;  %v662_v61 = vmul.f32 1.442695, %v611_v53  ;;  %v4773_v62 = vadd.f32 %v577_v54, %v4675_v25  ;;  %v468_v0 = vpop.f32.mrf.mxu0  ;;  %4028 = vpow2.f32 %v660_v50  ;;  %6341 = vst [vmem:[#allocation20_spill] sm:$0xff] %v4796_v24  ;;  %v4801_v43 = vpop.eup %4014 }
 0x11c   :  { %v581_v1 = vpop.f32.mrf.mxu1  ;;  %v664_v3 = vmul.f32 1.442695, %v612_v55  ;;  %v613_v5 = vmin.f32 %v4770_v57, 20.0  ;;  %4030 = vpow2.f32 %v658_v60  ;;  %v4783_v10 = vadd.f32 %v468_v0, %v4681_v28  ;;  %6342 = vst [vmem:[#allocation21_spill] sm:$0xff] %v4801_v43  ;;  %v4811_v55 = vpop.eup %4016 }
 0x11d   :  { %v668_v4 = vmul.f32 1.442695, %v614_v56  ;;  %v615_v9 = vmin.f32 %v4773_v62, 20.0  ;;  %v4786_v25 = vadd.f32 %v581_v1, %v4681_v28  ;;  %v470_v11 = vpop.f32.mrf.mxu0  ;;  %4032 = vpow2.f32 %v662_v61  ;;  %6343 = vst [vmem:[#allocation22_spill] sm:$0xff] %v4811_v55  ;;  %v4814_v0 = vpop.eup %4018 }
 0x11e   :  { %v583_v15 = vpop.f32.mrf.mxu1  ;;  %v666_v17 = vmul.f32 1.442695, %v613_v5  ;;  %v4791_v18 = vadd.f32 %v470_v11, %v4681_v28  ;;  %4034 = vpow2.f32 %v664_v3  ;;  %v616_v32 = vmin.f32 %v4783_v10, 20.0  ;;  %2511 = vxpose.xlu1.b32.cont [7/8] (short) %v4783_v10, 128  ;;  %6344 = vst [vmem:[#allocation23_spill] sm:$0xff] %v4814_v0 }
 0x11f   :  { %v4794_v19 = vadd.f32 %v583_v15, %v4681_v28  ;;  %v670_v31 = vmul.f32 1.442695, %v615_v9  ;;  %v618_v33 = vmin.f32 %v4786_v25, 20.0  ;;  %v474_v36 = vpop.f32.mrf.mxu0  ;;  %4036 = vpow2.f32 %v668_v4  ;;  %v4829_v15 = vpop.eup %4020 }
 0x120   :  { %v587_v40 = vpop.f32.mrf.mxu1  ;;  %v617_v44 = vmin.f32 %v4791_v18, 20.0  ;;  %v4806_v46 = vadd.f32 %v474_v36, %v4677_v26  ;;  %4038 = vpow2.f32 %v666_v17  ;;  %v672_v50 = vmul.f32 1.442695, %v616_v32  ;;  %6346 = vst [vmem:[#allocation25_spill] sm:$0xff] %v4829_v15 }
 0x121   :  { %v619_v28 = vmin.f32 %v4794_v19, 20.0  ;;  %v676_v51 = vmul.f32 1.442695, %v618_v33  ;;  %v4809_v53 = vadd.f32 %v587_v40, %v4677_v26  ;;  %v476_v27 = vpop.f32.mrf.mxu0  ;;  %4040 = vpow2.f32 %v670_v31 }
 0x122   :  { %v589_v54 = vpop.f32.mrf.mxu1  ;;  %v674_v56 = vmul.f32 1.442695, %v617_v44  ;;  %v620_v61 = vmin.f32 %v4806_v46, 20.0  ;;  %4042 = vpow2.f32 %v672_v50  ;;  %v4818_v3 = vadd.f32 %v476_v27, %v4677_v26  ;;  %2512 = vxpose.xlu1.b32.end [8/8] (short) %v4806_v46, 128 }
 0x123   :  { %v678_v60 = vmul.f32 1.442695, %v619_v28  ;;  %v622_v1 = vmin.f32 %v4809_v53, 20.0  ;;  %v4821_v4 = vadd.f32 %v589_v54, %v4677_v26  ;;  %v601_v5 = vmin.f32 %v4742_v22, 20.0 }
 0x124   :  { %v4827_v9 = vadd.f32 %v4716_v63, %v4683_v29  ;;  %4044 = vpow2.f32 %v676_v51  ;;  %v680_v11 = vmul.f32 1.442695, %v620_v61  ;;  %v621_v31 = vmin.f32 %v4818_v3, 20.0 }
 0x125   :  { %4046 = vpow2.f32 %v674_v56  ;;  %v684_v17 = vmul.f32 1.442695, %v622_v1  ;;  %v623_v32 = vmin.f32 %v4821_v4, 20.0  ;;  %v4833_v26 = vpop.eup %4022  ;;  %v640_v33 = vmul.f32 1.442695, %v600_v14 }
 0x126   :  { %6345 = vst [vmem:[#allocation24_spill] sm:$0xff] %v4827_v9  ;;  %v604_v36 = vmin.f32 %v4725_v8, 20.0  ;;  %4048 = vpow2.f32 %v678_v60  ;;  %v4838_v29 = vpop.eup %4024  ;;  %v606_v63 = vmin.f32 %v4749_v37, 20.0  ;;  %v682_v40 = vmul.f32 1.442695, %v621_v31 }
 0x127   :  { %4050 = vpow2.f32 %v680_v11  ;;  %v686_v44 = vmul.f32 1.442695, %v623_v32  ;;  %v4027_v28 = vpop.eup %4026  ;;  %v644_v50 = vmul.f32 1.442695, %v602_v21  ;;  %v603_v51 = vmin.f32 %v4827_v9, 20.0 }
 0x128   :  { %4052 = vpow2.f32 %v684_v17  ;;  %v4029_v27 = vpop.eup %4028  ;;  %v642_v54 = vmul.f32 1.442695, %v601_v5  ;;  %v648_v56 = vmul.f32 1.442695, %v604_v36  ;;  %v704_v60 = vadd.f32 2.0, %v4027_v28 }
 0x129   :  { %4054 = vpow2.f32 %v682_v40  ;;  %v4031_v14 = vpop.eup %4030  ;;  %v652_v1 = vmul.f32 1.442695, %v606_v63  ;;  %v646_v32 = vmul.f32 1.442695, %v603_v51  ;;  %v706_v17 = vadd.f32 2.0, %v4029_v27 }
 0x12a   :  { %4056 = vpow2.f32 %v686_v44  ;;  %v4033_v61 = vpop.eup %4032  ;;  %v705_v11 = vadd.f32 2.0, %v4031_v14  ;;  %v736_v34 = vmul.f32 %v4027_v28, %v704_v60  ;;  %v4845_v63 = vadd.f32 2.0, %v4833_v26 }
 0x12b   :  { %4058 = vpow2.f32 %v640_v33  ;;  %v4035_v31 = vpop.eup %4034  ;;  %v707_v45 = vadd.f32 2.0, %v4033_v61  ;;  %v4852_v28 = vadd.f32 2.0, %v4838_v29  ;;  %vm937_vm1 = vcmp.gt.f32.partialorder %v4791_v18, 20.0 }
 0x12c   :  { %4060 = vpow2.f32 %v644_v50  ;;  %v4037_v35 = vpop.eup %4036  ;;  %v708_v21 = vadd.f32 2.0, %v4035_v31  ;;  %v737_v40 = vmul.f32 %v4031_v14, %v705_v11  ;;  %v4847_v47 = vadd.f32 2.0, %v736_v34 }
 0x12d   :  { %4062 = vpow2.f32 %v642_v54  ;;  %v4039_v39 = vpop.eup %4038  ;;  %v710_v5 = vadd.f32 2.0, %v4037_v35  ;;  %v739_v44 = vmul.f32 %v4033_v61, %v707_v45  ;;  %v4849_v54 = vmul.f32 %v4029_v27, %v706_v17 }
 0x12e   :  { %4064 = vpow2.f32 %v648_v56  ;;  %v4041_v36 = vpop.eup %4040  ;;  %v709_v33 = vadd.f32 2.0, %v4039_v39  ;;  %v740_v51 = vmul.f32 %v4035_v31, %v708_v21  ;;  %v4857_v45 = vmul.f32 %v736_v34, %v4738_v20 }
 0x12f   :  { %4066 = vpow2.f32 %v652_v1  ;;  %v4043_v48 = vpop.eup %4042  ;;  %v711_v14 = vadd.f32 2.0, %v4041_v36  ;;  %v742_v60 = vmul.f32 %v4037_v35, %v710_v5  ;;  %v4854_v1 = vadd.f32 2.0, %v737_v40 }
 0x130   :  { %4068 = vpow2.f32 %v646_v32  ;;  %6347 = vst [vmem:[#allocation26_spill] sm:$0xff] %v4857_v45  ;;  %v712_v32 = vadd.f32 2.0, %v4043_v48  ;;  %v4860_v31 = vmul.f32 %v737_v40, %v4753_v41  ;;  %v4862_v21 = vadd.f32 2.0, %v739_v44 }
 0x131   :  { %v4045_v50 = vpop.eup %4044  ;;  %v741_v7 = vmul.f32 %v4039_v39, %v709_v33  ;;  %v4865_v59 = vmul.f32 %v739_v44, %v4756_v42  ;;  %v4867_v34 = vadd.f32 2.0, %v740_v51  ;;  %v4870_v6 = vmul.f32 %v740_v51, %v4760_v49 }
 0x132   :  { %v4047_v56 = vpop.eup %4046  ;;  %6348 = vst [vmem:[#allocation27_spill] sm:$0xff] %v4860_v31  ;;  %v714_v58 = vadd.f32 2.0, %v4045_v50  ;;  %v743_v16 = vmul.f32 %v4041_v36, %v711_v14  ;;  %v4872_v55 = vadd.f32 2.0, %v742_v60  ;;  %v744_v44 = vmul.f32 %v4043_v48, %v712_v32 }
 0x133   :  { %v4049_v61 = vpop.eup %4048  ;;  %v713_v11 = vadd.f32 2.0, %v4047_v56  ;;  %6349 = vst [vmem:[#allocation28_spill] sm:$0xff] %v4865_v59  ;;  %6350 = vst [vmem:[#allocation29_spill] sm:$0xff] %v4870_v6  ;;  %v4886_v36 = vmul.f32 %v742_v60, %v4763_v30  ;;  %v4891_v32 = vadd.f32 2.0, %v741_v7  ;;  %vm939_vm2 = vcmp.gt.f32.partialorder %v4794_v19, 20.0 }
 0x134   :  { %v4051_v27 = vpop.eup %4050  ;;  %v715_v17 = vadd.f32 2.0, %v4049_v61  ;;  %v746_v51 = vmul.f32 %v4045_v50, %v714_v58  ;;  %vm940_vm3 = vcmp.gt.f32.partialorder %v4806_v46, 20.0  ;;  %vm942_vm4 = vcmp.gt.f32.partialorder %v4809_v53, 20.0 }
 0x135   :  { %v4053_v35 = vpop.eup %4052  ;;  %v716_v5 = vadd.f32 2.0, %v4051_v27  ;;  %v745_v9 = vmul.f32 %v4047_v56, %v713_v11  ;;  %6351 = vst [vmem:[#allocation30_spill] sm:$0xff] %v4886_v36  ;;  %v733_v36 = vmul.f32 %v4833_v26, %v4845_v63  ;;  %vm941_vm5 = vcmp.gt.f32.partialorder %v4818_v3, 20.0 }
 0x136   :  { %v4055_v2 = vpop.eup %4054  ;;  %v718_v40 = vadd.f32 2.0, %v4053_v35  ;;  %v747_v24 = vmul.f32 %v4049_v61, %v715_v17  ;;  %vm943_vm6 = vcmp.gt.f32.partialorder %v4821_v4, 20.0  ;;  %vm936_vm7 = vcmp.gt.f32.partialorder %v4783_v10, 20.0 }
 0x137   :  { %v4057_v43 = vpop.eup %4056  ;;  %v717_v15 = vadd.f32 2.0, %v4055_v2  ;;  %v748_v39 = vmul.f32 %v4051_v27, %v716_v5  ;;  %v4874_v33 = vadd.f32 2.0, %v745_v9  ;;  %v4920_v31 = vmul.f32 %v745_v9, %v4791_v18 }
 0x138   :  { %v4876_v37 = vpop.eup %4058  ;;  %v719_v56 = vadd.f32 2.0, %v4057_v43  ;;  %v750_v11 = vmul.f32 %v4053_v35, %v718_v40  ;;  %v4878_v0 = vadd.f32 2.0, %v747_v24  ;;  %v4906_v35 = vadd.f32 2.0, %v743_v16 }
 0x139   :  { %v4880_v45 = vpop.eup %4060  ;;  %v749_v59 = vmul.f32 %v4055_v2, %v717_v15  ;;  %v4882_v61 = vadd.f32 2.0, %v748_v39  ;;  %4070 = vrcp.f32 %v4874_v33  ;;  %v4896_v2 = vadd.f32 2.0, %v744_v44 }
 0x13a   :  { %v4063_v14 = vpop.eup %4062  ;;  %v751_v27 = vmul.f32 %v4057_v43, %v719_v56  ;;  %v4888_v48 = vadd.f32 2.0, %v750_v11  ;;  %4072 = vrcp.f32 %v4878_v0  ;;  %v4899_v15 = vmul.f32 %v741_v7, %v4770_v57 }
 0x13b   :  { %v4065_v17 = vpop.eup %4064  ;;  %v4893_v58 = vadd.f32 2.0, %v749_v59  ;;  %4074 = vrcp.f32 %v4882_v61  ;;  %v4904_v43 = vadd.f32 2.0, %v746_v51  ;;  %v4910_v40 = vmul.f32 %v744_v44, %v4783_v10 }
 0x13c   :  { %6352 = vst [vmem:[#allocation31_spill] sm:$0xff] %v4899_v15  ;;  %v4067_v50 = vpop.eup %4066  ;;  %v4901_v60 = vadd.f32 2.0, %v751_v27  ;;  %4076 = vrcp.f32 %v4888_v48  ;;  %v4913_v56 = vmul.f32 %v746_v51, %v4786_v25  ;;  %v4916_v7 = vmul.f32 %v743_v16, %v4773_v62 }
 0x13d   :  { %v4069_v5 = vpop.eup %4068  ;;  %4078 = vrcp.f32 %v4893_v58  ;;  %v700_v6 = vadd.f32 2.0, %v4065_v17  ;;  %v4925_v15 = vmul.f32 %v748_v39, %v4806_v46  ;;  %v4928_v44 = vmul.f32 %v747_v24, %v4794_v19 }
 0x13e   :  { %6353 = vst [vmem:[#allocation32_spill] sm:$0xff] %v4916_v7  ;;  %4080 = vrcp.f32 %v4901_v60  ;;  %v702_v51 = vadd.f32 2.0, %v4067_v50  ;;  %v4932_v16 = vmul.f32 %v749_v59, %v4818_v3  ;;  %v4935_v7 = vmul.f32 %v750_v11, %v4809_v53 }
 0x13f   :  { %4082 = vrcp.f32 %v4896_v2  ;;  %v4939_v9 = vadd.f32 2.0, %v4849_v54  ;;  %v4942_v26 = vmul.f32 %v751_v27, %v4821_v4  ;;  %v735_v24 = vmul.f32 %v4838_v29, %v4852_v28 }
 0x140   :  { %4084 = vrcp.f32 %v4904_v43  ;;  %v697_v63 = vadd.f32 2.0, %v4063_v14  ;;  %v4950_v59 = vmul.f32 %v4849_v54, %v4745_v23  ;;  %v4952_v39 = vadd.f32 2.0, %v733_v36 }
 0x141   :  { %4086 = vrcp.f32 %v4891_v32  ;;  %v732_v11 = vmul.f32 %v4065_v17, %v700_v6  ;;  %v4956_v27 = vmul.f32 %v733_v36, %v4728_v12  ;;  %v4958_v20 = vmul.f32 %v4067_v50, %v702_v51 }
 0x142   :  { %4088 = vrcp.f32 %v4906_v35  ;;  %v699_v42 = vadd.f32 2.0, %v4069_v5  ;;  %v4962_v29 = vmul.f32 %v4063_v14, %v697_v63  ;;  %v696_v54 = vadd.f32 2.0, %v4876_v37 }
 0x143   :  { %4090 = vrcp.f32 %v4867_v34  ;;  %6354 = vst [vmem:[#allocation33_spill] sm:$0xff] %v4956_v27  ;;  %6355 = vst [vmem:[#allocation34_spill] sm:$0xff] %v4958_v20  ;;  %2537 = vxpose.xlu1.b32.start [1/8] (short) %v4691_v38, 128  ;;  %v698_v28 = vadd.f32 2.0, %v4880_v45  ;;  %v4967_v6 = vadd.f32 2.0, %v735_v24  ;;  %v4970_v36 = vmul.f32 %v735_v24, %v4731_v13 }
 0x144   :  { %4092 = vrcp.f32 %v4872_v55  ;;  %6356 = vst [vmem:[#allocation35_spill] sm:$0xff] %v4962_v29  ;;  %v4972_v17 = vmul.f32 %v4069_v5, %v699_v42  ;;  %v4976_v14 = vadd.f32 2.0, %v732_v11  ;;  %v4979_v51 = vmul.f32 %v4876_v37, %v696_v54 }
 0x145   :  { %4094 = vrcp.f32 %v4854_v1  ;;  %6357 = vst [vmem:[#allocation36_spill] sm:$0xff] %v4970_v36  ;;  %v4982_v63 = vmul.f32 %v4880_v45, %v698_v28  ;;  %v4988_v42 = vmul.f32 %v732_v11, %v4725_v8  ;;  %v4991_v5 = vadd.f32 2.0, %v4958_v20 }
 0x146   :  { %6358 = vst [vmem:[#allocation37_spill] sm:$0xff] %v4972_v17  ;;  %v4071_v50 = vpop.eup %4070  ;;  %4096 = vrcp.f32 %v4862_v21  ;;  %6359 = vst [vmem:[#allocation38_spill] sm:$0xff] %v4979_v51  ;;  %v4998_v45 = vadd.f32 2.0, %v4962_v29  ;;  %vm938_vm8 = vcmp.gt.f32.partialorder %v4786_v25, 20.0  ;;  %vm933_vm9 = vcmp.gt.f32.partialorder %v4770_v57, 20.0 }
 0x147   :  { %6360 = vst [vmem:[#allocation39_spill] sm:$0xff] %v4982_v63  ;;  %v4073_v38 = vpop.eup %4072  ;;  %v841_v27 = vmul.f32 %v4071_v50, %v4874_v33  ;;  %4098 = vrcp.f32 %v4847_v47  ;;  %6361 = vst [vmem:[#allocation40_spill] sm:$0xff] %v4988_v42  ;;  %2538 = vxpose.xlu1.b32.cont [2/8] (short) %v4706_v52, 128  ;;  %v5001_v33 = vadd.f32 2.0, %v4972_v17  ;;  %v5007_v52 = vadd.f32 2.0, %v4979_v51 }
 0x148   :  { %v4075_v24 = vpop.eup %4074  ;;  %v843_v37 = vmul.f32 %v4073_v38, %v4878_v0  ;;  %4100 = vrcp.f32 %v4939_v9  ;;  %v5013_v17 = vadd.f32 2.0, %v4982_v63  ;;  %vm935_vm10 = vcmp.gt.f32.partialorder %v4773_v62, 20.0 }
 0x149   :  { %6362 = vst [vmem:[#allocation41_spill] sm:$0xff] %v5001_v33  ;;  %v4077_v11 = vpop.eup %4076  ;;  %v844_v54 = vmul.f32 %v4075_v24, %v4882_v61  ;;  %v873_v28 = vsub.f32 2.0, %v841_v27  ;;  %4102 = vrcp.f32 %v4952_v39  ;;  %6363 = vst [vmem:[#allocation42_spill] sm:$0xff] %v5007_v52  ;;  %vm932_vm11 = vcmp.gt.f32.partialorder %v4760_v49, 20.0 }
 0x14a   :  { %v4079_v0 = vpop.eup %4078  ;;  %v846_v29 = vmul.f32 %v4077_v11, %v4888_v48  ;;  %v875_v8 = vsub.f32 2.0, %v843_v37  ;;  %4104 = vrcp.f32 %v4967_v6  ;;  %6364 = vst [vmem:[#allocation43_spill] sm:$0xff] %v5013_v17  ;;  %vm934_vm12 = vcmp.gt.f32.partialorder %v4763_v30, 20.0 }
 0x14b   :  { %v4081_v61 = vpop.eup %4080  ;;  %v845_v42 = vmul.f32 %v4079_v0, %v4893_v58  ;;  %v876_v27 = vsub.f32 2.0, %v844_v54  ;;  %v905_v20 = vmul.f32 %v4071_v50, %v873_v28  ;;  %4106 = vrcp.f32 %v4976_v14  ;;  %2539 = vxpose.xlu1.b32.cont [3/8] (short) %v4742_v22, 128 }
 0x14c   :  { %v4083_v51 = vpop.eup %4082  ;;  %v847_v48 = vmul.f32 %v4081_v61, %v4901_v60  ;;  %v878_v37 = vsub.f32 2.0, %v846_v29  ;;  %v907_v36 = vmul.f32 %v4073_v38, %v875_v8  ;;  %4108 = vrcp.f32 %v4991_v5 }
 0x14d   :  { %v4085_v63 = vpop.eup %4084  ;;  %v877_v17 = vsub.f32 2.0, %v845_v42  ;;  %v908_v58 = vmul.f32 %v4075_v24, %v876_v27  ;;  %v1001_v52 = vmul.f32 %v4920_v31, %v905_v20  ;;  %v840_v50 = vmul.f32 %v4083_v51, %v4896_v2 }
 0x14e   :  { %v4087_v54 = vpop.eup %4086  ;;  %v879_v28 = vsub.f32 2.0, %v847_v48  ;;  %v910_v22 = vmul.f32 %v4077_v11, %v878_v37  ;;  %v1003_v60 = vmul.f32 %v4928_v44, %v907_v36  ;;  %v842_v38 = vmul.f32 %v4085_v63, %v4904_v43 }
 0x14f   :  { %v4089_v8 = vpop.eup %4088  ;;  %v909_v29 = vmul.f32 %v4079_v0, %v877_v17  ;;  %v1004_v33 = vmul.f32 %v4925_v15, %v908_v58  ;;  %v1033_v42 = vsel %vm937_vm1, %v4791_v18, %v1001_v52  ;;  %v872_v20 = vsub.f32 2.0, %v840_v50  ;;  %2540 = vxpose.xlu1.b32.cont [4/8] (short) %v4728_v12, 128 }
 0x150   :  { %v4091_v31 = vpop.eup %4090  ;;  %v911_v2 = vmul.f32 %v4081_v61, %v879_v28  ;;  %v1006_v24 = vmul.f32 %v4935_v7, %v910_v22  ;;  %v1035_v44 = vsel %vm939_vm2, %v4794_v19, %v1003_v60  ;;  %v874_v43 = vsub.f32 2.0, %v842_v38  ;;  %v6365_v60 = vld [vmem:[#allocation16_spill] sm:$0xff] }
 0x151   :  { %v4093_v36 = vpop.eup %4092  ;;  %v1005_v15 = vmul.f32 %v4932_v16, %v909_v29  ;;  %v1036_v52 = vsel %vm940_vm3, %v4806_v46, %v1004_v33  ;;  %v904_v17 = vmul.f32 %v4083_v51, %v872_v20  ;;  %v837_v11 = vmul.f32 %v4087_v54, %v4891_v32 }
 0x152   :  { %v4095_v22 = vpop.eup %4094  ;;  %v1007_v7 = vmul.f32 %v4942_v26, %v911_v2  ;;  %v1038_v0 = vsel %vm942_vm4, %v4809_v53, %v1006_v24  ;;  %v906_v61 = vmul.f32 %v4085_v63, %v874_v43  ;;  %v839_v27 = vmul.f32 %v4089_v8, %v4906_v35  ;;  %v6366_v2 = vld [vmem:[#allocation13_spill] sm:$0xff] }
 0x153   :  { %v4097_v16 = vpop.eup %4096  ;;  %v1037_v46 = vsel %vm941_vm5, %v4818_v3, %v1005_v15  ;;  %v1000_v32 = vmul.f32 %v4910_v40, %v904_v17  ;;  %v869_v51 = vsub.f32 2.0, %v837_v11  ;;  %v836_v33 = vmul.f32 %v4091_v31, %v4867_v34  ;;  %2541 = vxpose.xlu1.b32.cont [5/8] (short) %v4753_v41, 128 }
 0x154   :  { %v4099_v26 = vpop.eup %4098  ;;  %1137 = vmatprep.subr.mxu0 %v1037_v46  ;;  %v1039_v35 = vsel %vm943_vm6, %v4821_v4, %v1007_v7  ;;  %v1002_v63 = vmul.f32 %v4913_v56, %v906_v61  ;;  %v871_v48 = vsub.f32 2.0, %v839_v27  ;;  %v838_v37 = vmul.f32 %v4093_v36, %v4872_v55  ;;  %v6369_v7 = vld [vmem:[#allocation29_spill] sm:$0xff]  ;;  %v6370_v46 = vld [vmem:[#allocation30_spill] sm:$0xff] }
 0x155   :  { %vm929_vm13 = vcmp.gt.f32.partialorder %v4753_v41, 20.0  ;;  %v4101_v40 = vpop.eup %4100  ;;  %1250 = vmatprep.subr.mxu1 %v1039_v35  ;;  %1138 = vmatpush1.msra.mxu0 %v1036_v52  ;;  %v1032_v34 = vsel %vm936_vm7, %v4783_v10, %v1000_v32  ;;  %v901_v58 = vmul.f32 %v4087_v54, %v869_v51  ;;  %v868_v50 = vsub.f32 2.0, %v836_v33  ;;  %v6367_v54 = vld [vmem:[#allocation31_spill] sm:$0xff]  ;;  %v6368_v52 = vld [vmem:[#allocation32_spill] sm:$0xff] }
 0x156   :  { %v833_v28 = vmul.f32 %v4095_v22, %v4854_v1  ;;  %vm931_vm14 = vcmp.gt.f32.partialorder %v6365_v60, 20.0  ;;  %v4103_v38 = vpop.eup %4102  ;;  %1251 = vmatpush1.msra.mxu1 %v1038_v0  ;;  %1139 = vmatprep.subr.mxu0 %v1033_v42  ;;  %v1034_v55 = vsel %vm938_vm8, %v4786_v25, %v1002_v63  ;;  %v903_v56 = vmul.f32 %v4089_v8, %v871_v48  ;;  %v6372_v63 = vld [vmem:[#allocation28_spill] sm:$0xff] }
 0x157   :  { %v870_v29 = vsub.f32 2.0, %v838_v37  ;;  %v835_v20 = vmul.f32 %v4097_v16, %v4862_v21  ;;  %vm928_vm15 = vcmp.gt.f32.partialorder %v6366_v2, 20.0  ;;  %v4105_v10 = vpop.eup %4104  ;;  %1252 = vmatprep.subr.mxu1 %v1035_v44  ;;  %1140 = vmatpush1.msra.mxu0 %v1032_v34  ;;  %v997_v1 = vmul.f32 %v6367_v54, %v901_v58 }
 0x158   :  { %v900_v24 = vmul.f32 %v4091_v31, %v868_v50  ;;  %v865_v43 = vsub.f32 2.0, %v833_v28  ;;  %v832_v15 = vmul.f32 %v4099_v26, %v4847_v47  ;;  %v4107_v42 = vpop.eup %4106  ;;  %1253 = vmatpush1.msra.mxu1 %v1034_v55  ;;  %v999_v8 = vmul.f32 %v6368_v52, %v903_v56  ;;  %2542 = vxpose.xlu1.b32.cont [6/8] (short) %v4770_v57, 128 }
 0x159   :  { %v902_v21 = vmul.f32 %v4093_v36, %v870_v29  ;;  %v867_v17 = vsub.f32 2.0, %v835_v20  ;;  %v834_v11 = vmul.f32 %v4101_v40, %v4939_v9  ;;  %v4109_v44 = vpop.eup %4108  ;;  %v1029_v31 = vsel %vm933_vm9, %v4770_v57, %v997_v1  ;;  %v6371_v9 = vld [vmem:[#allocation27_spill] sm:$0xff] }
 0x15a   :  { %v996_v0 = vmul.f32 %v6369_v7, %v900_v24  ;;  %v897_v47 = vmul.f32 %v4095_v22, %v865_v43  ;;  %v864_v61 = vsub.f32 2.0, %v832_v15  ;;  %1141 = vmatprep.subr.mxu0 %v1029_v31  ;;  %v1031_v27 = vsel %vm935_vm10, %v4773_v62, %v999_v8  ;;  %v6376_v24 = vld [vmem:[#allocation42_spill] sm:$0xff]  ;;  %v6378_v43 = vld [vmem:[#allocation36_spill] sm:$0xff]  ;;  %v6379_v8 = vld [vmem:[#allocation15_spill] sm:$0xff] }
 0x15b   :  { %v998_v32 = vmul.f32 %v6370_v46, %v902_v21  ;;  %v899_v36 = vmul.f32 %v4097_v16, %v867_v17  ;;  %v866_v51 = vsub.f32 2.0, %v834_v11  ;;  %vm925_vm1 = vcmp.gt.f32.partialorder %v4728_v12, 20.0  ;;  %1254 = vmatprep.subr.mxu1 %v1031_v27  ;;  %v6380_v21 = vld [vmem:[#allocation34_spill] sm:$0xff]  ;;  %v6382_v31 = vld [vmem:[#allocation40_spill] sm:$0xff]  ;;  %v6385_v27 = vld [vmem:[#allocation21_spill] sm:$0xff] }
 0x15c   :  { %v1028_v57 = vsel %vm932_vm11, %v4760_v49, %v996_v0  ;;  %v993_v33 = vmul.f32 %v6371_v9, %v897_v47  ;;  %v896_v22 = vmul.f32 %v4099_v26, %v864_v61  ;;  %v829_v35 = vmul.f32 %v4103_v38, %v4952_v39  ;;  %v6373_v26 = vld [vmem:[#allocation26_spill] sm:$0xff]  ;;  %2543 = vxpose.xlu1.b32.cont [7/8] (short) %v4791_v18, 128  ;;  %v6383_v0 = vld [vmem:[#allocation25_spill] sm:$0xff] }
 0x15d   :  { %vm927_vm2 = vcmp.gt.f32.partialorder %v4731_v13, 20.0  ;;  %1142 = vmatpush1.msra.mxu0 %v1028_v57  ;;  %v1030_v16 = vsel %vm934_vm12, %v4763_v30, %v998_v32  ;;  %v995_v48 = vmul.f32 %v6372_v63, %v899_v36  ;;  %v898_v37 = vmul.f32 %v4101_v40, %v866_v51  ;;  %v6386_v9 = vld [vmem:[#allocation22_spill] sm:$0xff]  ;;  %v6387_v63 = vld [vmem:[#allocation19_spill] sm:$0xff] }
 0x15e   :  { %v831_v34 = vmul.f32 %v4105_v10, %v4967_v6  ;;  %1255 = vmatpush1.msra.mxu1 %v1030_v16  ;;  %v1025_v49 = vsel %vm929_vm13, %v4753_v41, %v993_v33  ;;  %v992_v58 = vmul.f32 %v6373_v26, %v896_v22  ;;  %v861_v39 = vsub.f32 2.0, %v829_v35 }
 0x15f   :  { %v828_v50 = vmul.f32 %v4107_v42, %v4976_v14  ;;  %1143 = vmatprep.subr.mxu0 %v1025_v49  ;;  %v1027_v28 = vsel %vm931_vm14, %v6365_v60, %v995_v48  ;;  %v994_v40 = vmul.f32 %v4950_v59, %v898_v37  ;;  %v830_v55 = vmul.f32 %v4109_v44, %v4991_v5  ;;  %v6374_v59 = vld [vmem:[#allocation41_spill] sm:$0xff]  ;;  %v6388_v37 = vld [vmem:[#allocation20_spill] sm:$0xff] }
 0x160   :  { %v863_v6 = vsub.f32 2.0, %v831_v34  ;;  %1256 = vmatprep.subr.mxu1 %v1027_v28  ;;  %v1024_v41 = vsel %vm928_vm15, %v6366_v2, %v992_v58  ;;  %v893_v56 = vmul.f32 %v4103_v38, %v861_v39  ;;  %4110 = vrcp.f32 %v4998_v45  ;;  %v6375_v5 = vld [vmem:[#allocation33_spill] sm:$0xff]  ;;  %v6377_v2 = vld [vmem:[#allocation23_spill] sm:$0xff]  ;;  %2544 = vxpose.xlu1.b32.end [8/8] (short) %v4818_v3, 128  ;;  %v6390_v58 = vld [vmem:[#allocation18_spill] sm:$0xff] }
 0x161   :  { %v860_v29 = vsub.f32 2.0, %v828_v50  ;;  %1144 = vmatpush1.msra.mxu0 %v1024_v41  ;;  %v1026_v18 = vsel %vm930_vm0, %v4745_v23, %v994_v40  ;;  %v862_v20 = vsub.f32 2.0, %v830_v55  ;;  %4112 = vrcp.f32 %v6374_v59  ;;  %v6389_v49 = vld [vmem:[#allocation17_spill] sm:$0xff] }
 0x162   :  { %v895_v14 = vmul.f32 %v4105_v10, %v863_v6  ;;  %1257 = vmatpush1.msra.mxu1 %v1026_v18  ;;  %v989_v54 = vmul.f32 %v6375_v5, %v893_v56  ;;  %4114 = vrcp.f32 %v6376_v24  ;;  %v693_v38 = vadd.f32 2.0, %v6377_v2  ;;  %v6381_v10 = vld [vmem:[#allocation43_spill] sm:$0xff]  ;;  %v5183_v18 = vpop.permute.xlu1 %1063 }
 0x163   :  { %v892_v1 = vmul.f32 %v4107_v42, %v860_v29  ;;  %v894_v52 = vmul.f32 %v4109_v44, %v862_v20  ;;  %v958_v17 = vmul.f32 %v6380_v21, %v6379_v8  ;;  %4116 = vrcp.f32 %v6381_v10  ;;  %v6384_v44 = vld [vmem:[#allocation12_spill] sm:$0xff]  ;;  %6391 = vst [vmem:[#allocation16_spill] sm:$0xff] %v5183_v18 }
 0x164   :  { %v991_v15 = vmul.f32 %v6378_v43, %v895_v14  ;;  %v1021_v11 = vsel %vm925_vm1, %v4728_v12, %v989_v54  ;;  %v5130_v7 = vmul.f32 %v6377_v2, %v693_v38  ;;  %v695_v47 = vadd.f32 2.0, %v6383_v0 }
 0x165   :  { %v988_v42 = vmul.f32 %v6382_v31, %v892_v1  ;;  %1145 = vmatprep.subr.mxu0 %v1021_v11  ;;  %vm924_vm3 = vcmp.gt.f32.partialorder %v6384_v44, 20.0  ;;  %v990_v61 = vmul.f32 %v958_v17, %v894_v52  ;;  %v692_v46 = vadd.f32 2.0, %v6385_v27  ;;  %v6392_v17 = vld [vmem:[#allocation14_spill] sm:$0xff]  ;;  %v6393_v11 = vld [vmem:[#allocation35_spill] sm:$0xff] }
 0x166   :  { %v1023_v3 = vsel %vm927_vm2, %v4731_v13, %v991_v15  ;;  %vm926_vm4 = vcmp.gt.f32.partialorder %v6379_v8, 20.0  ;;  %v757_v32 = vadd.f32 2.0, %v5130_v7  ;;  %v5142_v36 = vmul.f32 %v6383_v0, %v695_v47  ;;  %v6394_v0 = vld [vmem:[#allocation24_spill] sm:$0xff]  ;;  %v6395_v47 = vld [vmem:[#allocation37_spill] sm:$0xff] }
 0x167   :  { %1258 = vmatprep.subr.mxu1 %v1023_v3  ;;  %v1020_v12 = vsel %vm924_vm3, %v6384_v44, %v988_v42  ;;  %v1022_v51 = vsel %vm926_vm4, %v6379_v8, %v990_v61  ;;  %v5146_v57 = vmul.f32 %v6385_v27, %v692_v46  ;;  %v694_v33 = vadd.f32 2.0, %v6386_v9  ;;  %v6396_v46 = vld [vmem:[#allocation10_spill] sm:$0xff] }
 0x168   :  { %1146 = vmatpush1.msra.mxu0 %v1020_v12  ;;  %1259 = vmatpush1.msra.mxu1 %v1022_v51  ;;  %4118 = vrcp.f32 %v757_v32  ;;  %v5150_v22 = vadd.f32 2.0, %v5142_v36  ;;  %v689_v48 = vadd.f32 2.0, %v6387_v63  ;;  %v691_v34 = vadd.f32 2.0, %v6388_v37 }
 0x169   :  { %v5153_v35 = vadd.f32 2.0, %v5146_v57  ;;  %v5156_v16 = vmul.f32 %v6386_v9, %v694_v33  ;;  %v688_v26 = vadd.f32 2.0, %v6389_v49  ;;  %v690_v39 = vadd.f32 2.0, %v6390_v58 }
 0x16a   :  { %4120 = vrcp.f32 %v5150_v22  ;;  %v5168_v28 = vmul.f32 %v6387_v63, %v689_v48  ;;  %v5171_v40 = vmul.f32 %v6388_v37, %v691_v34  ;;  %v955_v3 = vmul.f32 %v6395_v47, %v6394_v0  ;;  %v6398_v63 = vld [vmem:[#allocation11_spill] sm:$0xff] }
 0x16b   :  { %4122 = vrcp.f32 %v5153_v35  ;;  %v5165_v50 = vadd.f32 2.0, %v5156_v16  ;;  %v5174_v6 = vmul.f32 %v6389_v49, %v688_v26  ;;  %v5177_v55 = vmul.f32 %v6390_v58, %v690_v39  ;;  %v6399_v48 = vld [vmem:[#allocation39_spill] sm:$0xff] }
 0x16c   :  { %v5181_v56 = vadd.f32 2.0, %v5168_v28  ;;  %v5187_v20 = vadd.f32 2.0, %v5171_v40  ;;  %vm921_vm5 = vcmp.gt.f32.partialorder %v6392_v17, 20.0  ;;  %v954_v37 = vmul.f32 %v6399_v48, %v6398_v63 }
 0x16d   :  { %v4111_v41 = vpop.eup %4110  ;;  %4124 = vrcp.f32 %v5165_v50  ;;  %v5190_v5 = vadd.f32 2.0, %v5174_v6  ;;  %v5195_v2 = vadd.f32 2.0, %v5177_v55  ;;  %vm923_vm6 = vcmp.gt.f32.partialorder %v6394_v0, 20.0 }
 0x16e   :  { %v4113_v29 = vpop.eup %4112  ;;  %v825_v14 = vmul.f32 %v4111_v41, %v4998_v45  ;;  %4126 = vrcp.f32 %v5181_v56  ;;  %vm920_vm7 = vcmp.gt.f32.partialorder %v6396_v46, 20.0  ;;  %vm922_vm8 = vcmp.gt.f32.partialorder %v6398_v63, 20.0 }
 0x16f   :  { %v4115_v54 = vpop.eup %4114  ;;  %v827_v1 = vmul.f32 %v4113_v29, %v6374_v59  ;;  %4128 = vrcp.f32 %v5187_v20  ;;  %v953_v59 = vmul.f32 %v6393_v11, %v6392_v17  ;;  %v6401_v11 = vld [vmem:[#allocation9_spill] sm:$0xff]  ;;  %vm1096_vm0 = vcmask 523264  }
 0x170   :  { %v4117_v38 = vpop.eup %4116  ;;  %v857_v43 = vsub.f32 2.0, %v825_v14  ;;  %v824_v15 = vmul.f32 %v4115_v54, %v6376_v24  ;;  %4130 = vrcp.f32 %v5190_v5  ;;  %v5206_v24 = vpop.permute.xlu1 %1073  ;;  %vm919_vm10 = vcmp.gt.f32.partialorder %v6401_v11, 20.0 }
 0x171   :  { %v859_v45 = vsub.f32 2.0, %v827_v1  ;;  %v826_v52 = vmul.f32 %v4117_v38, %v6381_v10  ;;  %4132 = vrcp.f32 %v5195_v2  ;;  %v6397_v10 = vld [vmem:[#allocation38_spill] sm:$0xff] }
 0x172   :  { %v889_v21 = vmul.f32 %v4111_v41, %v857_v43  ;;  %v856_v31 = vsub.f32 2.0, %v824_v15  ;;  %v952_v12 = vmul.f32 %v6397_v10, %v6396_v46 }
 0x173   :  { %v891_v42 = vmul.f32 %v4113_v29, %v859_v45  ;;  %v858_v44 = vsub.f32 2.0, %v826_v52  ;;  %v6400_v52 = vld [vmem:[#allocation8_spill] sm:$0xff] }
 0x174   :  { %v985_v61 = vmul.f32 %v953_v59, %v889_v21  ;;  %v888_v27 = vmul.f32 %v4115_v54, %v856_v31  ;;  %v5222_v15 = vpop.permute.xlu1 %1083  ;;  %v949_v21 = vmul.f32 %v5130_v7, %v6400_v52  ;;  %vm917_vm9 = vcmp.gt.f32.partialorder %v6400_v52, 20.0 }
 0x175   :  { %v4119_v51 = vpop.eup %4118  ;;  %v987_v9 = vmul.f32 %v955_v3, %v891_v42  ;;  %v890_v33 = vmul.f32 %v4117_v38, %v858_v44  ;;  %v6402_v3 = vld [vmem:[#allocation6_spill] sm:$0xff] }
 0x176   :  { %v1017_v34 = vsel %vm921_vm5, %v6392_v17, %v985_v61  ;;  %v984_v49 = vmul.f32 %v952_v12, %v888_v27  ;;  %v821_v26 = vmul.f32 %v4119_v51, %v757_v32  ;;  %vm916_vm11 = vcmp.gt.f32.partialorder %v6402_v3, 20.0 }
 0x177   :  { %v4121_v58 = vpop.eup %4120  ;;  %1147 = vmatprep.subr.mxu0 %v1017_v34  ;;  %v1019_v39 = vsel %vm923_vm6, %v6394_v0, %v987_v9  ;;  %v986_v41 = vmul.f32 %v954_v37, %v890_v33  ;;  %v948_v7 = vmul.f32 %v5146_v57, %v6402_v3 }
 0x178   :  { %v4123_v29 = vpop.eup %4122  ;;  %1260 = vmatprep.subr.mxu1 %v1019_v39  ;;  %v1016_v14 = vsel %vm920_vm7, %v6396_v46, %v984_v49  ;;  %v853_v54 = vsub.f32 2.0, %v821_v26  ;;  %v823_v1 = vmul.f32 %v4121_v58, %v5150_v22  ;;  %v5240_v57 = vpop.permute.xlu1 %1093  ;;  %v6404_v26 = vld [vmem:[#allocation4_spill] sm:$0xff] }
 0x179   :  { %1148 = vmatpush1.msra.mxu0 %v1016_v14  ;;  %v1018_v38 = vsel %vm922_vm8, %v6398_v63, %v986_v41  ;;  %v820_v32 = vmul.f32 %v4123_v29, %v5153_v35  ;;  %v951_v35 = vmul.f32 %v5142_v36, %v6401_v11  ;;  %vm913_vm13 = vcmp.gt.f32.partialorder %v6404_v26, 20.0 }
 0x17a   :  { %v4125_v43 = vpop.eup %4124  ;;  %1261 = vmatpush1.msra.mxu1 %v1018_v38  ;;  %v885_v45 = vmul.f32 %v4119_v51, %v853_v54  ;;  %v855_v17 = vsub.f32 2.0, %v823_v1  ;;  %v6403_v51 = vld [vmem:[#allocation7_spill] sm:$0xff]  ;;  %v6405_v54 = vld [vmem:[#allocation5_spill] sm:$0xff] }
 0x17b   :  { %v852_v59 = vsub.f32 2.0, %v820_v32  ;;  %v822_v22 = vmul.f32 %v4125_v43, %v5165_v50  ;;  %v4127_v31 = vpop.eup %4126  ;;  %v950_v9 = vmul.f32 %v5156_v16, %v6403_v51  ;;  %vm918_vm12 = vcmp.gt.f32.partialorder %v6403_v51, 20.0 }
 0x17c   :  { %v981_v42 = vmul.f32 %v949_v21, %v885_v45  ;;  %v887_v47 = vmul.f32 %v4121_v58, %v855_v17  ;;  %v4129_v44 = vpop.eup %4128  ;;  %v817_v46 = vmul.f32 %v4127_v31, %v5181_v56  ;;  %v945_v58 = vmul.f32 %v5168_v28, %v6404_v26 }
 0x17d   :  { %v884_v61 = vmul.f32 %v4123_v29, %v852_v59  ;;  %v854_v27 = vsub.f32 2.0, %v822_v22  ;;  %v4131_v10 = vpop.eup %4130  ;;  %v819_v33 = vmul.f32 %v4129_v44, %v5187_v20  ;;  %v947_v1 = vmul.f32 %v5171_v40, %v6405_v54 }
 0x17e   :  { %v1013_v12 = vsel %vm917_vm9, %v6400_v52, %v981_v42  ;;  %v983_v50 = vmul.f32 %v951_v35, %v887_v47  ;;  %v4133_v36 = vpop.eup %4132  ;;  %v849_v34 = vsub.f32 2.0, %v817_v46  ;;  %v816_v49 = vmul.f32 %v4131_v10, %v5190_v5  ;;  %v6407_v52 = vld [vmem:[#allocation3_spill] sm:$0xff]  ;;  %v1040_v47 = vld [vmem:[%s6262_s3] sm:$0xff] }
 0x17f   :  { %1149 = vmatprep.subr.mxu0 %v1013_v12  ;;  %v980_v48 = vmul.f32 %v948_v7, %v884_v61  ;;  %v886_v37 = vmul.f32 %v4125_v43, %v854_v27  ;;  %v851_v39 = vsub.f32 2.0, %v819_v33  ;;  %v818_v16 = vmul.f32 %v4133_v36, %v5195_v2  ;;  %v6406_v43 = vld [vmem:[#allocation2_spill] sm:$0xff]  ;;  %v1041_v61 = vld [vmem:[%s6262_s3 + $0x8] sm:$0xff]  ;;  %v1042_v27 = vld [vmem:[%s6262_s3 + $0x10] sm:$0xff] }
 0x180   :  { %v1015_v56 = vsel %vm919_vm10, %v6401_v11, %v983_v50  ;;  %v881_v29 = vmul.f32 %v4127_v31, %v849_v34  ;;  %v848_v5 = vsub.f32 2.0, %v816_v49  ;;  %v944_v45 = vmul.f32 %v5174_v6, %v6406_v43 }
 0x181   :  { %1262 = vmatprep.subr.mxu1 %v1015_v56  ;;  %v1012_v20 = vsel %vm916_vm11, %v6402_v3, %v980_v48  ;;  %v982_v41 = vmul.f32 %v950_v9, %v886_v37  ;;  %v883_v14 = vmul.f32 %v4129_v44, %v851_v39  ;;  %v850_v38 = vsub.f32 2.0, %v818_v16  ;;  %2569 = vxpose.xlu1.b32.start [1/8] (short) %v6407_v52, 128 }
 0x182   :  { %1150 = vmatpush1.msra.mxu0 %v1012_v20  ;;  %v977_v32 = vmul.f32 %v945_v58, %v881_v29  ;;  %v880_v2 = vmul.f32 %v4131_v10, %v848_v5  ;;  %v946_v59 = vmul.f32 %v5177_v55, %v6407_v52  ;;  %v5261_v22 = vpop.trf.xlu1  ;;  %vm915_vm14 = vcmp.gt.f32.partialorder %v6405_v54, 20.0 }
 0x183   :  { %v1014_v28 = vsel %vm918_vm12, %v6403_v51, %v982_v41  ;;  %v979_v21 = vmul.f32 %v947_v1, %v883_v14  ;;  %v882_v17 = vmul.f32 %v4133_v36, %v850_v38  ;;  %vm912_vm15 = vcmp.gt.f32.partialorder %v6406_v43, 20.0 }
 0x184   :  { %1263 = vmatpush1.msra.mxu1 %v1014_v28  ;;  %v1009_v40 = vsel %vm913_vm13, %v6404_v26, %v977_v32  ;;  %v976_v31 = vmul.f32 %v944_v45, %v880_v2  ;;  %vm914_vm1 = vcmp.gt.f32.partialorder %v6407_v52, 20.0  ;;  %v6408_v44 = vmov 0.0  }
 0x185   :  { %1151 = vmatprep.subr.mxu0 %v1009_v40  ;;  %v1011_v6 = vsel %vm915_vm14, %v6405_v54, %v979_v21  ;;  %v978_v42 = vmul.f32 %v946_v59, %v882_v17  ;;  %2570 = vxpose.xlu1.b32.cont [2/8] (short) %v6403_v51, 128 }
 0x186   :  { %1264 = vmatprep.subr.mxu1 %v1011_v6  ;;  %v1008_v55 = vsel %vm912_vm15, %v6406_v43, %v976_v31  ;;  %v5274_v3 = vpop.trf.xlu1 }
 0x187   :  { %1152 = vmatpush1.msra.mxu0 %v1008_v55  ;;  %v1010_v35 = vsel %vm914_vm1, %v6407_v52, %v978_v42 }
 0x188   :  { %1265 = vmatpush1.msra.mxu1 %v1010_v35  ;;  %3433 = vmatmul.mubr.msk.f32.vlgmr.msra.gmra.mxu0 %vm1096_vm0, %v1040_v47 }
 0x189   :  { %3441 = vmatmul.mubr.msk.f32.vlgmr.msra.gmra.mxu1 %vm1096_vm0, %v1040_v47  ;;  %1191 = vmatprep.mubr.f32.mxu0 %v6408_v44 }
 0x18a   :  { %1304 = vmatprep.mubr.f32.mxu1 %v6408_v44  ;;  %2571 = vxpose.xlu1.b32.cont [3/8] (short) %v6398_v63, 128  ;;  %v5284_v7 = vpop.trf.xlu1  ;;  %v1043_v63 = vld [vmem:[%s6262_s3 + $0x18] sm:$0xff] }
 0x18c   :  { %3434 = vmatmul.mubr.msk.f32.gmra.mxu0 %vm1096_vm0, %v1041_v61 }
 0x18d   :  { %3442 = vmatmul.mubr.msk.f32.gmra.mxu1 %vm1096_vm0, %v1041_v61  ;;  %1197 = vmatprep.mubr.f32.mxu0 %v6408_v44 }
 0x18e   :  { %1310 = vmatprep.mubr.f32.mxu1 %v6408_v44  ;;  %2572 = vxpose.xlu1.b32.cont [4/8] (short) %v6379_v8, 128  ;;  %v5294_v46 = vpop.trf.xlu1  ;;  %v1044_v8 = vld [vmem:[%s6262_s3 + $0x20] sm:$0xff] }
 0x190   :  { %3435 = vmatmul.mubr.msk.f32.gmra.mxu0 %vm1096_vm0, %v1042_v27 }
 0x191   :  { %3443 = vmatmul.mubr.msk.f32.gmra.mxu1 %vm1096_vm0, %v1042_v27  ;;  %1203 = vmatprep.mubr.f32.mxu0 %v6408_v44 }
 0x192   :  { %1316 = vmatprep.mubr.f32.mxu1 %v6408_v44  ;;  %2573 = vxpose.xlu1.b32.cont [5/8] (short) %v4745_v23, 128  ;;  %v5304_v10 = vpop.trf.xlu1  ;;  %v1045_v23 = vld [vmem:[%s6262_s3 + $0x28] sm:$0xff] }
 0x194   :  { %3436 = vmatmul.mubr.msk.f32.gmra.mxu0 %vm1096_vm0, %v1043_v63 }
 0x195   :  { %3444 = vmatmul.mubr.msk.f32.gmra.mxu1 %vm1096_vm0, %v1043_v63  ;;  %1209 = vmatprep.mubr.f32.mxu0 %v6408_v44 }
 0x196   :  { %1322 = vmatprep.mubr.f32.mxu1 %v6408_v44  ;;  %2574 = vxpose.xlu1.b32.cont [6/8] (short) %v4763_v30, 128  ;;  %v5314_v12 = vpop.trf.xlu1  ;;  %v1046_v30 = vld [vmem:[%s6262_s3 + $0x30] sm:$0xff] }
 0x198   :  { %3437 = vmatmul.mubr.msk.f32.gmra.mxu0 %vm1096_vm0, %v1044_v8 }
 0x199   :  { %3445 = vmatmul.mubr.msk.f32.gmra.mxu1 %vm1096_vm0, %v1044_v8  ;;  %1215 = vmatprep.mubr.f32.mxu0 %v6408_v44 }
 0x19a   :  { %1328 = vmatprep.mubr.f32.mxu1 %v6408_v44  ;;  %2575 = vxpose.xlu1.b32.cont [7/8] (short) %v4786_v25, 128  ;;  %v5324_v50 = vpop.trf.xlu1  ;;  %v1047_v25 = vld [vmem:[%s6262_s3 + $0x38] sm:$0xff] }
 0x19c   :  { %3438 = vmatmul.mubr.msk.f32.gmra.mxu0 %vm1096_vm0, %v1045_v23 }
 0x19d   :  { %3446 = vmatmul.mubr.msk.f32.gmra.mxu1 %vm1096_vm0, %v1045_v23  ;;  %1221 = vmatprep.mubr.f32.mxu0 %v6408_v44 }
 0x19e   :  { %1334 = vmatprep.mubr.f32.mxu1 %v6408_v44  ;;  %2576 = vxpose.xlu1.b32.end [8/8] (short) %v4809_v53, 128  ;;  %v5334_v51 = vpop.trf.xlu1 }
 0x1a0   :  { %3439 = vmatmul.mubr.msk.f32.gmra.mxu0 %vm1096_vm0, %v1046_v30 }
 0x1a1   :  { %3447 = vmatmul.mubr.msk.f32.gmra.mxu1 %vm1096_vm0, %v1046_v30  ;;  %1227 = vmatprep.mubr.f32.mxu0 %v6408_v44 }
 0x1a2   :  { %1340 = vmatprep.mubr.f32.mxu1 %v6408_v44  ;;  %v5343_v9 = vpop.trf.xlu1 }
 0x1a4   :  { %3440 = vmatmul.mubr.msk.f32.gmra.mxu0 %vm1096_vm0, %v1047_v25 }
 0x1a5   :  { %3448 = vmatmul.mubr.msk.f32.gmra.mxu1 %vm1096_vm0, %v1047_v25 }
 0x1a6   :  { %3906 = vmatprep.mubr.msk.f32.mxu1 %vm1096_vm0, %v5261_v22  ;;  %v5349_v53 = vpop.trf.xlu1 }
 0x1aa   :  { %v5351_v33 = vpop.trf.xlu1 }
 0x1ab   :  { %6409 = vst [vmem:[#allocation13_spill] sm:$0xff] %v5351_v33 }
 0x1ae   :  { %v5353_v36 = vpop.trf.xlu1 }
 0x1af   :  { %6410 = vst [vmem:[#allocation31_spill] sm:$0xff] %v5353_v36 }
 0x1b2   :  { %v5355_v48 = vpop.trf.xlu1 }
 0x1b3   :  { %6411 = vst [vmem:[#allocation32_spill] sm:$0xff] %v5355_v48 }
 0x1b6   :  { %v5357_v37 = vpop.trf.xlu1 }
 0x1b7   :  { %6412 = vst [vmem:[#allocation29_spill] sm:$0xff] %v5357_v37 }
 0x1ba   :  { %v5359_v34 = vpop.trf.xlu1 }
 0x1bb   :  { %6413 = vst [vmem:[#allocation30_spill] sm:$0xff] %v5359_v34 }
 0x1bf   :  { %2601 = vxpose.xlu1.b32.start [1/8] (short) %v6405_v54, 128 }
 0x1c3   :  { %2602 = vxpose.xlu1.b32.cont [2/8] (short) %v6401_v11, 128 }
 0x1c7   :  { %2603 = vxpose.xlu1.b32.cont [3/8] (short) %v6394_v0, 128  ;;  %v5375_v0 = vpop.permute.xlu0 %1058 }
 0x1c8   :  { %6414 = vst [vmem:[#allocation27_spill] sm:$0xff] %v5375_v0 }
 0x1cb   :  { %2604 = vxpose.xlu1.b32.cont [4/8] (short) %v4731_v13, 128 }
 0x1cf   :  { %2605 = vxpose.xlu1.b32.cont [5/8] (short) %v6365_v60, 128 }
 0x1d3   :  { %2606 = vxpose.xlu1.b32.cont [6/8] (short) %v4773_v62, 128  ;;  %v5380_v62 = vpop.permute.xlu0 %1068 }
 0x1d7   :  { %2607 = vxpose.xlu1.b32.cont [7/8] (short) %v4794_v19, 128  ;;  %v5393_v54 = vpop.permute.xlu0 %1078 }
 0x1db   :  { %2608 = vxpose.xlu1.b32.end [8/8] (short) %v4821_v4, 128  ;;  %v5411_v47 = vpop.permute.xlu0 %1088 }
 0x248   :  { %v1187_v49 = vpop.f32.mrf.mxu0 }
 0x249   :  { %v5396_v1 = vadd.f32 %v1187_v49, %v5375_v0 }
 0x24a   :  { %v5369_v56 = vpop.f32.mrf.mxu0 }
 0x24b   :  { %v1347_v43 = vmin.f32 %v5396_v1, 20.0  ;;  %vm1667_vm2 = vcmp.gt.f32.partialorder %v5396_v1, 20.0 }
 0x24c   :  { %v1193_v26 = vpop.f32.mrf.mxu0 }
 0x24d   :  { %v5378_v13 = vadd.f32 %v1193_v26, %v5183_v18  ;;  %v1379_v21 = vmul.f32 1.442695, %v1347_v43 }
 0x24e   :  { %v5371_v58 = vpop.f32.mrf.mxu0 }
 0x24f   :  { %v1351_v19 = vmin.f32 %v5378_v13, 20.0  ;;  %vm1671_vm3 = vcmp.gt.f32.partialorder %v5378_v13, 20.0 }
 0x250   :  { %v1199_v39 = vpop.f32.mrf.mxu0 }
 0x251   :  { %v5384_v4 = vadd.f32 %v1199_v39, %v5380_v62  ;;  %v1387_v41 = vmul.f32 1.442695, %v1351_v19 }
 0x252   :  { %v5373_v11 = vpop.f32.mrf.mxu0 }
 0x253   :  { %v1355_v29 = vmin.f32 %v5384_v4, 20.0  ;;  %4134 = vpow2.f32 %v1387_v41  ;;  %vm1675_vm4 = vcmp.gt.f32.partialorder %v5384_v4, 20.0 }
 0x254   :  { %v1205_v60 = vpop.f32.mrf.mxu0 }
 0x255   :  { %v5389_v20 = vadd.f32 %v1205_v60, %v5206_v24  ;;  %v1395_v38 = vmul.f32 1.442695, %v1355_v29 }
 0x256   :  { %v5386_v16 = vpop.f32.mrf.mxu0 }
 0x257   :  { %v1359_v14 = vmin.f32 %v5389_v20, 20.0  ;;  %4136 = vpow2.f32 %v1395_v38  ;;  %vm1679_vm5 = vcmp.gt.f32.partialorder %v5389_v20, 20.0 }
 0x258   :  { %v1211_v5 = vpop.f32.mrf.mxu0 }
 0x259   :  { %v5399_v28 = vadd.f32 %v1211_v5, %v5393_v54  ;;  %v1403_v2 = vmul.f32 1.442695, %v1359_v14 }
 0x25a   :  { %v5401_v32 = vpop.f32.mrf.mxu0 }
 0x25b   :  { %v1363_v45 = vmin.f32 %v5399_v28, 20.0  ;;  %4138 = vpow2.f32 %v1403_v2  ;;  %vm1683_vm6 = vcmp.gt.f32.partialorder %v5399_v28, 20.0 }
 0x25c   :  { %v1217_v52 = vpop.f32.mrf.mxu0  ;;  %4140 = vpow2.f32 %v1379_v21 }
 0x25d   :  { %v5406_v17 = vadd.f32 %v1217_v52, %v5222_v15  ;;  %v1411_v59 = vmul.f32 1.442695, %v1363_v45 }
 0x25e   :  { %v5408_v22 = vpop.f32.mrf.mxu0 }
 0x25f   :  { %v1367_v40 = vmin.f32 %v5406_v17, 20.0  ;;  %4142 = vpow2.f32 %v1411_v59  ;;  %vm1687_vm7 = vcmp.gt.f32.partialorder %v5406_v17, 20.0 }
 0x260   :  { %v1223_v31 = vpop.f32.mrf.mxu0  ;;  %v4135_v6 = vpop.eup %4134 }
 0x261   :  { %v1419_v42 = vmul.f32 1.442695, %v1367_v40  ;;  %v1447_v55 = vadd.f32 2.0, %v4135_v6  ;;  %v5416_v61 = vadd.f32 %v1223_v31, %v5411_v47 }
 0x262   :  { %v5413_v35 = vpop.f32.mrf.mxu0 }
 0x263   :  { %4144 = vpow2.f32 %v1419_v42  ;;  %v1479_v63 = vmul.f32 %v4135_v6, %v1447_v55  ;;  %v1371_v23 = vmin.f32 %v5416_v61, 20.0  ;;  %vm1691_vm8 = vcmp.gt.f32.partialorder %v5416_v61, 20.0 }
 0x264   :  { %v4137_v44 = vpop.eup %4136  ;;  %v1229_v30 = vpop.f32.mrf.mxu0 }
 0x265   :  { %v1451_v8 = vadd.f32 2.0, %v4137_v44  ;;  %v1427_v49 = vmul.f32 1.442695, %v1371_v23  ;;  %v5420_v26 = vadd.f32 %v1229_v30, %v5240_v57  ;;  %v1511_v60 = vadd.f32 2.0, %v1479_v63 }
 0x267   :  { %v5422_v19 = vmul.f32 %v4137_v44, %v1451_v8  ;;  %v1375_v29 = vmin.f32 %v5420_v26, 20.0  ;;  %4146 = vpow2.f32 %v1427_v49  ;;  %vm1695_vm9 = vcmp.gt.f32.partialorder %v5420_v26, 20.0 }
 0x268   :  { %v4139_v27 = vpop.eup %4138  ;;  %4148 = vrcp.f32 %v1511_v60 }
 0x269   :  { %v1455_v25 = vadd.f32 2.0, %v4139_v27  ;;  %v4141_v39 = vpop.eup %4140  ;;  %v1435_v14 = vmul.f32 1.442695, %v1375_v29  ;;  %v1515_v38 = vadd.f32 2.0, %v5422_v19 }
 0x26a   :  { %v1443_v43 = vadd.f32 2.0, %v4141_v39 }
 0x26b   :  { %v5425_v5 = vmul.f32 %v4139_v27, %v1455_v25  ;;  %4150 = vpow2.f32 %v1435_v14  ;;  %v5440_v14 = vadd.f32 %v5369_v56, %v5375_v0 }
 0x26c   :  { %v4143_v41 = vpop.eup %4142  ;;  %v1475_v52 = vmul.f32 %v4141_v39, %v1443_v43  ;;  %4152 = vrcp.f32 %v1515_v38 }
 0x26d   :  { %v1459_v2 = vadd.f32 2.0, %v4143_v41  ;;  %v1519_v45 = vadd.f32 2.0, %v5425_v5  ;;  %6415 = vst [vmem:[#allocation28_spill] sm:$0xff] %v5440_v14  ;;  %v1348_v34 = vmin.f32 %v5440_v14, 20.0 }
 0x26e   :  { %v1507_v40 = vadd.f32 2.0, %v1475_v52 }
 0x26f   :  { %v5429_v59 = vmul.f32 %v4143_v41, %v1459_v2  ;;  %4154 = vrcp.f32 %v1519_v45 }
 0x270   :  { %v4145_v21 = vpop.eup %4144  ;;  %4156 = vrcp.f32 %v1507_v40 }
 0x271   :  { %v1463_v31 = vadd.f32 2.0, %v4145_v21  ;;  %v1523_v6 = vadd.f32 2.0, %v5429_v59 }
 0x273   :  { %v5432_v42 = vmul.f32 %v4145_v21, %v1463_v31  ;;  %4158 = vrcp.f32 %v1523_v6 }
 0x274   :  { %v4147_v55 = vpop.eup %4146 }
 0x275   :  { %v1527_v44 = vadd.f32 2.0, %v5432_v42  ;;  %v1467_v27 = vadd.f32 2.0, %v4147_v55  ;;  %v4149_v8 = vpop.eup %4148 }
 0x276   :  { %v1575_v49 = vmul.f32 %v4149_v8, %v1511_v60 }
 0x277   :  { %v5435_v23 = vmul.f32 %v4147_v55, %v1467_v27  ;;  %4160 = vrcp.f32 %v1527_v44  ;;  %v5446_v55 = vadd.f32 %v5371_v58, %v5183_v18 }
 0x278   :  { %v4151_v30 = vpop.eup %4150  ;;  %v1607_v21 = vsub.f32 2.0, %v1575_v49  ;;  %v1703_v49 = vmul.f32 %v1479_v63, %v5378_v13  ;;  %v1707_v63 = vmul.f32 %v5422_v19, %v5384_v4  ;;  %v1711_v19 = vmul.f32 %v5425_v5, %v5389_v20 }
 0x279   :  { %v1531_v25 = vadd.f32 2.0, %v5435_v23  ;;  %v4153_v39 = vpop.eup %4152  ;;  %v1471_v41 = vadd.f32 2.0, %v4151_v30  ;;  %v1715_v5 = vmul.f32 %v5429_v59, %v5399_v28  ;;  %vm1672_vm11 = vcmp.gt.f32.partialorder %v5446_v55, 20.0 }
 0x27a   :  { %v1579_v31 = vmul.f32 %v4153_v39, %v1515_v38  ;;  %v1639_v56 = vmul.f32 %v4149_v8, %v1607_v21  ;;  %v5454_v38 = vadd.f32 %v5373_v11, %v5380_v62 }
 0x27b   :  { %4162 = vrcp.f32 %v1531_v25  ;;  %v5442_v43 = vmul.f32 %v4151_v30, %v1471_v41  ;;  %v1352_v30 = vmin.f32 %v5446_v55, 20.0  ;;  %v1381_v41 = vmul.f32 1.442695, %v1348_v34 }
 0x27c   :  { %v4155_v29 = vpop.eup %4154  ;;  %v1611_v0 = vsub.f32 2.0, %v1579_v31  ;;  %v1356_v31 = vmin.f32 %v5454_v38, 20.0  ;;  %vm1676_vm12 = vcmp.gt.f32.partialorder %v5454_v38, 20.0 }
 0x27d   :  { %v4157_v2 = vpop.eup %4156  ;;  %v1535_v60 = vadd.f32 2.0, %v5442_v43  ;;  %v1583_v37 = vmul.f32 %v4155_v29, %v1519_v45  ;;  %v1735_v45 = vmul.f32 %v1703_v49, %v1639_v56  ;;  %v1389_v21 = vmul.f32 1.442695, %v1352_v30 }
 0x27e   :  { %v1571_v27 = vmul.f32 %v4157_v2, %v1507_v40  ;;  %v1699_v40 = vmul.f32 %v1475_v52, %v5396_v1  ;;  %v1643_v33 = vmul.f32 %v4153_v39, %v1611_v0  ;;  %v5481_v56 = vadd.f32 %v5408_v22, %v5222_v15  ;;  %v1796_v22 = vld [vmem:[%s6263_s6] sm:$0xf] }
 0x27f   :  { %4164 = vrcp.f32 %v1535_v60  ;;  %v1615_v18 = vsub.f32 2.0, %v1583_v37  ;;  %v1767_v34 = vsel %vm1671_vm3, %v5378_v13, %v1735_v45  ;;  %3806 = vmatprep.subr.msk.mxu0 %vm1096_vm0, %v1796_v22 }
 0x280   :  { %v1603_v48 = vsub.f32 2.0, %v1571_v27  ;;  %v4159_v36 = vpop.eup %4158  ;;  %4166 = vpow2.f32 %v1381_v41  ;;  %v1739_v0 = vmul.f32 %v1707_v63, %v1643_v33  ;;  %v1368_v59 = vmin.f32 %v5481_v56, 20.0  ;;  %v1795_v41 = vld [vmem:[%s6264_s5] sm:$0xf]  ;;  %3807 = vmatpush3.xpose.msk.msra.mxu0 %vm1096_vm0, %v1796_v22 }
 0x281   :  { %v1587_v27 = vmul.f32 %v4159_v36, %v1523_v6  ;;  %v1647_v37 = vmul.f32 %v4155_v29, %v1615_v18  ;;  %4168 = vpow2.f32 %v1389_v21  ;;  %3904 = vmatprep.subr.msk.mxu1 %vm1096_vm0, %v1795_v41  ;;  %vm1688_vm15 = vcmp.gt.f32.partialorder %v5481_v56, 20.0 }
 0x282   :  { %v1635_v58 = vmul.f32 %v4157_v2, %v1603_v48  ;;  %v5464_v48 = vadd.f32 %v5386_v16, %v5206_v24  ;;  %v5473_v16 = vadd.f32 %v5401_v32, %v5393_v54  ;;  %v1771_v33 = vsel %vm1675_vm4, %v5384_v4, %v1739_v0  ;;  %3905 = vmatpush3.xpose.msk.msra.mxu1 %vm1096_vm0, %v1795_v41  ;;  %v6418_v41 = vld [vmem:[#allocation32_spill] sm:$0xff] }
 0x283   :  { %v1619_v52 = vsub.f32 2.0, %v1587_v27  ;;  %v1743_v18 = vmul.f32 %v1711_v19, %v1647_v37 }
 0x284   :  { %v1731_v14 = vmul.f32 %v1699_v40, %v1635_v58  ;;  %v4161_v8 = vpop.eup %4160  ;;  %v1364_v30 = vmin.f32 %v5473_v16, 20.0  ;;  %v1719_v40 = vmul.f32 %v5432_v42, %v5406_v17  ;;  %vm1680_vm13 = vcmp.gt.f32.partialorder %v5464_v48, 20.0 }
 0x285   :  { %v1591_v6 = vmul.f32 %v4161_v8, %v1527_v44  ;;  %v1651_v13 = vmul.f32 %v4159_v36, %v1619_v52  ;;  %v1775_v4 = vsel %vm1679_vm5, %v5389_v20, %v1743_v18  ;;  %v5497_v20 = vadd.f32 %v5413_v35, %v5411_v47  ;;  %3907 = vmatmul.mubr.msk.f32.vlgmr.msra.gmra.mxu1 %vm1096_vm0, %v5274_v3 }
 0x286   :  { %v1763_v11 = vsel %vm1667_vm2, %v5396_v1, %v1731_v14  ;;  %v1397_v1 = vmul.f32 1.442695, %v1356_v31  ;;  %v1360_v14 = vmin.f32 %v5464_v48, 20.0  ;;  %v1413_v45 = vmul.f32 1.442695, %v1364_v30  ;;  %3909 = vmatprep.mubr.msk.f32.mxu1 %vm1096_vm0, %v5284_v7 }
 0x287   :  { %1797 = vxpose.xlu0.b32.start [1/8] (short) %v1763_v11, 128  ;;  %v1623_v44 = vsub.f32 2.0, %v1591_v6  ;;  %v1747_v36 = vmul.f32 %v1715_v5, %v1651_v13  ;;  %v1421_v35 = vmul.f32 1.442695, %v1368_v59  ;;  %v1723_v31 = vmul.f32 %v5435_v23, %v5416_v61  ;;  %v6417_v59 = vld [vmem:[#allocation31_spill] sm:$0xff] }
 0x288   :  { %v4163_v39 = vpop.eup %4162  ;;  %4170 = vpow2.f32 %v1397_v1  ;;  %v1405_v32 = vmul.f32 1.442695, %v1360_v14  ;;  %v1727_v23 = vmul.f32 %v5442_v43, %v5420_v26  ;;  %vm1684_vm14 = vcmp.gt.f32.partialorder %v5473_v16, 20.0 }
 0x289   :  { %v1595_v29 = vmul.f32 %v4163_v39, %v1531_v25  ;;  %v1655_v49 = vmul.f32 %v4161_v8, %v1623_v44  ;;  %v1779_v27 = vsel %vm1683_vm6, %v5399_v28, %v1747_v36  ;;  %v1372_v28 = vmin.f32 %v5497_v20, 20.0  ;;  %3910 = vmatmul.mubr.msk.f32.gmra.mxu1 %vm1096_vm0, %v5294_v46 }
 0x28a   :  { %4172 = vpow2.f32 %v1405_v32  ;;  %3912 = vmatprep.mubr.msk.f32.mxu1 %vm1096_vm0, %v5304_v10  ;;  %vm1692_vm1 = vcmp.gt.f32.partialorder %v5497_v20, 20.0 }
 0x28b   :  { %1798 = vxpose.xlu0.b32.cont [2/8] (short) %v1767_v34, 128  ;;  %v1627_v25 = vsub.f32 2.0, %v1595_v29  ;;  %v1751_v8 = vmul.f32 %v1719_v40, %v1655_v49  ;;  %4174 = vpow2.f32 %v1413_v45  ;;  %v1429_v18 = vmul.f32 1.442695, %v1372_v28 }
 0x28c   :  { %v4165_v2 = vpop.eup %4164  ;;  %4176 = vpow2.f32 %v1421_v35 }
 0x28d   :  { %v1599_v58 = vmul.f32 %v4165_v2, %v1535_v60  ;;  %v1231_v60 = vpop.f32.mrf.mxu0  ;;  %v4167_v42 = vpop.eup %4166  ;;  %v1659_v21 = vmul.f32 %v4163_v39, %v1627_v25  ;;  %v1783_v0 = vsel %vm1687_vm7, %v5406_v17, %v1751_v8  ;;  %4178 = vpow2.f32 %v1429_v18  ;;  %3913 = vmatmul.mubr.msk.f32.gmra.mxu1 %vm1096_vm0, %v5314_v12  ;;  %v6416_v25 = vld [vmem:[#allocation13_spill] sm:$0xff] }
 0x28e   :  { %v5508_v11 = vadd.f32 %v1231_v60, %v5240_v57  ;;  %v4169_v37 = vpop.eup %4168  ;;  %v1444_v34 = vadd.f32 2.0, %v4167_v42  ;;  %v5515_v39 = vpop.f32.mrf.mxu1  ;;  %3915 = vmatprep.mubr.msk.f32.mxu1 %vm1096_vm0, %v5324_v50  ;;  %v6419_v8 = vld [vmem:[#allocation29_spill] sm:$0xff] }
 0x28f   :  { %1799 = vxpose.xlu0.b32.cont [3/8] (short) %v1771_v33, 128  ;;  %v1631_v63 = vsub.f32 2.0, %v1599_v58  ;;  %v1755_v52 = vmul.f32 %v1723_v31, %v1659_v21  ;;  %v1448_v14 = vadd.f32 2.0, %v4169_v37 }
 0x290   :  { %v1376_v19 = vmin.f32 %v5508_v11, 20.0  ;;  %v5523_v17 = vmul.f32 %v4167_v42, %v1444_v34  ;;  %v5528_v7 = vpop.f32.mrf.mxu1  ;;  %vm1696_vm2 = vcmp.gt.f32.partialorder %v5508_v11, 20.0 }
 0x291   :  { %v1663_v6 = vmul.f32 %v4165_v2, %v1631_v63  ;;  %v1787_v3 = vsel %vm1691_vm8, %v5416_v61, %v1755_v52  ;;  %v5532_v44 = vmul.f32 %v4169_v37, %v1448_v14  ;;  %3916 = vmatmul.mubr.msk.f32.gmra.mxu1 %vm1096_vm0, %v5334_v51  ;;  %v6420_v63 = vld [vmem:[#allocation30_spill] sm:$0xff]  ;;  %v6421_v52 = vld [vmem:[#allocation27_spill] sm:$0xff] }
 0x292   :  { %v1437_v13 = vmul.f32 1.442695, %v1376_v19  ;;  %v1508_v29 = vadd.f32 2.0, %v5523_v17  ;;  %v1306_v46 = vpop.f32.mrf.mxu1  ;;  %3918 = vmatprep.mubr.msk.f32.mxu1 %vm1096_vm0, %v5343_v9 }
 0x293   :  { %1800 = vxpose.xlu0.b32.cont [4/8] (short) %v1775_v4, 128  ;;  %v1759_v33 = vmul.f32 %v1727_v23, %v1663_v6  ;;  %v1512_v5 = vadd.f32 2.0, %v5532_v44  ;;  %v5580_v6 = vadd.f32 %v5515_v39, %v6421_v52 }
 0x294   :  { %4180 = vpow2.f32 %v1437_v13 }
 0x295   :  { %v4171_v1 = vpop.eup %4170  ;;  %v1791_v2 = vsel %vm1695_vm9, %v5420_v26, %v1759_v33  ;;  %4182 = vrcp.f32 %v1508_v29  ;;  %v5546_v26 = vpop.f32.mrf.mxu1  ;;  %3919 = vmatmul.mubr.msk.f32.gmra.mxu1 %vm1096_vm0, %v5349_v53  ;;  %v1349_v33 = vmin.f32 %v5580_v6, 20.0  ;;  %vm1669_vm3 = vcmp.gt.f32.partialorder %v5580_v6, 20.0 }
 0x296   :  { %v1452_v43 = vadd.f32 2.0, %v4171_v1  ;;  %4184 = vrcp.f32 %v1512_v5  ;;  %3921 = vmatprep.mubr.msk.f32.mxu1 %vm1096_vm0, %v6416_v25 }
 0x297   :  { %1801 = vxpose.xlu0.b32.cont [5/8] (short) %v1779_v27, 128  ;;  %v4173_v61 = vpop.eup %4172  ;;  %v1312_v49 = vpop.f32.mrf.mxu1 }
 0x298   :  { %v5541_v10 = vmul.f32 %v4171_v1, %v1452_v43  ;;  %v1456_v32 = vadd.f32 2.0, %v4173_v61  ;;  %v4175_v30 = vpop.eup %4174 }
 0x299   :  { %v4177_v50 = vpop.eup %4176  ;;  %v1460_v36 = vadd.f32 2.0, %v4175_v30  ;;  %3922 = vmatmul.mubr.msk.f32.gmra.mxu1 %vm1096_vm0, %v6417_v59  ;;  %v5562_v22 = vpop.f32.mrf.mxu1 }
 0x29a   :  { %v1516_v12 = vadd.f32 2.0, %v5541_v10  ;;  %v5551_v4 = vmul.f32 %v4173_v61, %v1456_v32  ;;  %v1464_v51 = vadd.f32 2.0, %v4177_v50  ;;  %v4179_v9 = vpop.eup %4178  ;;  %3924 = vmatprep.mubr.msk.f32.mxu1 %vm1096_vm0, %v6418_v41 }
 0x29b   :  { %1802 = vxpose.xlu0.b32.cont [6/8] (short) %v1783_v0, 128  ;;  %v5558_v40 = vmul.f32 %v4175_v30, %v1460_v36  ;;  %v1468_v42 = vadd.f32 2.0, %v4179_v9  ;;  %v1318_v21 = vpop.f32.mrf.mxu1 }
 0x29c   :  { %4186 = vrcp.f32 %v1516_v12  ;;  %v1520_v58 = vadd.f32 2.0, %v5551_v4  ;;  %v5566_v53 = vmul.f32 %v4177_v50, %v1464_v51  ;;  %v6423_v50 = vld [vmem:[#allocation28_spill] sm:$0xff] }
 0x29d   :  { %v1524_v60 = vadd.f32 2.0, %v5558_v40  ;;  %3925 = vmatmul.mubr.msk.f32.gmra.mxu1 %vm1096_vm0, %v6419_v8  ;;  %v5574_v31 = vmul.f32 %v4179_v9, %v1468_v42  ;;  %v5576_v0 = vpop.f32.mrf.mxu1  ;;  %v1700_v36 = vmul.f32 %v5523_v17, %v6423_v50  ;;  %v5604_v17 = vadd.f32 %v1318_v21, %v5206_v24 }
 0x29e   :  { %4188 = vrcp.f32 %v1520_v58  ;;  %3927 = vmatprep.mubr.msk.f32.mxu1 %vm1096_vm0, %v6420_v63  ;;  %v1528_v35 = vadd.f32 2.0, %v5566_v53  ;;  %vm1668_vm10 = vcmp.gt.f32.partialorder %v6423_v50, 20.0 }
 0x29f   :  { %1803 = vxpose.xlu0.b32.cont [7/8] (short) %v1787_v3, 128  ;;  %4190 = vrcp.f32 %v1524_v60  ;;  %v1532_v19 = vadd.f32 2.0, %v5574_v31  ;;  %v1324_v3 = vpop.f32.mrf.mxu1  ;;  %v1361_v21 = vmin.f32 %v5604_v17, 20.0  ;;  %vm1681_vm6 = vcmp.gt.f32.partialorder %v5604_v17, 20.0 }
 0x2a0   :  { %4192 = vrcp.f32 %v1528_v35 }
 0x2a1   :  { %v4181_v45 = vpop.eup %4180  ;;  %4194 = vrcp.f32 %v1532_v19  ;;  %v5592_v30 = vpop.f32.mrf.mxu1 }
 0x2a2   :  { %v4183_v27 = vpop.eup %4182  ;;  %v1472_v37 = vadd.f32 2.0, %v4181_v45 }
 0x2a3   :  { %1804 = vxpose.xlu0.b32.end [8/8] (short) %v1791_v2, 128  ;;  %v1572_v28 = vmul.f32 %v4183_v27, %v1508_v29  ;;  %v4185_v34 = vpop.eup %4184  ;;  %v6422_v2 = vld [vmem:[#allocation16_spill] sm:$0xff]  ;;  %v1330_v42 = vpop.f32.mrf.mxu1 }
 0x2a4   :  { %v5583_v1 = vmul.f32 %v4181_v45, %v1472_v37  ;;  %v1576_v18 = vmul.f32 %v4185_v34, %v1512_v5  ;;  %v5590_v32 = vadd.f32 %v1306_v46, %v6422_v2  ;;  %v1383_v5 = vmul.f32 1.442695, %v1349_v33 }
 0x2a5   :  { %v1604_v14 = vsub.f32 2.0, %v1572_v28  ;;  %v5599_v45 = vadd.f32 %v1312_v49, %v5380_v62  ;;  %v1704_v46 = vmul.f32 %v5532_v44, %v5446_v55  ;;  %v1708_v44 = vmul.f32 %v5541_v10, %v5454_v38 }
 0x2a6   :  { %v5587_v13 = vadd.f32 2.0, %v5583_v1  ;;  %v1608_v61 = vsub.f32 2.0, %v1576_v18  ;;  %v1353_v41 = vmin.f32 %v5590_v32, 20.0  ;;  %v1712_v10 = vmul.f32 %v5551_v4, %v5464_v48 }
 0x2a7   :  { %v1636_v29 = vmul.f32 %v4183_v27, %v1604_v14  ;;  %v1357_v49 = vmin.f32 %v5599_v45, 20.0  ;;  %v5611_v14 = vpop.f32.mrf.mxu1  ;;  %v1716_v4 = vmul.f32 %v5558_v40, %v5473_v16  ;;  %vm1673_vm4 = vcmp.gt.f32.partialorder %v5590_v32, 20.0 }
 0x2a8   :  { %4196 = vrcp.f32 %v5587_v13  ;;  %v1640_v51 = vmul.f32 %v4185_v34, %v1608_v61  ;;  %v1391_v34 = vmul.f32 1.442695, %v1353_v41  ;;  %v5626_v41 = vadd.f32 %v1330_v42, %v5222_v15 }
 0x2a9   :  { %v4187_v23 = vpop.eup %4186  ;;  %4198 = vpow2.f32 %v1383_v5  ;;  %v1399_v61 = vmul.f32 1.442695, %v1357_v49  ;;  %v1407_v5 = vmul.f32 1.442695, %v1361_v21  ;;  %vm1677_vm5 = vcmp.gt.f32.partialorder %v5599_v45, 20.0 }
 0x2aa   :  { %v1580_v43 = vmul.f32 %v4187_v23, %v1516_v12  ;;  %v1732_v12 = vmul.f32 %v1700_v36, %v1636_v29  ;;  %v1736_v63 = vmul.f32 %v1704_v46, %v1640_v51  ;;  %4200 = vpow2.f32 %v1391_v34  ;;  %v1336_v36 = vpop.f32.mrf.mxu1 }
 0x2ab   :  { %v4189_v39 = vpop.eup %4188  ;;  %4202 = vpow2.f32 %v1399_v61  ;;  %v1720_v34 = vmul.f32 %v5566_v53, %v5481_v56  ;;  %vm1689_vm8 = vcmp.gt.f32.partialorder %v5626_v41, 20.0 }
 0x2ac   :  { %v1612_v25 = vsub.f32 2.0, %v1580_v43  ;;  %v1584_v9 = vmul.f32 %v4189_v39, %v1520_v58  ;;  %v4191_v59 = vpop.eup %4190  ;;  %v1764_v58 = vsel %vm1668_vm10, %v6423_v50, %v1732_v12  ;;  %v1768_v18 = vsel %vm1672_vm11, %v5446_v55, %v1736_v63  ;;  %v5630_v46 = vpop.f32.mrf.mxu1 }
 0x2ad   :  { %v4193_v8 = vpop.eup %4192  ;;  %v1588_v28 = vmul.f32 %v4191_v59, %v1524_v60  ;;  %v5617_v50 = vadd.f32 %v1324_v3, %v5393_v54  ;;  %4204 = vpow2.f32 %v1407_v5 }
 0x2ae   :  { %v1644_v27 = vmul.f32 %v4187_v23, %v1612_v25  ;;  %v1616_v37 = vsub.f32 2.0, %v1584_v9  ;;  %v1592_v23 = vmul.f32 %v4193_v8, %v1528_v35  ;;  %v4195_v60 = vpop.eup %4194  ;;  %v2536_v25 = vpop.trf.xlu1 }
 0x2af   :  { %v1620_v29 = vsub.f32 2.0, %v1588_v28  ;;  %v1596_v51 = vmul.f32 %v4195_v60, %v1532_v19  ;;  %3928 = vmatmul.mubr.msk.f32.gmra.mxu1 %vm1096_vm0, %v2536_v25  ;;  %v1365_v3 = vmin.f32 %v5617_v50, 20.0  ;;  %v1369_v28 = vmin.f32 %v5626_v41, 20.0  ;;  %v1342_v49 = vpop.f32.mrf.mxu1 }
 0x2b0   :  { %v1740_v33 = vmul.f32 %v1708_v44, %v1644_v27  ;;  %v1648_v43 = vmul.f32 %v4189_v39, %v1616_v37  ;;  %v1624_v35 = vsub.f32 2.0, %v1592_v23  ;;  %vm1685_vm7 = vcmp.gt.f32.partialorder %v5617_v50, 20.0 }
 0x2b1   :  { %v1652_v12 = vmul.f32 %v4191_v59, %v1620_v29  ;;  %v1628_v42 = vsub.f32 2.0, %v1596_v51  ;;  %v1415_v40 = vmul.f32 1.442695, %v1365_v3  ;;  %v1724_v29 = vmul.f32 %v5574_v31, %v5497_v20 }
 0x2b2   :  { %v1772_v55 = vsel %vm1676_vm12, %v5454_v38, %v1740_v33  ;;  %v1744_v39 = vmul.f32 %v1712_v10, %v1648_v43  ;;  %v5633_v38 = vadd.f32 %v1336_v36, %v5411_v47  ;;  %v1656_v19 = vmul.f32 %v4193_v8, %v1624_v35  ;;  %v2553_v59 = vpop.trf.xlu1 }
 0x2b3   :  { %v1748_v63 = vmul.f32 %v1716_v4, %v1652_v12  ;;  %3930 = vmatprep.mubr.msk.f32.mxu1 %vm1096_vm0, %v2553_v59  ;;  %4206 = vpow2.f32 %v1415_v40  ;;  %v1423_v33 = vmul.f32 1.442695, %v1369_v28  ;;  %v5647_v43 = vadd.f32 %v1342_v49, %v5240_v57 }
 0x2b4   :  { %v1373_v8 = vmin.f32 %v5633_v38, 20.0  ;;  %v1752_v23 = vmul.f32 %v1720_v34, %v1656_v19  ;;  %v1728_v31 = vmul.f32 %v5583_v1, %v5508_v11  ;;  %vm1693_vm9 = vcmp.gt.f32.partialorder %v5633_v38, 20.0 }
 0x2b5   :  { %v4197_v9 = vpop.eup %4196  ;;  %v1780_v21 = vsel %vm1684_vm14, %v5473_v16, %v1748_v63  ;;  %4208 = vpow2.f32 %v1423_v33  ;;  %v1377_v25 = vmin.f32 %v5647_v43, 20.0  ;;  %vm1697_vm10 = vcmp.gt.f32.partialorder %v5647_v43, 20.0 }
 0x2b6   :  { %v4199_v27 = vpop.eup %4198  ;;  %v1600_v37 = vmul.f32 %v4197_v9, %v5587_v13  ;;  %v1660_v13 = vmul.f32 %v4195_v60, %v1628_v42  ;;  %v1431_v10 = vmul.f32 1.442695, %v1373_v8  ;;  %v1784_v60 = vsel %vm1688_vm15, %v5481_v56, %v1752_v23 }
 0x2b7   :  { %v1445_v44 = vadd.f32 2.0, %v4199_v27  ;;  %v4201_v53 = vpop.eup %4200  ;;  %v1439_v19 = vmul.f32 1.442695, %v1377_v25 }
 0x2b8   :  { %v1756_v36 = vmul.f32 %v1724_v29, %v1660_v13  ;;  %v1449_v35 = vadd.f32 2.0, %v4201_v53  ;;  %4210 = vpow2.f32 %v1431_v10 }
 0x2b9   :  { %v5651_v61 = vmul.f32 %v4199_v27, %v1445_v44 }
 0x2ba   :  { %v1788_v56 = vsel %vm1692_vm1, %v5497_v20, %v1756_v36  ;;  %v5663_v3 = vmul.f32 %v4201_v53, %v1449_v35 }
 0x2bb   :  { %v1509_v51 = vadd.f32 2.0, %v5651_v61 }
 0x2bd   :  { %4212 = vrcp.f32 %v1509_v51 }
 0x2be   :  { %4214 = vpow2.f32 %v1439_v19 }
 0x2c4   :  { %1829 = vxpose.xlu0.b32.start [1/8] (short) %v1764_v58, 128  ;;  %v1776_v58 = vsel %vm1680_vm13, %v5464_v48, %v1744_v39  ;;  %v2554_v48 = vpop.trf.xlu1 }
 0x2c5   :  { %3931 = vmatmul.mubr.msk.f32.gmra.mxu1 %vm1096_vm0, %v2554_v48 }
 0x2c8   :  { %1830 = vxpose.xlu0.b32.cont [2/8] (short) %v1768_v18, 128  ;;  %v1632_v18 = vsub.f32 2.0, %v1600_v37  ;;  %v2555_v16 = vpop.trf.xlu1 }
 0x2c9   :  { %3933 = vmatprep.mubr.msk.f32.mxu1 %vm1096_vm0, %v2555_v16 }
 0x2ca   :  { %v1664_v5 = vmul.f32 %v4197_v9, %v1632_v18 }
 0x2cc   :  { %1831 = vxpose.xlu0.b32.cont [3/8] (short) %v1772_v55, 128  ;;  %v4203_v55 = vpop.eup %4202  ;;  %v2556_v39 = vpop.trf.xlu1  ;;  %v1760_v9 = vmul.f32 %v1728_v31, %v1664_v5 }
 0x2cd   :  { %v4205_v12 = vpop.eup %4204  ;;  %3934 = vmatmul.mubr.msk.f32.gmra.mxu1 %vm1096_vm0, %v2556_v39  ;;  %v1453_v4 = vadd.f32 2.0, %v4203_v55 }
 0x2ce   :  { %v1457_v59 = vadd.f32 2.0, %v4205_v12  ;;  %v1792_v27 = vsel %vm1696_vm2, %v5508_v11, %v1760_v9  ;;  %v4207_v63 = vpop.eup %4206 }
 0x2cf   :  { %v5669_v20 = vmul.f32 %v4203_v55, %v1453_v4  ;;  %v1461_v28 = vadd.f32 2.0, %v4207_v63  ;;  %v4209_v34 = vpop.eup %4208 }
 0x2d0   :  { %1832 = vxpose.xlu0.b32.cont [4/8] (short) %v1776_v58, 128  ;;  %v2557_v1 = vpop.trf.xlu1  ;;  %v1513_v58 = vadd.f32 2.0, %v5663_v3  ;;  %v5671_v37 = vmul.f32 %v4205_v12, %v1457_v59  ;;  %v4211_v44 = vpop.eup %4210  ;;  %v1465_v48 = vadd.f32 2.0, %v4209_v34 }
 0x2d1   :  { %3936 = vmatprep.mubr.msk.f32.mxu1 %vm1096_vm0, %v2557_v1  ;;  %v1517_v40 = vadd.f32 2.0, %v5669_v20  ;;  %v5677_v8 = vmul.f32 %v4207_v63, %v1461_v28  ;;  %v1469_v23 = vadd.f32 2.0, %v4211_v44  ;;  %v4213_v13 = vpop.eup %4212 }
 0x2d2   :  { %4216 = vrcp.f32 %v1513_v58  ;;  %v1521_v49 = vadd.f32 2.0, %v5671_v37  ;;  %v5681_v33 = vmul.f32 %v4209_v34, %v1465_v48  ;;  %v4215_v53 = vpop.eup %4214  ;;  %v1573_v36 = vmul.f32 %v4213_v13, %v1509_v51 }
 0x2d3   :  { %4218 = vrcp.f32 %v1517_v40  ;;  %v1525_v18 = vadd.f32 2.0, %v5677_v8  ;;  %v5683_v16 = vmul.f32 %v4211_v44, %v1469_v23  ;;  %v5699_v51 = vadd.f32 %v5546_v26, %v6422_v2 }
 0x2d4   :  { %1833 = vxpose.xlu0.b32.cont [5/8] (short) %v1780_v21, 128  ;;  %v2558_v42 = vpop.trf.xlu1  ;;  %4220 = vrcp.f32 %v1521_v49  ;;  %v1529_v10 = vadd.f32 2.0, %v5681_v33  ;;  %v1605_v31 = vsub.f32 2.0, %v1573_v36 }
 0x2d5   :  { %3937 = vmatmul.mubr.msk.f32.gmra.mxu1 %vm1096_vm0, %v2558_v42  ;;  %4222 = vrcp.f32 %v1525_v18  ;;  %v5688_v25 = vadd.f32 2.0, %v5683_v16  ;;  %v1354_v26 = vmin.f32 %v5699_v51, 20.0  ;;  %vm1674_vm12 = vcmp.gt.f32.partialorder %v5699_v51, 20.0 }
 0x2d6   :  { %4224 = vrcp.f32 %v1529_v10  ;;  %v1637_v1 = vmul.f32 %v4213_v13, %v1605_v31 }
 0x2d7   :  { %4226 = vrcp.f32 %v5688_v25  ;;  %v1393_v48 = vmul.f32 1.442695, %v1354_v26 }
 0x2d8   :  { %1834 = vxpose.xlu0.b32.cont [6/8] (short) %v1784_v60, 128  ;;  %v2559_v11 = vpop.trf.xlu1  ;;  %v1473_v60 = vadd.f32 2.0, %v4215_v53 }
 0x2d9   :  { %3939 = vmatprep.mubr.msk.f32.mxu1 %vm1096_vm0, %v2559_v11 }
 0x2da   :  { %v5691_v55 = vmul.f32 %v4215_v53, %v1473_v60 }
 0x2dc   :  { %1835 = vxpose.xlu0.b32.cont [7/8] (short) %v1788_v56, 128  ;;  %v2560_v21 = vpop.trf.xlu1  ;;  %v5695_v56 = vadd.f32 %v5528_v7, %v6421_v52  ;;  %v5704_v19 = vadd.f32 2.0, %v5691_v55  ;;  %v1701_v7 = vmul.f32 %v5651_v61, %v5580_v6  ;;  %v1705_v61 = vmul.f32 %v5663_v3, %v5590_v32 }
 0x2dd   :  { %3940 = vmatmul.mubr.msk.f32.gmra.mxu1 %vm1096_vm0, %v2560_v21  ;;  %v1709_v3 = vmul.f32 %v5669_v20, %v5599_v45 }
 0x2de   :  { %4228 = vrcp.f32 %v5704_v19  ;;  %v1733_v63 = vmul.f32 %v1701_v7, %v1637_v1  ;;  %vm1670_vm11 = vcmp.gt.f32.partialorder %v5695_v56, 20.0 }
 0x2df   :  { %v4217_v5 = vpop.eup %4216 }
 0x2e0   :  { %1836 = vxpose.xlu0.b32.end [8/8] (short) %v1792_v27, 128  ;;  %v2561_v29 = vpop.trf.xlu1  ;;  %v1577_v39 = vmul.f32 %v4217_v5, %v1513_v58  ;;  %v4219_v12 = vpop.eup %4218  ;;  %v1350_v58 = vmin.f32 %v5695_v56, 20.0  ;;  %v1765_v21 = vsel %vm1669_vm3, %v5580_v6, %v1733_v63 }
 0x2e1   :  { %3942 = vmatprep.mubr.msk.f32.mxu1 %vm1096_vm0, %v2561_v29  ;;  %v4221_v4 = vpop.eup %4220  ;;  %v1581_v27 = vmul.f32 %v4219_v12, %v1517_v40  ;;  %v5714_v40 = vadd.f32 %v5562_v22, %v5380_v62  ;;  %v5724_v22 = vadd.f32 %v5576_v0, %v5206_v24  ;;  %v1713_v0 = vmul.f32 %v5671_v37, %v5604_v17 }
 0x2e2   :  { %v1609_v59 = vsub.f32 2.0, %v1577_v39  ;;  %v1585_v2 = vmul.f32 %v4221_v4, %v1521_v49  ;;  %v4223_v34 = vpop.eup %4222  ;;  %v1385_v11 = vmul.f32 1.442695, %v1350_v58 }
 0x2e3   :  { %v1613_v28 = vsub.f32 2.0, %v1581_v27  ;;  %v1589_v53 = vmul.f32 %v4223_v34, %v1525_v18  ;;  %v4225_v29 = vpop.eup %4224  ;;  %v1358_v62 = vmin.f32 %v5714_v40, 20.0  ;;  %v1362_v20 = vmin.f32 %v5724_v22, 20.0 }
 0x2e4   :  { %v2562_v35 = vpop.trf.xlu1  ;;  %v1641_v42 = vmul.f32 %v4217_v5, %v1609_v59  ;;  %v1617_v49 = vsub.f32 2.0, %v1585_v2  ;;  %4230 = vpow2.f32 %v1385_v11  ;;  %v4227_v18 = vpop.eup %4226  ;;  %v1593_v39 = vmul.f32 %v4225_v29, %v1529_v10 }
 0x2e5   :  { %3943 = vmatmul.mubr.msk.f32.gmra.mxu1 %vm1096_vm0, %v2562_v35  ;;  %v1645_v13 = vmul.f32 %v4219_v12, %v1613_v28  ;;  %4232 = vpow2.f32 %v1393_v48  ;;  %v1621_v31 = vsub.f32 2.0, %v1589_v53  ;;  %v1401_v24 = vmul.f32 1.442695, %v1358_v62 }
 0x2e6   :  { %v1737_v23 = vmul.f32 %v1705_v61, %v1641_v42  ;;  %v1649_v36 = vmul.f32 %v4221_v4, %v1617_v49  ;;  %v5737_v12 = vadd.f32 %v5592_v30, %v5393_v54  ;;  %v1625_v59 = vsub.f32 2.0, %v1593_v39 }
 0x2e7   :  { %v1741_v35 = vmul.f32 %v1709_v3, %v1645_v13  ;;  %v1653_v1 = vmul.f32 %v4223_v34, %v1621_v31  ;;  %v1597_v54 = vmul.f32 %v4227_v18, %v5688_v25  ;;  %4234 = vpow2.f32 %v1401_v24  ;;  %v1344_v25 = vpop.f32.mrf.mxu1 }
 0x2e8   :  { %v2563_v9 = vpop.trf.xlu1  ;;  %v1769_v5 = vsel %vm1673_vm4, %v5590_v32, %v1737_v23  ;;  %v5741_v32 = vadd.f32 %v5611_v14, %v5222_v15  ;;  %v1745_v4 = vmul.f32 %v1713_v0, %v1649_v36  ;;  %v1409_v27 = vmul.f32 1.442695, %v1362_v20 }
 0x2e9   :  { %3945 = vmatprep.mubr.msk.f32.mxu1 %vm1096_vm0, %v2563_v9  ;;  %v1773_v37 = vsel %vm1677_vm5, %v5599_v45, %v1741_v35  ;;  %v1366_v15 = vmin.f32 %v5737_v12, 20.0  ;;  %v1717_v14 = vmul.f32 %v5677_v8, %v5617_v50  ;;  %v1657_v2 = vmul.f32 %v4225_v29, %v1625_v59 }
 0x2ea   :  { %v1370_v45 = vmin.f32 %v5741_v32, 20.0  ;;  %v1777_v7 = vsel %vm1681_vm6, %v5604_v17, %v1745_v4  ;;  %v1629_v63 = vsub.f32 2.0, %v1597_v54  ;;  %4236 = vpow2.f32 %v1409_v27 }
 0x2eb   :  { %v4229_v30 = vpop.eup %4228  ;;  %v1749_v26 = vmul.f32 %v1717_v14, %v1653_v1  ;;  %v1417_v8 = vmul.f32 1.442695, %v1366_v15  ;;  %v5759_v28 = vadd.f32 %v5630_v46, %v5411_v47  ;;  %v1721_v17 = vmul.f32 %v5681_v33, %v5626_v41 }
 0x2ec   :  { %v2564_v52 = vpop.trf.xlu1  ;;  %v1601_v42 = vmul.f32 %v4229_v30, %v5704_v19  ;;  %v1425_v61 = vmul.f32 1.442695, %v1370_v45  ;;  %v1661_v46 = vmul.f32 %v4227_v18, %v1629_v63  ;;  %v1729_v18 = vmul.f32 %v5691_v55, %v5647_v43 }
 0x2ed   :  { %3946 = vmatmul.mubr.msk.f32.gmra.mxu1 %vm1096_vm0, %v2564_v52  ;;  %v1781_v49 = vsel %vm1685_vm7, %v5617_v50, %v1749_v26  ;;  %v1753_v47 = vmul.f32 %v1721_v17, %v1657_v2  ;;  %4238 = vpow2.f32 %v1417_v8  ;;  %v1374_v33 = vmin.f32 %v5759_v28, 20.0 }
 0x2ee   :  { %4240 = vpow2.f32 %v1425_v61  ;;  %vm1678_vm13 = vcmp.gt.f32.partialorder %v5714_v40, 20.0  ;;  %vm1682_vm14 = vcmp.gt.f32.partialorder %v5724_v22, 20.0  ;;  %vm1686_vm15 = vcmp.gt.f32.partialorder %v5737_v12, 20.0 }
 0x2ef   :  { %v1785_v62 = vsel %vm1689_vm8, %v5626_v41, %v1753_v47  ;;  %v1433_v36 = vmul.f32 1.442695, %v1374_v33  ;;  %vm1690_vm1 = vcmp.gt.f32.partialorder %v5741_v32, 20.0  ;;  %vm1694_vm2 = vcmp.gt.f32.partialorder %v5759_v28, 20.0 }
 0x2f0   :  { %v2565_v44 = vpop.trf.xlu1  ;;  %vm3284_vm4 = vcmask 31744  }
 0x2f1   :  { %3948 = vmatprep.mubr.msk.f32.mxu1 %vm1096_vm0, %v2565_v44  ;;  %v4231_v34 = vpop.eup %4230  ;;  %v5764_v44 = vadd.f32 %v1344_v25, %v5240_v57  ;;  %v1725_v57 = vmul.f32 %v5683_v16, %v5633_v38  ;;  %4242 = vpow2.f32 %v1433_v36 }
 0x2f2   :  { %v4233_v48 = vpop.eup %4232  ;;  %v1446_v23 = vadd.f32 2.0, %v4231_v34 }
 0x2f3   :  { %v1450_v53 = vadd.f32 2.0, %v4233_v48  ;;  %v1378_v50 = vmin.f32 %v5764_v44, 20.0  ;;  %v1757_v3 = vmul.f32 %v1725_v57, %v1661_v46  ;;  %vm1698_vm3 = vcmp.gt.f32.partialorder %v5764_v44, 20.0 }
 0x2f4   :  { %v2566_v60 = vpop.trf.xlu1  ;;  %v4235_v16 = vpop.eup %4234 }
 0x2f5   :  { %3949 = vmatmul.mubr.msk.f32.gmra.mxu1 %vm1096_vm0, %v2566_v60  ;;  %v5784_v31 = vmul.f32 %v4233_v48, %v1450_v53  ;;  %v1441_v41 = vmul.f32 1.442695, %v1378_v50  ;;  %v1789_v39 = vsel %vm1693_vm9, %v5633_v38, %v1757_v3  ;;  %v1454_v20 = vadd.f32 2.0, %v4235_v16 }
 0x2f7   :  { %v4237_v55 = vpop.eup %4236  ;;  %v1514_v4 = vadd.f32 2.0, %v5784_v31  ;;  %4244 = vpow2.f32 %v1441_v41 }
 0x2f8   :  { %v2567_v9 = vpop.trf.xlu1  ;;  %v1458_v1 = vadd.f32 2.0, %v4237_v55 }
 0x2f9   :  { %3951 = vmatprep.mubr.msk.f32.mxu1 %vm1096_vm0, %v2567_v9 }
 0x2fa   :  { %v4239_v59 = vpop.eup %4238  ;;  %v5799_v14 = vmul.f32 %v4237_v55, %v1458_v1 }
 0x2fb   :  { %v4241_v27 = vpop.eup %4240 }
 0x2fc   :  { %v2568_v58 = vpop.trf.xlu1 }
 0x2fd   :  { %3952 = vmatmul.mubr.msk.f32.gmra.mxu1 %vm1096_vm0, %v2568_v58 }
 0x2fe   :  { %v4243_v26 = vpop.eup %4242 }
 0x2ff   :  { %v1470_v17 = vadd.f32 2.0, %v4243_v26 }
 0x300   :  { %v2585_v11 = vpop.trf.xlu1 }
 0x301   :  { %1861 = vxpose.xlu0.b32.start [1/8] (short) %v1765_v21, 128  ;;  %3954 = vmatprep.mubr.msk.f32.mxu1 %vm1096_vm0, %v2585_v11  ;;  %v1633_v21 = vsub.f32 2.0, %v1601_v42  ;;  %v5814_v46 = vmul.f32 %v4243_v26, %v1470_v17 }
 0x303   :  { %v1813_v6 = vpop.trf.xlu0  ;;  %v1665_v60 = vmul.f32 %v4229_v30, %v1633_v21  ;;  %v1534_v53 = vadd.f32 2.0, %v5814_v46 }
 0x304   :  { %3808 = vmatprep.mubr.msk.f32.mxu0 %vm1096_vm0, %v1813_v6  ;;  %v2586_v13 = vpop.trf.xlu1  ;;  %v5778_v6 = vmul.f32 %v4231_v34, %v1446_v23  ;;  %v4245_v8 = vpop.eup %4244 }
 0x305   :  { %1862 = vxpose.xlu0.b32.cont [2/8] (short) %v1769_v5, 128  ;;  %3955 = vmatmul.mubr.msk.f32.gmra.mxu1 %vm1096_vm0, %v2586_v13  ;;  %v1761_v24 = vmul.f32 %v1729_v18, %v1665_v60 }
 0x306   :  { %v1510_v0 = vadd.f32 2.0, %v5778_v6  ;;  %v1702_v41 = vmul.f32 %v5778_v6, %v5695_v56 }
 0x307   :  { %v1814_v10 = vpop.trf.xlu0  ;;  %v1793_v38 = vsel %vm1697_vm10, %v5647_v43, %v1761_v24  ;;  %v1462_v43 = vadd.f32 2.0, %v4239_v59 }
 0x308   :  { %3809 = vmatmul.mubr.msk.f32.vlgmr.msra.gmra.mxu0 %vm1096_vm0, %v1814_v10  ;;  %v2587_v5 = vpop.trf.xlu1  ;;  %4246 = vrcp.f32 %v1510_v0 }
 0x309   :  { %1863 = vxpose.xlu0.b32.cont [3/8] (short) %v1773_v37, 128  ;;  %3957 = vmatprep.mubr.msk.f32.mxu1 %vm1096_vm0, %v2587_v5  ;;  %v5794_v37 = vmul.f32 %v4235_v16, %v1454_v20  ;;  %4248 = vrcp.f32 %v1514_v4  ;;  %v5804_v25 = vmul.f32 %v4239_v59, %v1462_v43 }
 0x30b   :  { %v1815_v52 = vpop.trf.xlu0  ;;  %v1518_v15 = vadd.f32 2.0, %v5794_v37  ;;  %v1526_v34 = vadd.f32 2.0, %v5804_v25 }
 0x30c   :  { %3811 = vmatprep.mubr.msk.f32.mxu0 %vm1096_vm0, %v1815_v52  ;;  %v2588_v9 = vpop.trf.xlu1  ;;  %v1522_v52 = vadd.f32 2.0, %v5799_v14 }
 0x30d   :  { %1864 = vxpose.xlu0.b32.cont [4/8] (short) %v1777_v7, 128  ;;  %3958 = vmatmul.mubr.msk.f32.gmra.mxu1 %vm1096_vm0, %v2588_v9  ;;  %v1466_v7 = vadd.f32 2.0, %v4241_v27  ;;  %4250 = vrcp.f32 %v1518_v15 }
 0x30e   :  { %4252 = vrcp.f32 %v1522_v52 }
 0x30f   :  { %v1816_v19 = vpop.trf.xlu0  ;;  %v5807_v42 = vmul.f32 %v4241_v27, %v1466_v7  ;;  %4254 = vrcp.f32 %v1526_v34 }
 0x310   :  { %3812 = vmatmul.mubr.msk.f32.gmra.mxu0 %vm1096_vm0, %v1816_v19  ;;  %v2589_v54 = vpop.trf.xlu1 }
 0x311   :  { %1865 = vxpose.xlu0.b32.cont [5/8] (short) %v1781_v49, 128  ;;  %3960 = vmatprep.mubr.msk.f32.mxu1 %vm1096_vm0, %v2589_v54  ;;  %v1530_v48 = vadd.f32 2.0, %v5807_v42  ;;  %v1474_v49 = vadd.f32 2.0, %v4245_v8 }
 0x313   :  { %v1817_v29 = vpop.trf.xlu0  ;;  %4256 = vrcp.f32 %v1530_v48  ;;  %v5817_v57 = vmul.f32 %v4245_v8, %v1474_v49 }
 0x314   :  { %3814 = vmatprep.mubr.msk.f32.mxu0 %vm1096_vm0, %v1817_v29  ;;  %v2590_v58 = vpop.trf.xlu1  ;;  %4258 = vrcp.f32 %v1534_v53 }
 0x315   :  { %1866 = vxpose.xlu0.b32.cont [6/8] (short) %v1785_v62, 128  ;;  %3961 = vmatmul.mubr.msk.f32.gmra.mxu1 %vm1096_vm0, %v2590_v58  ;;  %v4247_v11 = vpop.eup %4246  ;;  %v5823_v60 = vadd.f32 2.0, %v5817_v57 }
 0x316   :  { %v4249_v47 = vpop.eup %4248  ;;  %v1574_v21 = vmul.f32 %v4247_v11, %v1510_v0 }
 0x317   :  { %v1818_v35 = vpop.trf.xlu0  ;;  %v1578_v13 = vmul.f32 %v4249_v47, %v1514_v4  ;;  %4260 = vrcp.f32 %v5823_v60 }
 0x318   :  { %3815 = vmatmul.mubr.msk.f32.gmra.mxu0 %vm1096_vm0, %v1818_v35  ;;  %v2591_v2 = vpop.trf.xlu1  ;;  %v1606_v29 = vsub.f32 2.0, %v1574_v21 }
 0x319   :  { %1867 = vxpose.xlu0.b32.cont [7/8] (short) %v1789_v39, 128  ;;  %3963 = vmatprep.mubr.msk.f32.mxu1 %vm1096_vm0, %v2591_v2  ;;  %v1610_v36 = vsub.f32 2.0, %v1578_v13  ;;  %v1722_v13 = vmul.f32 %v5807_v42, %v5741_v32 }
 0x31a   :  { %v4251_v50 = vpop.eup %4250  ;;  %v1638_v16 = vmul.f32 %v4247_v11, %v1606_v29 }
 0x31b   :  { %v1819_v10 = vpop.trf.xlu0  ;;  %v1582_v18 = vmul.f32 %v4251_v50, %v1518_v15  ;;  %v4253_v5 = vpop.eup %4252  ;;  %v1642_v24 = vmul.f32 %v4249_v47, %v1610_v36 }
 0x31c   :  { %3817 = vmatprep.mubr.msk.f32.mxu0 %vm1096_vm0, %v1819_v10  ;;  %v2592_v61 = vpop.trf.xlu1  ;;  %v1734_v0 = vmul.f32 %v1702_v41, %v1638_v16  ;;  %v1586_v55 = vmul.f32 %v4253_v5, %v1522_v52  ;;  %v4255_v9 = vpop.eup %4254  ;;  %v1706_v10 = vmul.f32 %v5784_v31, %v5699_v51  ;;  %v1710_v31 = vmul.f32 %v5794_v37, %v5714_v40 }
 0x31d   :  { %1868 = vxpose.xlu0.b32.end [8/8] (short) %v1793_v38, 128  ;;  %3964 = vmatmul.mubr.msk.f32.gmra.mxu1 %vm1096_vm0, %v2592_v61  ;;  %v1614_v20 = vsub.f32 2.0, %v1582_v18  ;;  %v1590_v27 = vmul.f32 %v4255_v9, %v1526_v34  ;;  %v1730_v18 = vmul.f32 %v5817_v57, %v5764_v44 }
 0x31e   :  { %v1738_v6 = vmul.f32 %v1706_v10, %v1642_v24  ;;  %v1766_v59 = vsel %vm1670_vm11, %v5695_v56, %v1734_v0 }
 0x31f   :  { %v1820_v30 = vpop.trf.xlu0  ;;  %v1646_v54 = vmul.f32 %v4251_v50, %v1614_v20  ;;  %v1622_v52 = vsub.f32 2.0, %v1590_v27 }
 0x320   :  { %3818 = vmatmul.mubr.msk.f32.gmra.mxu0 %vm1096_vm0, %v1820_v30  ;;  %v2593_v23 = vpop.trf.xlu1  ;;  %v4257_v1 = vpop.eup %4256  ;;  %v1618_v30 = vsub.f32 2.0, %v1586_v55 }
 0x321   :  { %3966 = vmatprep.mubr.msk.f32.mxu1 %vm1096_vm0, %v2593_v23  ;;  %v1594_v58 = vmul.f32 %v4257_v1, %v1530_v48  ;;  %v1742_v7 = vmul.f32 %v1710_v31, %v1646_v54  ;;  %v4259_v26 = vpop.eup %4258  ;;  %v1654_v11 = vmul.f32 %v4255_v9, %v1622_v52  ;;  %v1718_v48 = vmul.f32 %v5804_v25, %v5737_v12 }
 0x322   :  { %v1650_v56 = vmul.f32 %v4253_v5, %v1618_v30  ;;  %v1598_v61 = vmul.f32 %v4259_v26, %v1534_v53 }
 0x323   :  { %v1821_v45 = vpop.trf.xlu0  ;;  %v1626_v8 = vsub.f32 2.0, %v1594_v58 }
 0x324   :  { %3820 = vmatprep.mubr.msk.f32.mxu0 %vm1096_vm0, %v1821_v45  ;;  %v2594_v62 = vpop.trf.xlu1  ;;  %v1770_v45 = vsel %vm1674_vm12, %v5699_v51, %v1738_v6  ;;  %v4261_v34 = vpop.eup %4260  ;;  %v1774_v51 = vsel %vm1678_vm13, %v5714_v40, %v1742_v7  ;;  %v1750_v40 = vmul.f32 %v1718_v48, %v1654_v11  ;;  %v1630_v23 = vsub.f32 2.0, %v1598_v61 }
 0x325   :  { %3967 = vmatmul.mubr.msk.f32.gmra.mxu1 %vm1096_vm0, %v2594_v62  ;;  %v1602_v49 = vmul.f32 %v4261_v34, %v5823_v60  ;;  %v1658_v21 = vmul.f32 %v4257_v1, %v1626_v8 }
 0x326   :  { %v1782_v53 = vsel %vm1686_vm15, %v5737_v12, %v1750_v40  ;;  %v1662_v50 = vmul.f32 %v4259_v26, %v1630_v23 }
 0x327   :  { %v1822_v63 = vpop.trf.xlu0  ;;  %v1754_v29 = vmul.f32 %v1722_v13, %v1658_v21 }
 0x328   :  { %3821 = vmatmul.mubr.msk.f32.gmra.mxu0 %vm1096_vm0, %v1822_v63  ;;  %v2595_v35 = vpop.trf.xlu1  ;;  %v1714_v63 = vmul.f32 %v5799_v14, %v5724_v22 }
 0x329   :  { %3969 = vmatprep.mubr.msk.f32.mxu1 %vm1096_vm0, %v2595_v35  ;;  %v1786_v42 = vsel %vm1690_vm1, %v5741_v32, %v1754_v29 }
 0x32a   :  { %v1746_v17 = vmul.f32 %v1714_v63, %v1650_v56 }
 0x32b   :  { %v1823_v19 = vpop.trf.xlu0 }
 0x32c   :  { %3823 = vmatprep.mubr.msk.f32.mxu0 %vm1096_vm0, %v1823_v19  ;;  %v2596_v4 = vpop.trf.xlu1  ;;  %v1778_v47 = vsel %vm1682_vm14, %v5724_v22, %v1746_v17  ;;  %v1634_v22 = vsub.f32 2.0, %v1602_v49 }
 0x32d   :  { %3970 = vmatmul.mubr.msk.f32.gmra.mxu1 %vm1096_vm0, %v2596_v4 }
 0x32e   :  { %v1666_v16 = vmul.f32 %v4261_v34, %v1634_v22 }
 0x32f   :  { %v1824_v33 = vpop.trf.xlu0 }
 0x330   :  { %3824 = vmatmul.mubr.msk.f32.gmra.mxu0 %vm1096_vm0, %v1824_v33  ;;  %v2597_v15 = vpop.trf.xlu1  ;;  %v1762_v35 = vmul.f32 %v1730_v18, %v1666_v16 }
 0x331   :  { %3972 = vmatprep.mubr.msk.f32.mxu1 %vm1096_vm0, %v2597_v15 }
 0x332   :  { %v1794_v57 = vsel %vm1698_vm3, %v5764_v44, %v1762_v35 }
 0x333   :  { %v1825_v3 = vpop.trf.xlu0 }
 0x334   :  { %3826 = vmatprep.mubr.msk.f32.mxu0 %vm1096_vm0, %v1825_v3  ;;  %v2598_v2 = vpop.trf.xlu1  ;;  %v1726_v3 = vmul.f32 %v5814_v46, %v5759_v28 }
 0x335   :  { %3973 = vmatmul.mubr.msk.f32.gmra.mxu1 %vm1096_vm0, %v2598_v2 }
 0x336   :  { %v1758_v36 = vmul.f32 %v1726_v3, %v1662_v50 }
 0x337   :  { %v1826_v39 = vpop.trf.xlu0 }
 0x338   :  { %3827 = vmatmul.mubr.msk.f32.gmra.mxu0 %vm1096_vm0, %v1826_v39  ;;  %v2599_v19 = vpop.trf.xlu1  ;;  %v1790_v46 = vsel %vm1694_vm2, %v5759_v28, %v1758_v36 }
 0x339   :  { %3975 = vmatprep.mubr.msk.f32.mxu1 %vm1096_vm0, %v2599_v19 }
 0x33b   :  { %v1827_v38 = vpop.trf.xlu0 }
 0x33c   :  { %3829 = vmatprep.mubr.msk.f32.mxu0 %vm1096_vm0, %v1827_v38  ;;  %v2600_v33 = vpop.trf.xlu1 }
 0x33d   :  { %3976 = vmatmul.mubr.msk.f32.gmra.mxu1 %vm1096_vm0, %v2600_v33  ;;  %v5922_v33 = vld [vmem:[%s6265_s7] ss:$0 sm:$0xff] }
 0x33e   :  { %1893 = vxpose.xlu0.b32.start [1/8] (short) %v1766_v59, 128 }
 0x33f   :  { %v1828_v43 = vpop.trf.xlu0 }
 0x340   :  { %3830 = vmatmul.mubr.msk.f32.gmra.mxu0 %vm1096_vm0, %v1828_v43  ;;  %v2617_v62 = vpop.trf.xlu1 }
 0x341   :  { %3978 = vmatprep.mubr.msk.f32.mxu1 %vm1096_vm0, %v2617_v62 }
 0x342   :  { %1894 = vxpose.xlu0.b32.cont [2/8] (short) %v1770_v45, 128 }
 0x343   :  { %v1845_v37 = vpop.trf.xlu0 }
 0x344   :  { %3832 = vmatprep.mubr.msk.f32.mxu0 %vm1096_vm0, %v1845_v37  ;;  %v2618_v12 = vpop.trf.xlu1 }
 0x345   :  { %3979 = vmatmul.mubr.msk.f32.gmra.mxu1 %vm1096_vm0, %v2618_v12  ;;  %v3908_v40 = vpop.f32.mrf.mxu1 }
 0x346   :  { %1895 = vxpose.xlu0.b32.cont [3/8] (short) %v1774_v51, 128 }
 0x347   :  { %v1846_v14 = vpop.trf.xlu0 }
 0x348   :  { %3833 = vmatmul.mubr.msk.f32.gmra.mxu0 %vm1096_vm0, %v1846_v14  ;;  %v2619_v41 = vpop.trf.xlu1 }
 0x349   :  { %3981 = vmatprep.mubr.msk.f32.mxu1 %vm1096_vm0, %v2619_v41 }
 0x34a   :  { %1896 = vxpose.xlu0.b32.cont [4/8] (short) %v1778_v47, 128 }
 0x34b   :  { %v1847_v25 = vpop.trf.xlu0 }
 0x34c   :  { %3835 = vmatprep.mubr.msk.f32.mxu0 %vm1096_vm0, %v1847_v25  ;;  %v2620_v39 = vpop.trf.xlu1 }
 0x34d   :  { %3982 = vmatmul.mubr.msk.f32.gmra.mxu1 %vm1096_vm0, %v2620_v39 }
 0x34e   :  { %1897 = vxpose.xlu0.b32.cont [5/8] (short) %v1782_v53, 128  ;;  %v2894_v53 = vpop.f32.mrf.mxu1 }
 0x34f   :  { %v1848_v60 = vpop.trf.xlu0 }
 0x350   :  { %3836 = vmatmul.mubr.msk.f32.gmra.mxu0 %vm1096_vm0, %v1848_v60  ;;  %v2621_v28 = vpop.trf.xlu1  ;;  %v3911_v3 = vpop.f32.mrf.mxu1 }
 0x351   :  { %3984 = vmatprep.mubr.msk.f32.mxu1 %vm1096_vm0, %v2621_v28 }
 0x352   :  { %1898 = vxpose.xlu0.b32.cont [6/8] (short) %v1786_v42, 128  ;;  %v2904_v12 = vpop.f32.mrf.mxu1 }
 0x353   :  { %v1849_v5 = vpop.trf.xlu0 }
 0x354   :  { %3838 = vmatprep.mubr.msk.f32.mxu0 %vm1096_vm0, %v1849_v5  ;;  %v2622_v20 = vpop.trf.xlu1  ;;  %v3914_v41 = vpop.f32.mrf.mxu1 }
 0x355   :  { %3985 = vmatmul.mubr.msk.f32.gmra.mxu1 %vm1096_vm0, %v2622_v20 }
 0x356   :  { %1899 = vxpose.xlu0.b32.cont [7/8] (short) %v1790_v46, 128  ;;  %v2914_v28 = vpop.f32.mrf.mxu1 }
 0x357   :  { %v1850_v32 = vpop.trf.xlu0 }
 0x358   :  { %3839 = vmatmul.mubr.msk.f32.gmra.mxu0 %vm1096_vm0, %v1850_v32  ;;  %v2623_v44 = vpop.trf.xlu1 }
 0x359   :  { %3987 = vmatprep.mubr.msk.f32.mxu1 %vm1096_vm0, %v2623_v44 }
 0x35a   :  { %1900 = vxpose.xlu0.b32.end [8/8] (short) %v1794_v57, 128 }
 0x35b   :  { %v1851_v24 = vpop.trf.xlu0 }
 0x35c   :  { %3841 = vmatprep.mubr.msk.f32.mxu0 %vm1096_vm0, %v1851_v24  ;;  %v2624_v10 = vpop.trf.xlu1 }
 0x35d   :  { %3988 = vmatmul.mubr.msk.f32.gmra.mxu1 %vm1096_vm0, %v2624_v10 }
 0x35f   :  { %v1852_v0 = vpop.trf.xlu0 }
 0x360   :  { %3842 = vmatmul.mubr.msk.f32.gmra.mxu0 %vm1096_vm0, %v1852_v0  ;;  %v2625_v38 = vpop.trf.xlu1 }
 0x361   :  { %3990 = vmatprep.mubr.msk.f32.mxu1 %vm1096_vm0, %v2625_v38 }
 0x363   :  { %v1853_v55 = vpop.trf.xlu0 }
 0x364   :  { %3844 = vmatprep.mubr.msk.f32.mxu0 %vm1096_vm0, %v1853_v55  ;;  %v2626_v1 = vpop.trf.xlu1 }
 0x365   :  { %3991 = vmatmul.mubr.msk.f32.gmra.mxu1 %vm1096_vm0, %v2626_v1 }
 0x367   :  { %v1854_v9 = vpop.trf.xlu0 }
 0x368   :  { %3845 = vmatmul.mubr.msk.f32.gmra.mxu0 %vm1096_vm0, %v1854_v9  ;;  %v2627_v54 = vpop.trf.xlu1  ;;  %v3917_v9 = vpop.f32.mrf.mxu1 }
 0x369   :  { %3993 = vmatprep.mubr.msk.f32.mxu1 %vm1096_vm0, %v2627_v54 }
 0x36a   :  { %v2924_v1 = vpop.f32.mrf.mxu1 }
 0x36b   :  { %v1855_v4 = vpop.trf.xlu0 }
 0x36c   :  { %3847 = vmatprep.mubr.msk.f32.mxu0 %vm1096_vm0, %v1855_v4  ;;  %v2628_v27 = vpop.trf.xlu1 }
 0x36d   :  { %3994 = vmatmul.mubr.msk.f32.gmra.mxu1 %vm1096_vm0, %v2628_v27 }
 0x36f   :  { %v1856_v6 = vpop.trf.xlu0 }
 0x370   :  { %3848 = vmatmul.mubr.msk.f32.gmra.mxu0 %vm1096_vm0, %v1856_v6  ;;  %v2629_v31 = vpop.trf.xlu1 }
 0x371   :  { %3996 = vmatprep.mubr.msk.f32.mxu1 %vm1096_vm0, %v2629_v31 }
 0x373   :  { %v1857_v59 = vpop.trf.xlu0 }
 0x374   :  { %3850 = vmatprep.mubr.msk.f32.mxu0 %vm1096_vm0, %v1857_v59  ;;  %v2630_v58 = vpop.trf.xlu1 }
 0x375   :  { %3997 = vmatmul.mubr.msk.f32.gmra.mxu1 %vm1096_vm0, %v2630_v58 }
 0x377   :  { %v1858_v30 = vpop.trf.xlu0 }
 0x378   :  { %3851 = vmatmul.mubr.msk.f32.gmra.mxu0 %vm1096_vm0, %v1858_v30  ;;  %v2631_v7 = vpop.trf.xlu1 }
 0x379   :  { %3999 = vmatprep.mubr.msk.f32.mxu1 %vm1096_vm0, %v2631_v7 }
 0x37b   :  { %v1859_v15 = vpop.trf.xlu0 }
 0x37c   :  { %3853 = vmatprep.mubr.msk.f32.mxu0 %vm1096_vm0, %v1859_v15  ;;  %v2632_v52 = vpop.trf.xlu1  ;;  %v3920_v15 = vpop.f32.mrf.mxu1 }
 0x37d   :  { %4000 = vmatmul.mubr.msk.f32.gmra.mxu1 %vm1096_vm0, %v2632_v52 }
 0x37e   :  { %v2934_v7 = vpop.f32.mrf.mxu1 }
 0x37f   :  { %v1860_v43 = vpop.trf.xlu0 }
 0x380   :  { %3854 = vmatmul.mubr.msk.f32.gmra.mxu0 %vm1096_vm0, %v1860_v43 }
 0x383   :  { %v1877_v45 = vpop.trf.xlu0 }
 0x384   :  { %3856 = vmatprep.mubr.msk.f32.mxu0 %vm1096_vm0, %v1877_v45 }
 0x387   :  { %v1878_v56 = vpop.trf.xlu0 }
 0x388   :  { %3857 = vmatmul.mubr.msk.f32.gmra.mxu0 %vm1096_vm0, %v1878_v56 }
 0x38b   :  { %v1879_v26 = vpop.trf.xlu0 }
 0x38c   :  { %3859 = vmatprep.mubr.msk.f32.mxu0 %vm1096_vm0, %v1879_v26 }
 0x38f   :  { %v1880_v2 = vpop.trf.xlu0 }
 0x390   :  { %3860 = vmatmul.mubr.msk.f32.gmra.mxu0 %vm1096_vm0, %v1880_v2 }
 0x393   :  { %v1881_v63 = vpop.trf.xlu0 }
 0x394   :  { %3862 = vmatprep.mubr.msk.f32.mxu0 %vm1096_vm0, %v1881_v63  ;;  %v3923_v63 = vpop.f32.mrf.mxu1 }
 0x397   :  { %v1882_v37 = vpop.trf.xlu0 }
 0x398   :  { %3863 = vmatmul.mubr.msk.f32.gmra.mxu0 %vm1096_vm0, %v1882_v37 }
 0x39b   :  { %v1883_v8 = vpop.trf.xlu0 }
 0x39c   :  { %3865 = vmatprep.mubr.msk.f32.mxu0 %vm1096_vm0, %v1883_v8 }
 0x39f   :  { %v1884_v34 = vpop.trf.xlu0 }
 0x3a0   :  { %3866 = vmatmul.mubr.msk.f32.gmra.mxu0 %vm1096_vm0, %v1884_v34 }
 0x3a3   :  { %v1885_v51 = vpop.trf.xlu0 }
 0x3a4   :  { %3868 = vmatprep.mubr.msk.f32.mxu0 %vm1096_vm0, %v1885_v51 }
 0x3a7   :  { %v1886_v17 = vpop.trf.xlu0 }
 0x3a8   :  { %3869 = vmatmul.mubr.msk.f32.gmra.mxu0 %vm1096_vm0, %v1886_v17  ;;  %v2944_v17 = vpop.f32.mrf.mxu1 }
 0x3ab   :  { %v1887_v11 = vpop.trf.xlu0 }
 0x3ac   :  { %3871 = vmatprep.mubr.msk.f32.mxu0 %vm1096_vm0, %v1887_v11 }
 0x3af   :  { %v1888_v61 = vpop.trf.xlu0 }
 0x3b0   :  { %3872 = vmatmul.mubr.msk.f32.gmra.mxu0 %vm1096_vm0, %v1888_v61 }
 0x3b3   :  { %v1889_v19 = vpop.trf.xlu0 }
 0x3b4   :  { %3874 = vmatprep.mubr.msk.f32.mxu0 %vm1096_vm0, %v1889_v19 }
 0x3b7   :  { %v1890_v48 = vpop.trf.xlu0 }
 0x3b8   :  { %3875 = vmatmul.mubr.msk.f32.gmra.mxu0 %vm1096_vm0, %v1890_v48 }
 0x3bb   :  { %v1891_v14 = vpop.trf.xlu0 }
 0x3bc   :  { %3877 = vmatprep.mubr.msk.f32.mxu0 %vm1096_vm0, %v1891_v14  ;;  %v3926_v14 = vpop.f32.mrf.mxu1 }
 0x3bf   :  { %v1892_v49 = vpop.trf.xlu0 }
 0x3c0   :  { %3878 = vmatmul.mubr.msk.f32.gmra.mxu0 %vm1096_vm0, %v1892_v49 }
 0x3c3   :  { %v1909_v47 = vpop.trf.xlu0 }
 0x3c4   :  { %3880 = vmatprep.mubr.msk.f32.mxu0 %vm1096_vm0, %v1909_v47 }
 0x3c7   :  { %v1910_v21 = vpop.trf.xlu0 }
 0x3c8   :  { %v3810_v23 = vpop.f32.mrf.mxu0  ;;  %3881 = vmatmul.mubr.msk.f32.gmra.mxu0 %vm1096_vm0, %v1910_v21 }
 0x3c9   :  { %v2900_v13 = vadd.f32 %v3908_v40, %v3810_v23  ;;  %v2954_v23 = vpop.f32.mrf.mxu1 }
 0x3ca   :  { %v2186_v25 = vpop.f32.mrf.mxu0 }
 0x3cb   :  { %v3221_v29 = vadd.f32 %v5922_v33, %v2900_v13  ;;  %v2895_v50 = vadd.f32 %v2894_v53, %v2186_v25  ;;  %v1911_v22 = vpop.trf.xlu0 }
 0x3cc   :  { %3883 = vmatprep.mubr.msk.f32.mxu0 %vm1096_vm0, %v1911_v22 }
 0x3cd   :  { %3286 = vst.msk [vmem:[%s6266_s8 + $0x8] sm:$0xff] %vm3284_vm4, %v3221_v29  ;;  %v3220_v62 = vadd.f32 %v5922_v33, %v2895_v50  ;;  %v3929_v50 = vpop.f32.mrf.mxu1 }
 0x3cf   :  { %3285 = vst.msk [vmem:[%s6266_s8] sm:$0xff] %vm3284_vm4, %v3220_v62  ;;  %v1912_v60 = vpop.trf.xlu0 }
 0x3d0   :  { %v3813_v42 = vpop.f32.mrf.mxu0  ;;  %3884 = vmatmul.mubr.msk.f32.gmra.mxu0 %vm1096_vm0, %v1912_v60 }
 0x3d1   :  { %v2910_v36 = vadd.f32 %v3911_v3, %v3813_v42  ;;  %v2964_v42 = vpop.f32.mrf.mxu1 }
 0x3d2   :  { %v2196_v16 = vpop.f32.mrf.mxu0 }
 0x3d3   :  { %v3223_v18 = vadd.f32 %v5922_v33, %v2910_v36  ;;  %v2905_v5 = vadd.f32 %v2904_v12, %v2196_v16  ;;  %v1913_v46 = vpop.trf.xlu0 }
 0x3d4   :  { %3886 = vmatprep.mubr.msk.f32.mxu0 %vm1096_vm0, %v1913_v46 }
 0x3d5   :  { %3288 = vst.msk [vmem:[%s6266_s8 + $0x18] sm:$0xff] %vm3284_vm4, %v3223_v18  ;;  %v3222_v35 = vadd.f32 %v5922_v33, %v2905_v5  ;;  %v3932_v18 = vpop.f32.mrf.mxu1 }
 0x3d7   :  { %3287 = vst.msk [vmem:[%s6266_s8 + $0x10] sm:$0xff] %vm3284_vm4, %v3222_v35  ;;  %v1914_v32 = vpop.trf.xlu0 }
 0x3d8   :  { %v3816_v57 = vpop.f32.mrf.mxu0  ;;  %3887 = vmatmul.mubr.msk.f32.gmra.mxu0 %vm1096_vm0, %v1914_v32 }
 0x3d9   :  { %v2920_v39 = vadd.f32 %v3914_v41, %v3816_v57  ;;  %v2974_v41 = vpop.f32.mrf.mxu1 }
 0x3da   :  { %v2206_v24 = vpop.f32.mrf.mxu0 }
 0x3db   :  { %v3225_v0 = vadd.f32 %v5922_v33, %v2920_v39  ;;  %v2915_v20 = vadd.f32 %v2914_v28, %v2206_v24  ;;  %v1915_v55 = vpop.trf.xlu0  ;;  %v3935_v24 = vpop.f32.mrf.mxu1 }
 0x3dc   :  { %3889 = vmatprep.mubr.msk.f32.mxu0 %vm1096_vm0, %v1915_v55 }
 0x3dd   :  { %3290 = vst.msk [vmem:[%s6266_s8 + $0x28] sm:$0xff] %vm3284_vm4, %v3225_v0  ;;  %v3224_v44 = vadd.f32 %v5922_v33, %v2915_v20  ;;  %v2984_v55 = vpop.f32.mrf.mxu1 }
 0x3df   :  { %3289 = vst.msk [vmem:[%s6266_s8 + $0x20] sm:$0xff] %vm3284_vm4, %v3224_v44  ;;  %v1916_v10 = vpop.trf.xlu0 }
 0x3e0   :  { %v3819_v4 = vpop.f32.mrf.mxu0  ;;  %3890 = vmatmul.mubr.msk.f32.gmra.mxu0 %vm1096_vm0, %v1916_v10 }
 0x3e1   :  { %v2930_v38 = vadd.f32 %v3917_v9, %v3819_v4  ;;  %v3938_v4 = vpop.f32.mrf.mxu1 }
 0x3e2   :  { %v2216_v6 = vpop.f32.mrf.mxu0 }
 0x3e3   :  { %v3227_v59 = vadd.f32 %v5922_v33, %v2930_v38  ;;  %v2925_v54 = vadd.f32 %v2924_v1, %v2216_v6  ;;  %v1917_v30 = vpop.trf.xlu0 }
 0x3e4   :  { %3892 = vmatprep.mubr.msk.f32.mxu0 %vm1096_vm0, %v1917_v30 }
 0x3e5   :  { %3292 = vst.msk [vmem:[%s6266_s8 + $0x38] sm:$0xff] %vm3284_vm4, %v3227_v59  ;;  %v3226_v27 = vadd.f32 %v5922_v33, %v2925_v54  ;;  %v2994_v59 = vpop.f32.mrf.mxu1 }
 0x3e7   :  { %3291 = vst.msk [vmem:[%s6266_s8 + $0x30] sm:$0xff] %vm3284_vm4, %v3226_v27  ;;  %v1918_v31 = vpop.trf.xlu0 }
 0x3e8   :  { %v3822_v43 = vpop.f32.mrf.mxu0  ;;  %3893 = vmatmul.mubr.msk.f32.gmra.mxu0 %vm1096_vm0, %v1918_v31 }
 0x3e9   :  { %v2940_v58 = vadd.f32 %v3920_v15, %v3822_v43  ;;  %v3941_v15 = vpop.f32.mrf.mxu1 }
 0x3ea   :  { %v2226_v45 = vpop.f32.mrf.mxu0 }
 0x3eb   :  { %v3229_v56 = vadd.f32 %v5922_v33, %v2940_v58  ;;  %v2935_v52 = vadd.f32 %v2934_v7, %v2226_v45  ;;  %v1919_v26 = vpop.trf.xlu0  ;;  %v3004_v45 = vpop.f32.mrf.mxu1 }
 0x3ec   :  { %3895 = vmatprep.mubr.msk.f32.mxu0 %vm1096_vm0, %v1919_v26 }
 0x3ed   :  { %3294 = vst.msk [vmem:[%s6266_s8 + $0x48] sm:$0xff] %vm3284_vm4, %v3229_v56  ;;  %v3228_v2 = vadd.f32 %v5922_v33, %v2935_v52  ;;  %v3944_v26 = vpop.f32.mrf.mxu1 }
 0x3ef   :  { %3293 = vst.msk [vmem:[%s6266_s8 + $0x40] sm:$0xff] %vm3284_vm4, %v3228_v2  ;;  %v1920_v37 = vpop.trf.xlu0 }
 0x3f0   :  { %v3825_v8 = vpop.f32.mrf.mxu0  ;;  %3896 = vmatmul.mubr.msk.f32.gmra.mxu0 %vm1096_vm0, %v1920_v37 }
 0x3f1   :  { %v2950_v34 = vadd.f32 %v3923_v63, %v3825_v8  ;;  %v3014_v8 = vpop.f32.mrf.mxu1 }
 0x3f2   :  { %v2236_v51 = vpop.f32.mrf.mxu0 }
 0x3f3   :  { %v3231_v11 = vadd.f32 %v5922_v33, %v2950_v34  ;;  %v2945_v61 = vadd.f32 %v2944_v17, %v2236_v51  ;;  %v1921_v19 = vpop.trf.xlu0 }
 0x3f4   :  { %3898 = vmatprep.mubr.msk.f32.mxu0 %vm1096_vm0, %v1921_v19 }
 0x3f5   :  { %3296 = vst.msk [vmem:[%s6266_s8 + $0x58] sm:$0xff] %vm3284_vm4, %v3231_v11  ;;  %v3230_v48 = vadd.f32 %v5922_v33, %v2945_v61  ;;  %v3947_v11 = vpop.f32.mrf.mxu1 }
 0x3f7   :  { %3295 = vst.msk [vmem:[%s6266_s8 + $0x50] sm:$0xff] %vm3284_vm4, %v3230_v48  ;;  %v1922_v49 = vpop.trf.xlu0 }
 0x3f8   :  { %v3828_v47 = vpop.f32.mrf.mxu0  ;;  %3899 = vmatmul.mubr.msk.f32.gmra.mxu0 %vm1096_vm0, %v1922_v49 }
 0x3f9   :  { %v2960_v40 = vadd.f32 %v3926_v14, %v3828_v47  ;;  %v3024_v14 = vpop.f32.mrf.mxu1 }
 0x3fa   :  { %v2246_v21 = vpop.f32.mrf.mxu0 }
 0x3fb   :  { %v3233_v13 = vadd.f32 %v5922_v33, %v2960_v40  ;;  %v2955_v25 = vadd.f32 %v2954_v23, %v2246_v21  ;;  %v1923_v53 = vpop.trf.xlu0  ;;  %v3950_v21 = vpop.f32.mrf.mxu1 }
 0x3fc   :  { %3901 = vmatprep.mubr.msk.f32.mxu0 %vm1096_vm0, %v1923_v53 }
 0x3fd   :  { %3298 = vst.msk [vmem:[%s6266_s8 + $0x68] sm:$0xff] %vm3284_vm4, %v3233_v13  ;;  %v3232_v29 = vadd.f32 %v5922_v33, %v2955_v25  ;;  %v3034_v53 = vpop.f32.mrf.mxu1 }
 0x3ff   :  { %3297 = vst.msk [vmem:[%s6266_s8 + $0x60] sm:$0xff] %vm3284_vm4, %v3232_v29  ;;  %v1924_v22 = vpop.trf.xlu0 }
 0x400   :  { %v3831_v62 = vpop.f32.mrf.mxu0  ;;  %3902 = vmatmul.mubr.msk.f32.gmra.mxu0 %vm1096_vm0, %v1924_v22 }
 0x401   :  { %v2970_v3 = vadd.f32 %v3929_v50, %v3831_v62  ;;  %v3953_v62 = vpop.f32.mrf.mxu1 }
 0x402   :  { %v2256_v60 = vpop.f32.mrf.mxu0 }
 0x403   :  { %v3235_v36 = vadd.f32 %v5922_v33, %v2970_v3  ;;  %v2965_v16 = vadd.f32 %v2964_v42, %v2256_v60 }
 0x405   :  { %3300 = vst.msk [vmem:[%s6266_s8 + $0x78] sm:$0xff] %vm3284_vm4, %v3235_v36  ;;  %v3234_v12 = vadd.f32 %v5922_v33, %v2965_v16  ;;  %v3044_v36 = vpop.f32.mrf.mxu1 }
 0x407   :  { %3299 = vst.msk [vmem:[%s6266_s8 + $0x70] sm:$0xff] %vm3284_vm4, %v3234_v12 }
 0x408   :  { %v3834_v5 = vpop.f32.mrf.mxu0 }
 0x409   :  { %v2980_v46 = vadd.f32 %v3932_v18, %v3834_v5  ;;  %v3956_v5 = vpop.f32.mrf.mxu1 }
 0x40a   :  { %v2266_v35 = vpop.f32.mrf.mxu0 }
 0x40b   :  { %v3237_v32 = vadd.f32 %v5922_v33, %v2980_v46  ;;  %v2975_v57 = vadd.f32 %v2974_v41, %v2266_v35 }
 0x40d   :  { %3302 = vst.msk [vmem:[%s6266_s8 + $0x88] sm:$0xff] %vm3284_vm4, %v3237_v32  ;;  %v3236_v39 = vadd.f32 %v5922_v33, %v2975_v57  ;;  %v3054_v32 = vpop.f32.mrf.mxu1 }
 0x40f   :  { %3301 = vst.msk [vmem:[%s6266_s8 + $0x80] sm:$0xff] %vm3284_vm4, %v3236_v39 }
 0x410   :  { %v3837_v28 = vpop.f32.mrf.mxu0 }
 0x411   :  { %v2990_v0 = vadd.f32 %v3935_v24, %v3837_v28  ;;  %v3959_v28 = vpop.f32.mrf.mxu1 }
 0x412   :  { %v2276_v20 = vpop.f32.mrf.mxu0 }
 0x413   :  { %v3239_v44 = vadd.f32 %v5922_v33, %v2990_v0  ;;  %v2985_v9 = vadd.f32 %v2984_v55, %v2276_v20 }
 0x415   :  { %3304 = vst.msk [vmem:[%s6266_s8 + $0x98] sm:$0xff] %vm3284_vm4, %v3239_v44  ;;  %v3238_v10 = vadd.f32 %v5922_v33, %v2985_v9  ;;  %v3064_v44 = vpop.f32.mrf.mxu1 }
 0x417   :  { %3303 = vst.msk [vmem:[%s6266_s8 + $0x90] sm:$0xff] %vm3284_vm4, %v3238_v10 }
 0x418   :  { %v3840_v38 = vpop.f32.mrf.mxu0 }
 0x419   :  { %v3000_v6 = vadd.f32 %v3938_v4, %v3840_v38  ;;  %v3962_v38 = vpop.f32.mrf.mxu1 }
 0x41a   :  { %v2286_v1 = vpop.f32.mrf.mxu0 }
 0x41b   :  { %v3241_v54 = vadd.f32 %v5922_v33, %v3000_v6  ;;  %v2995_v30 = vadd.f32 %v2994_v59, %v2286_v1 }
 0x41d   :  { %3306 = vst.msk [vmem:[%s6266_s8 + $0xa8] sm:$0xff] %vm3284_vm4, %v3241_v54  ;;  %v3240_v27 = vadd.f32 %v5922_v33, %v2995_v30  ;;  %v3074_v54 = vpop.f32.mrf.mxu1 }
 0x41f   :  { %3305 = vst.msk [vmem:[%s6266_s8 + $0xa0] sm:$0xff] %vm3284_vm4, %v3240_v27 }
 0x420   :  { %v3843_v31 = vpop.f32.mrf.mxu0 }
 0x421   :  { %v3010_v43 = vadd.f32 %v3941_v15, %v3843_v31  ;;  %v3965_v31 = vpop.f32.mrf.mxu1 }
 0x422   :  { %v2296_v58 = vpop.f32.mrf.mxu0 }
 0x423   :  { %v3243_v7 = vadd.f32 %v5922_v33, %v3010_v43  ;;  %v3005_v56 = vadd.f32 %v3004_v45, %v2296_v58 }
 0x425   :  { %3308 = vst.msk [vmem:[%s6266_s8 + $0xb8] sm:$0xff] %vm3284_vm4, %v3243_v7  ;;  %v3242_v52 = vadd.f32 %v5922_v33, %v3005_v56  ;;  %v3084_v7 = vpop.f32.mrf.mxu1 }
 0x427   :  { %3307 = vst.msk [vmem:[%s6266_s8 + $0xb0] sm:$0xff] %vm3284_vm4, %v3242_v52 }
 0x428   :  { %v3846_v2 = vpop.f32.mrf.mxu0 }
 0x429   :  { %v3020_v63 = vadd.f32 %v3944_v26, %v3846_v2  ;;  %v3968_v2 = vpop.f32.mrf.mxu1 }
 0x42a   :  { %v2306_v37 = vpop.f32.mrf.mxu0 }
 0x42b   :  { %v3245_v34 = vadd.f32 %v5922_v33, %v3020_v63  ;;  %v3015_v51 = vadd.f32 %v3014_v8, %v2306_v37 }
 0x42d   :  { %3310 = vst.msk [vmem:[%s6266_s8 + $0xc8] sm:$0xff] %vm3284_vm4, %v3245_v34  ;;  %v3244_v17 = vadd.f32 %v5922_v33, %v3015_v51  ;;  %v3094_v34 = vpop.f32.mrf.mxu1 }
 0x42f   :  { %3309 = vst.msk [vmem:[%s6266_s8 + $0xc0] sm:$0xff] %vm3284_vm4, %v3244_v17 }
 0x430   :  { %v3849_v61 = vpop.f32.mrf.mxu0 }
 0x431   :  { %v3030_v19 = vadd.f32 %v3947_v11, %v3849_v61  ;;  %v3971_v61 = vpop.f32.mrf.mxu1 }
 0x432   :  { %v2316_v48 = vpop.f32.mrf.mxu0 }
 0x433   :  { %v3247_v49 = vadd.f32 %v5922_v33, %v3030_v19  ;;  %v3025_v47 = vadd.f32 %v3024_v14, %v2316_v48 }
 0x435   :  { %3312 = vst.msk [vmem:[%s6266_s8 + $0xd8] sm:$0xff] %vm3284_vm4, %v3247_v49  ;;  %v3246_v40 = vadd.f32 %v5922_v33, %v3025_v47  ;;  %v3104_v49 = vpop.f32.mrf.mxu1 }
 0x437   :  { %3311 = vst.msk [vmem:[%s6266_s8 + $0xd0] sm:$0xff] %vm3284_vm4, %v3246_v40 }
 0x438   :  { %v3852_v23 = vpop.f32.mrf.mxu0 }
 0x439   :  { %v3040_v13 = vadd.f32 %v3950_v21, %v3852_v23  ;;  %v3974_v23 = vpop.f32.mrf.mxu1 }
 0x43a   :  { %v2326_v25 = vpop.f32.mrf.mxu0 }
 0x43b   :  { %v3249_v29 = vadd.f32 %v5922_v33, %v3040_v13  ;;  %v3035_v50 = vadd.f32 %v3034_v53, %v2326_v25 }
 0x43d   :  { %3314 = vst.msk [vmem:[%s6266_s8 + $0xe8] sm:$0xff] %vm3284_vm4, %v3249_v29  ;;  %v3248_v22 = vadd.f32 %v5922_v33, %v3035_v50  ;;  %v3114_v29 = vpop.f32.mrf.mxu1 }
 0x43f   :  { %3313 = vst.msk [vmem:[%s6266_s8 + $0xe0] sm:$0xff] %vm3284_vm4, %v3248_v22 }
 0x440   :  { %v3855_v3 = vpop.f32.mrf.mxu0 }
 0x441   :  { %v3050_v60 = vadd.f32 %v3953_v62, %v3855_v3  ;;  %v3977_v3 = vpop.f32.mrf.mxu1 }
 0x442   :  { %v2336_v42 = vpop.f32.mrf.mxu0 }
 0x443   :  { %v3251_v16 = vadd.f32 %v5922_v33, %v3050_v60  ;;  %v3045_v12 = vadd.f32 %v3044_v36, %v2336_v42 }
 0x445   :  { %3316 = vst.msk [vmem:[%s6266_s8 + $0xf8] sm:$0xff] %vm3284_vm4, %v3251_v16  ;;  %v3250_v18 = vadd.f32 %v5922_v33, %v3045_v12  ;;  %v3124_v16 = vpop.f32.mrf.mxu1 }
 0x447   :  { %3315 = vst.msk [vmem:[%s6266_s8 + $0xf0] sm:$0xff] %vm3284_vm4, %v3250_v18 }
 0x448   :  { %v3858_v46 = vpop.f32.mrf.mxu0 }
 0x449   :  { %v3060_v35 = vadd.f32 %v3956_v5, %v3858_v46  ;;  %v3980_v46 = vpop.f32.mrf.mxu1 }
 0x44a   :  { %v2346_v41 = vpop.f32.mrf.mxu0 }
 0x44b   :  { %v3253_v57 = vadd.f32 %v5922_v33, %v3060_v35  ;;  %v3055_v39 = vadd.f32 %v3054_v32, %v2346_v41 }
 0x44d   :  { %3318 = vst.msk [vmem:[%s6266_s8 + $0x108] sm:$0xff] %vm3284_vm4, %v3253_v57  ;;  %v3252_v24 = vadd.f32 %v5922_v33, %v3055_v39  ;;  %v3134_v57 = vpop.f32.mrf.mxu1 }
 0x44f   :  { %3317 = vst.msk [vmem:[%s6266_s8 + $0x100] sm:$0xff] %vm3284_vm4, %v3252_v24 }
 0x450   :  { %v3861_v0 = vpop.f32.mrf.mxu0 }
 0x451   :  { %v3070_v20 = vadd.f32 %v3959_v28, %v3861_v0  ;;  %v3983_v0 = vpop.f32.mrf.mxu1 }
 0x452   :  { %v2356_v55 = vpop.f32.mrf.mxu0 }
 0x453   :  { %v3255_v9 = vadd.f32 %v5922_v33, %v3070_v20  ;;  %v3065_v10 = vadd.f32 %v3064_v44, %v2356_v55 }
 0x455   :  { %3320 = vst.msk [vmem:[%s6266_s8 + $0x118] sm:$0xff] %vm3284_vm4, %v3255_v9  ;;  %v3254_v4 = vadd.f32 %v5922_v33, %v3065_v10  ;;  %v3144_v9 = vpop.f32.mrf.mxu1 }
 0x457   :  { %3319 = vst.msk [vmem:[%s6266_s8 + $0x110] sm:$0xff] %vm3284_vm4, %v3254_v4 }
 0x458   :  { %v3864_v6 = vpop.f32.mrf.mxu0 }
 0x459   :  { %v3080_v1 = vadd.f32 %v3962_v38, %v3864_v6  ;;  %v3986_v6 = vpop.f32.mrf.mxu1 }
 0x45a   :  { %v2366_v59 = vpop.f32.mrf.mxu0 }
 0x45b   :  { %v3257_v30 = vadd.f32 %v5922_v33, %v3080_v1  ;;  %v3075_v27 = vadd.f32 %v3074_v54, %v2366_v59 }
 0x45d   :  { %3322 = vst.msk [vmem:[%s6266_s8 + $0x128] sm:$0xff] %vm3284_vm4, %v3257_v30  ;;  %v3256_v15 = vadd.f32 %v5922_v33, %v3075_v27  ;;  %v3154_v30 = vpop.f32.mrf.mxu1 }
 0x45f   :  { %3321 = vst.msk [vmem:[%s6266_s8 + $0x120] sm:$0xff] %vm3284_vm4, %v3256_v15 }
 0x460   :  { %v3867_v43 = vpop.f32.mrf.mxu0 }
 0x461   :  { %v3090_v58 = vadd.f32 %v3965_v31, %v3867_v43  ;;  %v3989_v43 = vpop.f32.mrf.mxu1 }
 0x462   :  { %v2376_v45 = vpop.f32.mrf.mxu0 }
 0x463   :  { %v3259_v56 = vadd.f32 %v5922_v33, %v3090_v58  ;;  %v3085_v52 = vadd.f32 %v3084_v7, %v2376_v45 }
 0x465   :  { %3324 = vst.msk [vmem:[%s6266_s8 + $0x138] sm:$0xff] %vm3284_vm4, %v3259_v56  ;;  %v3258_v26 = vadd.f32 %v5922_v33, %v3085_v52  ;;  %v3164_v56 = vpop.f32.mrf.mxu1 }
 0x467   :  { %3323 = vst.msk [vmem:[%s6266_s8 + $0x130] sm:$0xff] %vm3284_vm4, %v3258_v26 }
 0x468   :  { %v3870_v63 = vpop.f32.mrf.mxu0 }
 0x469   :  { %v3100_v37 = vadd.f32 %v3968_v2, %v3870_v63  ;;  %v3992_v63 = vpop.f32.mrf.mxu1 }
 0x46a   :  { %v2386_v8 = vpop.f32.mrf.mxu0 }
 0x46b   :  { %v3261_v51 = vadd.f32 %v5922_v33, %v3100_v37  ;;  %v3095_v17 = vadd.f32 %v3094_v34, %v2386_v8 }
 0x46d   :  { %3326 = vst.msk [vmem:[%s6266_s8 + $0x148] sm:$0xff] %vm3284_vm4, %v3261_v51  ;;  %v3260_v11 = vadd.f32 %v5922_v33, %v3095_v17  ;;  %v3174_v51 = vpop.f32.mrf.mxu1 }
 0x46f   :  { %3325 = vst.msk [vmem:[%s6266_s8 + $0x140] sm:$0xff] %vm3284_vm4, %v3260_v11 }
 0x470   :  { %v3873_v19 = vpop.f32.mrf.mxu0 }
 0x471   :  { %v3110_v48 = vadd.f32 %v3971_v61, %v3873_v19  ;;  %v3995_v19 = vpop.f32.mrf.mxu1 }
 0x472   :  { %v2396_v14 = vpop.f32.mrf.mxu0 }
 0x473   :  { %v3263_v47 = vadd.f32 %v5922_v33, %v3110_v48  ;;  %v3105_v40 = vadd.f32 %v3104_v49, %v2396_v14 }
 0x475   :  { %3328 = vst.msk [vmem:[%s6266_s8 + $0x158] sm:$0xff] %vm3284_vm4, %v3263_v47  ;;  %v3262_v21 = vadd.f32 %v5922_v33, %v3105_v40  ;;  %v3184_v47 = vpop.f32.mrf.mxu1 }
 0x477   :  { %3327 = vst.msk [vmem:[%s6266_s8 + $0x150] sm:$0xff] %vm3284_vm4, %v3262_v21 }
 0x478   :  { %v3876_v13 = vpop.f32.mrf.mxu0 }
 0x479   :  { %v3120_v25 = vadd.f32 %v3974_v23, %v3876_v13  ;;  %v3998_v13 = vpop.f32.mrf.mxu1 }
 0x47a   :  { %v2406_v53 = vpop.f32.mrf.mxu0 }
 0x47b   :  { %v3265_v50 = vadd.f32 %v5922_v33, %v3120_v25  ;;  %v3115_v22 = vadd.f32 %v3114_v29, %v2406_v53 }
 0x47d   :  { %3330 = vst.msk [vmem:[%s6266_s8 + $0x168] sm:$0xff] %vm3284_vm4, %v3265_v50  ;;  %v3264_v62 = vadd.f32 %v5922_v33, %v3115_v22  ;;  %v3194_v50 = vpop.f32.mrf.mxu1 }
 0x47f   :  { %3329 = vst.msk [vmem:[%s6266_s8 + $0x160] sm:$0xff] %vm3284_vm4, %v3264_v62 }
 0x480   :  { %v3879_v60 = vpop.f32.mrf.mxu0 }
 0x481   :  { %v3130_v42 = vadd.f32 %v3977_v3, %v3879_v60  ;;  %v4001_v60 = vpop.f32.mrf.mxu1 }
 0x482   :  { %v2416_v36 = vpop.f32.mrf.mxu0 }
 0x483   :  { %v3267_v12 = vadd.f32 %v5922_v33, %v3130_v42  ;;  %v3125_v18 = vadd.f32 %v3124_v16, %v2416_v36 }
 0x485   :  { %3332 = vst.msk [vmem:[%s6266_s8 + $0x178] sm:$0xff] %vm3284_vm4, %v3267_v12  ;;  %v3266_v5 = vadd.f32 %v5922_v33, %v3125_v18  ;;  %v3204_v12 = vpop.f32.mrf.mxu1 }
 0x487   :  { %3331 = vst.msk [vmem:[%s6266_s8 + $0x170] sm:$0xff] %vm3284_vm4, %v3266_v5 }
 0x488   :  { %v3882_v35 = vpop.f32.mrf.mxu0 }
 0x489   :  { %v3140_v41 = vadd.f32 %v3980_v46, %v3882_v35 }
 0x48a   :  { %v2426_v32 = vpop.f32.mrf.mxu0 }
 0x48b   :  { %v3269_v39 = vadd.f32 %v5922_v33, %v3140_v41  ;;  %v3135_v24 = vadd.f32 %v3134_v57, %v2426_v32 }
 0x48d   :  { %3334 = vst.msk [vmem:[%s6266_s8 + $0x188] sm:$0xff] %vm3284_vm4, %v3269_v39  ;;  %v3268_v28 = vadd.f32 %v5922_v33, %v3135_v24 }
 0x48f   :  { %3333 = vst.msk [vmem:[%s6266_s8 + $0x180] sm:$0xff] %vm3284_vm4, %v3268_v28 }
 0x490   :  { %v3885_v20 = vpop.f32.mrf.mxu0 }
 0x491   :  { %v3150_v55 = vadd.f32 %v3983_v0, %v3885_v20 }
 0x492   :  { %v2436_v44 = vpop.f32.mrf.mxu0 }
 0x493   :  { %v3271_v10 = vadd.f32 %v5922_v33, %v3150_v55  ;;  %v3145_v4 = vadd.f32 %v3144_v9, %v2436_v44 }
 0x495   :  { %3336 = vst.msk [vmem:[%s6266_s8 + $0x198] sm:$0xff] %vm3284_vm4, %v3271_v10  ;;  %v3270_v38 = vadd.f32 %v5922_v33, %v3145_v4 }
 0x497   :  { %3335 = vst.msk [vmem:[%s6266_s8 + $0x190] sm:$0xff] %vm3284_vm4, %v3270_v38 }
 0x498   :  { %v3888_v1 = vpop.f32.mrf.mxu0 }
 0x499   :  { %v3160_v59 = vadd.f32 %v3986_v6, %v3888_v1 }
 0x49a   :  { %v2446_v54 = vpop.f32.mrf.mxu0 }
 0x49b   :  { %v3273_v27 = vadd.f32 %v5922_v33, %v3160_v59  ;;  %v3155_v15 = vadd.f32 %v3154_v30, %v2446_v54 }
 0x49d   :  { %3338 = vst.msk [vmem:[%s6266_s8 + $0x1a8] sm:$0xff] %vm3284_vm4, %v3273_v27  ;;  %v3272_v31 = vadd.f32 %v5922_v33, %v3155_v15 }
 0x49f   :  { %3337 = vst.msk [vmem:[%s6266_s8 + $0x1a0] sm:$0xff] %vm3284_vm4, %v3272_v31 }
 0x4a0   :  { %v3891_v58 = vpop.f32.mrf.mxu0 }
 0x4a1   :  { %v3170_v45 = vadd.f32 %v3989_v43, %v3891_v58 }
 0x4a2   :  { %v2456_v7 = vpop.f32.mrf.mxu0 }
 0x4a3   :  { %v3275_v52 = vadd.f32 %v5922_v33, %v3170_v45  ;;  %v3165_v26 = vadd.f32 %v3164_v56, %v2456_v7 }
 0x4a5   :  { %3340 = vst.msk [vmem:[%s6266_s8 + $0x1b8] sm:$0xff] %vm3284_vm4, %v3275_v52  ;;  %v3274_v2 = vadd.f32 %v5922_v33, %v3165_v26 }
 0x4a7   :  { %3339 = vst.msk [vmem:[%s6266_s8 + $0x1b0] sm:$0xff] %vm3284_vm4, %v3274_v2 }
 0x4a8   :  { %v3894_v37 = vpop.f32.mrf.mxu0 }
 0x4a9   :  { %v3180_v8 = vadd.f32 %v3992_v63, %v3894_v37 }
 0x4aa   :  { %v2466_v34 = vpop.f32.mrf.mxu0 }
 0x4ab   :  { %v3277_v17 = vadd.f32 %v5922_v33, %v3180_v8  ;;  %v3175_v11 = vadd.f32 %v3174_v51, %v2466_v34 }
 0x4ad   :  { %3342 = vst.msk [vmem:[%s6266_s8 + $0x1c8] sm:$0xff] %vm3284_vm4, %v3277_v17  ;;  %v3276_v61 = vadd.f32 %v5922_v33, %v3175_v11 }
 0x4af   :  { %3341 = vst.msk [vmem:[%s6266_s8 + $0x1c0] sm:$0xff] %vm3284_vm4, %v3276_v61 }
 0x4b0   :  { %v3897_v48 = vpop.f32.mrf.mxu0 }
 0x4b1   :  { %v3190_v14 = vadd.f32 %v3995_v19, %v3897_v48 }
 0x4b2   :  { %v2476_v49 = vpop.f32.mrf.mxu0 }
 0x4b3   :  { %v3279_v40 = vadd.f32 %v5922_v33, %v3190_v14  ;;  %v3185_v21 = vadd.f32 %v3184_v47, %v2476_v49 }
 0x4b5   :  { %3344 = vst.msk [vmem:[%s6266_s8 + $0x1d8] sm:$0xff] %vm3284_vm4, %v3279_v40  ;;  %v3278_v23 = vadd.f32 %v5922_v33, %v3185_v21 }
 0x4b7   :  { %3343 = vst.msk [vmem:[%s6266_s8 + $0x1d0] sm:$0xff] %vm3284_vm4, %v3278_v23 }
 0x4b8   :  { %v3900_v25 = vpop.f32.mrf.mxu0 }
 0x4b9   :  { %v3200_v53 = vadd.f32 %v3998_v13, %v3900_v25 }
 0x4ba   :  { %v2486_v29 = vpop.f32.mrf.mxu0 }
 0x4bb   :  { %v3281_v22 = vadd.f32 %v5922_v33, %v3200_v53  ;;  %v3195_v62 = vadd.f32 %v3194_v50, %v2486_v29 }
 0x4bd   :  { %3346 = vst.msk [vmem:[%s6266_s8 + $0x1e8] sm:$0xff] %vm3284_vm4, %v3281_v22  ;;  %v3280_v3 = vadd.f32 %v5922_v33, %v3195_v62 }
 0x4bf   :  { %3345 = vst.msk [vmem:[%s6266_s8 + $0x1e0] sm:$0xff] %vm3284_vm4, %v3280_v3 }
 0x4c0   :  { %v3903_v42 = vpop.f32.mrf.mxu0 }
 0x4c1   :  { %v3210_v36 = vadd.f32 %v4001_v60, %v3903_v42 }
 0x4c2   :  { %v2496_v16 = vpop.f32.mrf.mxu0 }
 0x4c3   :  { %v3283_v18 = vadd.f32 %v5922_v33, %v3210_v36  ;;  %v3205_v5 = vadd.f32 %v3204_v12, %v2496_v16 }
 0x4c5   :  { %3348 = vst.msk [vmem:[%s6266_s8 + $0x1f8] sm:$0xff] %vm3284_vm4, %v3283_v18  ;;  %v3282_v46 = vadd.f32 %v5922_v33, %v3205_v5 }
 0x4c7   :  { %3347 = vst.msk [vmem:[%s6266_s8 + $0x1f0] sm:$0xff] %vm3284_vm4, %v3282_v46 }

</bundles_post_ra>
